<compile_context>
chip_gen: v7x
topology: tpu7x:2x2x1
jax: 0.10.0
libtpu: 0.0.40
codegen_flags: <defaults>
</compile_context>

<pallas_src>
import functools

import numpy as np
import jax
import jax.numpy as jnp
from jax import lax
from jax.experimental import pallas as pl
from jax.experimental.pallas import tpu as pltpu

EPS = 1e-5
LANE = 128

# synthetic binary 3x3 pruning pattern (pattern_dic is undefined in the source module)
PATTERN = ((1, 0, 1),
           (0, 1, 0),
           (1, 0, 1))
# static list of non-zero taps of the pattern-masked conv2
TAPS = tuple((kh, kw) for kh in range(3) for kw in range(3) if PATTERN[kh][kw])


def _round_up(x, m):
    return (x + m - 1) // m * m


# ---------------------------------------------------------------------------
# Fused Pallas kernel (flat-slab formulation)
# ---------------------------------------------------------------------------
def _make_fused_kernel(H, W, RPAD, taps):
    """bn1+relu -> conv1(3x3) -> bn2+relu -> masked conv2(3x3) -> (+ bn_sc -> conv1x1)."""
    W2 = W + 2                 # padded image width
    M = H * W2                 # slab rows (output rows; 2 garbage columns per image row)
    INT0 = W2 + 1              # interior store offset: slab row p -> pad row p + W2 + 1
    BOT0 = (H + 1) * W2        # first pad row not covered by the interior store (bottom halo)

    def kernel(x_ref, s1_ref, b1_ref, w1_ref, s2_ref, b2_ref, w2_ref,
               ssc_ref, bsc_ref, wsc_ref, o_ref, padf1_ref, padf2_ref, acc_ref):
        # column-validity mask for the slab rows (j < W), shared by both stages
        p_idx = lax.broadcasted_iota(jnp.int32, (M, 1), 0)
        col_ok = (p_idx % W2) < W

        def fill_pad(p_ref, h):
            """Write relu(bn(.)) slab into a flat zero-padded bf16 image scratch.

            Store offset INT0 places slab row (i, j) at pad position (i+1, j+1); the masked
            columns j in {W, W+1} land exactly on the right/left halo columns, so only the
            top and bottom halo row-ranges need explicit zero stores.
            """
            c = p_ref.shape[1]
            p_ref[0:INT0, :] = jnp.zeros((INT0, c), p_ref.dtype)
            p_ref[BOT0:RPAD, :] = jnp.zeros((RPAD - BOT0, c), p_ref.dtype)
            p_ref[INT0:INT0 + M, :] = jnp.where(col_ok, h, 0.0).astype(p_ref.dtype)

        # -- stage 1: bn1 (folded) + ReLU -> bf16 padded slab ---------------------------------
        x = x_ref[0]                                             # (M, Cip), channel-padded
        fill_pad(padf1_ref, jnp.maximum(x * s1_ref[...] + b1_ref[...], 0.0))

        # conv1: 9 taps, each tap is a contiguous sublane-shifted slice of the flat slab
        for t in range(9):
            kh, kw = t // 3, t % 3
            off = kh * W2 + kw
            d = jnp.dot(padf1_ref[off:off + M, :], w1_ref[t],
                        preferred_element_type=jnp.float32)
            if t == 0:
                acc_ref[...] = d            # first tap initializes the shared accumulator
            else:
                acc_ref[...] += d

        # dropout(0.3) is identity in eval mode.

        # -- stage 2: bn2 (folded) + ReLU -> bf16 padded slab; pattern-masked conv2 -----------
        fill_pad(padf2_ref,
                 jnp.maximum(acc_ref[...] * s2_ref[...] + b2_ref[...], 0.0))

        # shortcut (bn_sc folded, no ReLU) + 1x1 conv re-initializes the reused accumulator
        xs = (x * ssc_ref[...] + bsc_ref[...]).astype(jnp.bfloat16)
        acc_ref[...] = jnp.dot(xs, wsc_ref[...], preferred_element_type=jnp.float32)

        # only the structurally non-zero taps of the pruned conv2
        for t, (kh, kw) in enumerate(taps):
            off = kh * W2 + kw
            acc_ref[...] += jnp.dot(padf2_ref[off:off + M, :], w2_ref[t],
                                    preferred_element_type=jnp.float32)

        o_ref[0] = acc_ref[...].astype(o_ref.dtype)

    return kernel


# ---------------------------------------------------------------------------
# pallas_call wrapper
# ---------------------------------------------------------------------------
def _fused_block(x_nhwc, p, taps, planes, out_dtype=jnp.float32):
    N, H, W, Cin = x_nhwc.shape
    Cip, Cp = p["w1"].shape[1], p["w1"].shape[2]
    T = len(taps)
    W2 = W + 2
    M = H * W2
    RPAD = _round_up((H + 2) * W2 + 2, 8)
    assert M % 8 == 0, "slab row count must be sublane aligned"

    # lane-dense channel padding + 2 zero columns on the right, flattened to the (M, C) slab
    x_slab = jnp.pad(x_nhwc, ((0, 0), (0, 0), (0, 2), (0, Cip - Cin))).reshape(N, M, Cip)

    out = pl.pallas_call(
        _make_fused_kernel(H, W, RPAD, taps),
        out_shape=jax.ShapeDtypeStruct((N, M, Cp), out_dtype),
        grid_spec=pltpu.PrefetchScalarGridSpec(
            num_scalar_prefetch=0,
            grid=(N,),
            in_specs=[
                pl.BlockSpec((1, M, Cip), lambda n: (n, 0, 0)),   # x slab
                pl.BlockSpec((1, Cip), lambda n: (0, 0)),         # bn1 scale (folded)
                pl.BlockSpec((1, Cip), lambda n: (0, 0)),         # bn1 bias  (folded)
                pl.BlockSpec((9, Cip, Cp), lambda n: (0, 0, 0)),  # conv1 weights (bf16)
                pl.BlockSpec((1, Cp), lambda n: (0, 0)),          # bn2 scale
                pl.BlockSpec((1, Cp), lambda n: (0, 0)),          # bn2 bias
                pl.BlockSpec((T, Cp, Cp), lambda n: (0, 0, 0)),   # conv2 non-zero taps (bf16)
                pl.BlockSpec((1, Cip), lambda n: (0, 0)),         # bn_sc scale
                pl.BlockSpec((1, Cip), lambda n: (0, 0)),         # bn_sc bias
                pl.BlockSpec((Cip, Cp), lambda n: (0, 0)),        # 1x1 shortcut weights (bf16)
            ],
            out_specs=pl.BlockSpec((1, M, Cp), lambda n: (n, 0, 0)),
            scratch_shapes=[
                pltpu.VMEM((RPAD, Cip), jnp.bfloat16),   # padded relu(bn1(x)) slab
                pltpu.VMEM((RPAD, Cp), jnp.bfloat16),    # padded relu(bn2(conv1)) slab
                pltpu.VMEM((M, Cp), jnp.float32),        # shared f32 accumulator
            ],
        ),
        compiler_params=pltpu.CompilerParams(
            dimension_semantics=("parallel",),
            # toy-shape working set is ~2 MiB; 48 MiB keeps headroom for real WRN widths while
            # staying inside v7x's 64 MiB per-TC VMEM (raise toward 96 MiB on v5e/v6e only).
            vmem_limit_bytes=48 * 1024 * 1024,
        ),
    )(x_slab, p["scale1"], p["bias1"], p["w1"],
      p["scale2"], p["bias2"], p["w2_taps"],
      p["scale_sc"], p["bias_sc"], p["wsc"])

    # drop the 2 garbage slab columns and the padded channels (layout plumbing, wrapper-side)
    return out.reshape(N, H, W2, Cp)[:, :, :W, :planes]


def wide_basic_block_q_forward(x_nchw, params, static):
    """Full block forward. Input/Output are NCHW like the PyTorch module."""
    x = jnp.transpose(x_nchw, (0, 2, 3, 1)).astype(jnp.float32)    # -> NHWC
    out = _fused_block(x, params, static["taps"], static["planes"])
    return jnp.transpose(out, (0, 3, 1, 2))                        # -> NCHW


# ---------------------------------------------------------------------------
# Deterministic parameter setup (glue)
# ---------------------------------------------------------------------------
def _bn_raw(key, c):
    k1, k2, k3, k4 = jax.random.split(key, 4)
    gamma = jax.random.uniform(k1, (c,), jnp.float32, 0.5, 1.5)
    beta = jax.random.normal(k2, (c,), jnp.float32) * 0.1
    mean = jax.random.normal(k3, (c,), jnp.float32) * 0.1
    var = jax.random.uniform(k4, (c,), jnp.float32, 0.5, 1.5)
    return gamma, beta, mean, var


def _fold_bn(bn):
    gamma, beta, mean, var = bn
    scale = gamma / jnp.sqrt(var + EPS)
    bias = beta - mean * scale
    return scale, bias


def _pad_vec(v, c):
    return jnp.pad(v, (0, c - v.shape[0])).reshape(1, c)


def init_params(key, in_planes, planes):
    k = jax.random.split(key, 6)
    bn1 = _bn_raw(k[0], in_planes)
    bn2 = _bn_raw(k[1], planes)
    bnsc = _bn_raw(k[2], in_planes)
    w1_oihw = jax.random.normal(k[3], (planes, in_planes, 3, 3), jnp.float32) * 0.1
    w2_oihw = jax.random.normal(k[4], (planes, planes, 3, 3), jnp.float32) * 0.1
    wsc_oihw = jax.random.normal(k[5], (planes, in_planes, 1, 1), jnp.float32) * 0.1

    pattern = jnp.asarray(PATTERN, jnp.float32)
    w2m_oihw = w2_oihw * pattern[None, None, :, :]      # masked weights (for the reference)

    Cip = _round_up(in_planes, LANE)
    Cp = _round_up(planes, LANE)

    s1, b1 = _fold_bn(bn1)
    s2, b2 = _fold_bn(bn2)
    ssc, bsc = _fold_bn(bnsc)

    w1_hwio = jnp.transpose(w1_oihw, (2, 3, 1, 0))                  # OIHW -> HWIO
    w2_hwio = jnp.transpose(w2_oihw, (2, 3, 1, 0))
    wsc_io = jnp.transpose(wsc_oihw, (2, 3, 1, 0)).reshape(in_planes, planes)

    w1_taps9 = w1_hwio.reshape(9, in_planes, planes)                # tap t = kh*3 + kw
    # only the non-zero taps of the masked conv2 (mask == 1 there, so the unmasked slice equals
    # the masked weight at those taps; zero taps are skipped structurally in the kernel)
    w2_taps = jnp.stack([w2_hwio[kh, kw] for kh, kw in TAPS])       # (T, in, out)

    params = dict(
        scale1=_pad_vec(s1, Cip), bias1=_pad_vec(b1, Cip),
        scale2=_pad_vec(s2, Cp), bias2=_pad_vec(b2, Cp),
        scale_sc=_pad_vec(ssc, Cip), bias_sc=_pad_vec(bsc, Cip),
        w1=jnp.pad(w1_taps9, ((0, 0), (0, Cip - in_planes),
                              (0, Cp - planes))).astype(jnp.bfloat16),
        w2_taps=jnp.pad(w2_taps, ((0, 0), (0, Cp - planes),
                                  (0, Cp - planes))).astype(jnp.bfloat16),
        wsc=jnp.pad(wsc_io, ((0, Cip - in_planes),
                             (0, Cp - planes))).astype(jnp.bfloat16),
    )
    static = dict(taps=TAPS, planes=planes, in_planes=in_planes)
    raw = dict(bn1=bn1, bn2=bn2, bnsc=bnsc, w1_oihw=w1_oihw,
               w2m_oihw=w2m_oihw, wsc_oihw=wsc_oihw)
    return params, static, raw


# ---------------------------------------------------------------------------
# Pure-JAX reference (same folded-BN + bf16-operand numerics as the kernel)
# ---------------------------------------------------------------------------
def _ref_forward(x_nchw, raw):
    def bn(x, p):
        scale, bias = _fold_bn(p)
        return x * scale[None, :, None, None] + bias[None, :, None, None]

    def conv(x, w, pad):
        return lax.conv_general_dilated(
            x.astype(jnp.bfloat16), w.astype(jnp.bfloat16), (1, 1), pad,
            dimension_numbers=("NCHW", "OIHW", "NCHW"),
            preferred_element_type=jnp.float32)

    h = jax.nn.relu(bn(x_nchw, raw["bn1"]))
    out = conv(h, raw["w1_oihw"], ((1, 1), (1, 1)))
    h2 = jax.nn.relu(bn(out, raw["bn2"]))
    out2 = conv(h2, raw["w2m_oihw"], ((1, 1), (1, 1)))
    sc = conv(bn(x_nchw, raw["bnsc"]), raw["wsc_oihw"], ((0, 0), (0, 0)))
    return out2 + sc


# ---------------------------------------------------------------------------
if __name__ == "__main__":
    N, in_planes, planes, H, W = 2, 4, 8, 16, 16

    key = jax.random.PRNGKey(0)
    kx, kp = jax.random.split(key)
    x = jax.random.normal(kx, (N, in_planes, H, W), jnp.float32)   # NCHW, as in PyTorch

    params, static, raw = init_params(kp, in_planes, planes)

    fwd = jax.jit(functools.partial(wide_basic_block_q_forward, static=static))
    out = jax.block_until_ready(fwd(x, params))

    ref = jax.block_until_ready(_ref_forward(x, raw))
    np.testing.assert_allclose(np.asarray(out), np.asarray(ref), rtol=1e-2, atol=1e-2)

    print("KERNEL_OK")
</pallas_src>

<mosaic_0001>
module attributes {stable_mosaic.version = 11 : i64} {
  func.func @kernel(%arg0: i32, %arg1: memref<1x288x128xf32, #tpu.memory_space<vmem>>, %arg2: memref<1x128xf32, #tpu.memory_space<vmem>>, %arg3: memref<1x128xf32, #tpu.memory_space<vmem>>, %arg4: memref<9x128x128xbf16, #tpu.memory_space<vmem>>, %arg5: memref<1x128xf32, #tpu.memory_space<vmem>>, %arg6: memref<1x128xf32, #tpu.memory_space<vmem>>, %arg7: memref<5x128x128xbf16, #tpu.memory_space<vmem>>, %arg8: memref<1x128xf32, #tpu.memory_space<vmem>>, %arg9: memref<1x128xf32, #tpu.memory_space<vmem>>, %arg10: memref<128x128xbf16, #tpu.memory_space<vmem>>, %arg11: memref<1x288x128xf32, #tpu.memory_space<vmem>>, %arg12: memref<328x128xbf16, #tpu.memory_space<vmem>>, %arg13: memref<328x128xbf16, #tpu.memory_space<vmem>>, %arg14: memref<288x128xf32, #tpu.memory_space<vmem>>) attributes {dimension_semantics = [#tpu.dimension_semantics<parallel>], iteration_bounds = array<i64: 2>, scalar_prefetch = 0 : i64, scratch_operands = 3 : i64, tpu.core_type = #tpu.core_type<tc>, window_params = [{transform_indices = @transform_0, window_bounds = array<i64: 1, 288, 128>}, {pipeline_mode = #tpu.pipeline_mode<synchronous>, transform_indices = @transform_1, window_bounds = array<i64: 1, 128>}, {pipeline_mode = #tpu.pipeline_mode<synchronous>, transform_indices = @transform_2, window_bounds = array<i64: 1, 128>}, {pipeline_mode = #tpu.pipeline_mode<synchronous>, transform_indices = @transform_3, window_bounds = array<i64: 9, 128, 128>}, {pipeline_mode = #tpu.pipeline_mode<synchronous>, transform_indices = @transform_4, window_bounds = array<i64: 1, 128>}, {pipeline_mode = #tpu.pipeline_mode<synchronous>, transform_indices = @transform_5, window_bounds = array<i64: 1, 128>}, {pipeline_mode = #tpu.pipeline_mode<synchronous>, transform_indices = @transform_6, window_bounds = array<i64: 5, 128, 128>}, {pipeline_mode = #tpu.pipeline_mode<synchronous>, transform_indices = @transform_7, window_bounds = array<i64: 1, 128>}, {pipeline_mode = #tpu.pipeline_mode<synchronous>, transform_indices = @transform_8, window_bounds = array<i64: 1, 128>}, {pipeline_mode = #tpu.pipeline_mode<synchronous>, transform_indices = @transform_9, window_bounds = array<i64: 128, 128>}, {transform_indices = @transform_10, window_bounds = array<i64: 1, 288, 128>}]} {
    %0 = tpu.iota {dimensions = array<i32: 0>} : vector<288x1xi32>
    %c18_i32 = arith.constant 18 : i32
    %c0_i32 = arith.constant 0 : i32
    %1 = arith.cmpi eq, %c18_i32, %c0_i32 : i32
    %c1_i32 = arith.constant 1 : i32
    %2 = arith.select %1, %c1_i32, %c18_i32 : i32
    %3 = vector.broadcast %2 : i32 to vector<288x1xi32>
    %4 = arith.remsi %0, %3 : vector<288x1xi32>
    %c0_i32_0 = arith.constant 0 : i32
    %5 = vector.broadcast %c0_i32_0 : i32 to vector<288x1xi32>
    %6 = arith.cmpi ne, %4, %5 : vector<288x1xi32>
    %c0_i32_1 = arith.constant 0 : i32
    %7 = vector.broadcast %c0_i32_1 : i32 to vector<288x1xi32>
    %8 = arith.cmpi slt, %4, %7 : vector<288x1xi32>
    %c0_i32_2 = arith.constant 0 : i32
    %9 = arith.cmpi slt, %2, %c0_i32_2 : i32
    %10 = vector.broadcast %9 : i1 to vector<288x1xi1>
    %11 = vector.broadcast %10 : vector<288x1xi1> to vector<288x1xi1>
    %12 = arith.xori %8, %11 : vector<288x1xi1>
    %13 = arith.andi %12, %6 : vector<288x1xi1>
    %14 = vector.broadcast %2 : i32 to vector<288x1xi32>
    %15 = arith.addi %4, %14 : vector<288x1xi32>
    %16 = arith.select %13, %15, %4 : vector<288x1xi1>, vector<288x1xi32>
    %c16_i32 = arith.constant 16 : i32
    %17 = vector.broadcast %c16_i32 : i32 to vector<288x1xi32>
    %18 = arith.cmpi slt, %16, %17 : vector<288x1xi32>
    %c0 = arith.constant 0 : index
    %c0_3 = arith.constant 0 : index
    %c0_4 = arith.constant 0 : index
    %19 = vector.load %arg1[%c0, %c0_3, %c0_4] : memref<1x288x128xf32, #tpu.memory_space<vmem>>, vector<1x288x128xf32>
    %20 = vector.shape_cast %19 : vector<1x288x128xf32> to vector<288x128xf32>
    %c0_5 = arith.constant 0 : index
    %c0_6 = arith.constant 0 : index
    %21 = vector.load %arg2[%c0_5, %c0_6] : memref<1x128xf32, #tpu.memory_space<vmem>>, vector<1x128xf32>
    %22 = vector.broadcast %21 : vector<1x128xf32> to vector<288x128xf32>
    %23 = arith.mulf %20, %22 : vector<288x128xf32>
    %c0_7 = arith.constant 0 : index
    %c0_8 = arith.constant 0 : index
    %24 = vector.load %arg3[%c0_7, %c0_8] : memref<1x128xf32, #tpu.memory_space<vmem>>, vector<1x128xf32>
    %25 = vector.broadcast %24 : vector<1x128xf32> to vector<288x128xf32>
    %26 = arith.addf %23, %25 : vector<288x128xf32>
    %cst = arith.constant 0.000000e+00 : f32
    %27 = vector.broadcast %cst : f32 to vector<288x128xf32>
    %28 = arith.maximumf %26, %27 : vector<288x128xf32>
    %cst_9 = arith.constant 0.000000e+00 : bf16
    %29 = vector.broadcast %cst_9 : bf16 to vector<19x128xbf16>
    %c0_10 = arith.constant 0 : index
    %c0_11 = arith.constant 0 : index
    %30 = vector.load %arg12[%c0_10, %c0_11] : memref<328x128xbf16, #tpu.memory_space<vmem>>, vector<19x128xbf16>
    tpu.vector_store %arg12[%c0_10, %c0_11], %29 {strides = array<i32>} : memref<328x128xbf16, #tpu.memory_space<vmem>>, vector<19x128xbf16>,
    %cst_12 = arith.constant 0.000000e+00 : bf16
    %31 = vector.broadcast %cst_12 : bf16 to vector<22x128xbf16>
    %c306 = arith.constant 306 : index
    %c0_13 = arith.constant 0 : index
    %32 = vector.load %arg12[%c306, %c0_13] : memref<328x128xbf16, #tpu.memory_space<vmem>>, vector<22x128xbf16>
    tpu.vector_store %arg12[%c306, %c0_13], %31 {strides = array<i32>} : memref<328x128xbf16, #tpu.memory_space<vmem>>, vector<22x128xbf16>,
    %cst_14 = arith.constant 0.000000e+00 : f32
    %33 = vector.shape_cast %18 : vector<288x1xi1> to vector<288x1xi1>
    %34 = vector.broadcast %33 : vector<288x1xi1> to vector<288x128xi1>
    %35 = vector.broadcast %cst_14 : f32 to vector<288x128xf32>
    %36 = arith.select %34, %28, %35 : vector<288x128xi1>, vector<288x128xf32>
    %37 = arith.truncf %36 : vector<288x128xf32> to vector<288x128xbf16>
    %c19 = arith.constant 19 : index
    %c0_15 = arith.constant 0 : index
    %38 = vector.load %arg12[%c19, %c0_15] : memref<328x128xbf16, #tpu.memory_space<vmem>>, vector<288x128xbf16>
    tpu.vector_store %arg12[%c19, %c0_15], %37 {strides = array<i32>} : memref<328x128xbf16, #tpu.memory_space<vmem>>, vector<288x128xbf16>,
    %c0_16 = arith.constant 0 : index
    %c0_17 = arith.constant 0 : index
    %39 = vector.load %arg12[%c0_16, %c0_17] : memref<328x128xbf16, #tpu.memory_space<vmem>>, vector<288x128xbf16>
    %c0_18 = arith.constant 0 : index
    %c0_19 = arith.constant 0 : index
    %c0_20 = arith.constant 0 : index
    %40 = vector.load %arg4[%c0_18, %c0_19, %c0_20] : memref<9x128x128xbf16, #tpu.memory_space<vmem>>, vector<1x128x128xbf16>
    %41 = vector.shape_cast %40 : vector<1x128x128xbf16> to vector<128x128xbf16>
    %cst_21 = arith.constant dense<0.000000e+00> : vector<288x128xf32>
    %42 = tpu.matmul %39, %41, %cst_21 {dimension_numbers = #tpu.dot_dimension_numbers<[1], [0], [0], [1], [0, 0, 1, 1], [], []>} : vector<288x128xbf16>, vector<128x128xbf16>, vector<288x128xf32> -> vector<288x128xf32>
    %c0_22 = arith.constant 0 : index
    %c0_23 = arith.constant 0 : index
    %43 = vector.load %arg14[%c0_22, %c0_23] : memref<288x128xf32, #tpu.memory_space<vmem>>, vector<288x128xf32>
    tpu.vector_store %arg14[%c0_22, %c0_23], %42 {strides = array<i32>} : memref<288x128xf32, #tpu.memory_space<vmem>>, vector<288x128xf32>,
    %c1 = arith.constant 1 : index
    %c0_24 = arith.constant 0 : index
    %44 = vector.load %arg12[%c1, %c0_24] : memref<328x128xbf16, #tpu.memory_space<vmem>>, vector<288x128xbf16>
    %c1_25 = arith.constant 1 : index
    %c0_26 = arith.constant 0 : index
    %c0_27 = arith.constant 0 : index
    %45 = vector.load %arg4[%c1_25, %c0_26, %c0_27] : memref<9x128x128xbf16, #tpu.memory_space<vmem>>, vector<1x128x128xbf16>
    %46 = vector.shape_cast %45 : vector<1x128x128xbf16> to vector<128x128xbf16>
    %cst_28 = arith.constant dense<0.000000e+00> : vector<288x128xf32>
    %47 = tpu.matmul %44, %46, %cst_28 {dimension_numbers = #tpu.dot_dimension_numbers<[1], [0], [0], [1], [0, 0, 1, 1], [], []>} : vector<288x128xbf16>, vector<128x128xbf16>, vector<288x128xf32> -> vector<288x128xf32>
    %c0_29 = arith.constant 0 : index
    %c0_30 = arith.constant 0 : index
    %48 = vector.load %arg14[%c0_29, %c0_30] : memref<288x128xf32, #tpu.memory_space<vmem>>, vector<288x128xf32>
    %49 = arith.addf %48, %47 : vector<288x128xf32>
    %c0_31 = arith.constant 0 : index
    %c0_32 = arith.constant 0 : index
    %50 = vector.load %arg14[%c0_31, %c0_32] : memref<288x128xf32, #tpu.memory_space<vmem>>, vector<288x128xf32>
    tpu.vector_store %arg14[%c0_31, %c0_32], %49 {strides = array<i32>} : memref<288x128xf32, #tpu.memory_space<vmem>>, vector<288x128xf32>,
    %c2 = arith.constant 2 : index
    %c0_33 = arith.constant 0 : index
    %51 = vector.load %arg12[%c2, %c0_33] : memref<328x128xbf16, #tpu.memory_space<vmem>>, vector<288x128xbf16>
    %c2_34 = arith.constant 2 : index
    %c0_35 = arith.constant 0 : index
    %c0_36 = arith.constant 0 : index
    %52 = vector.load %arg4[%c2_34, %c0_35, %c0_36] : memref<9x128x128xbf16, #tpu.memory_space<vmem>>, vector<1x128x128xbf16>
    %53 = vector.shape_cast %52 : vector<1x128x128xbf16> to vector<128x128xbf16>
    %cst_37 = arith.constant dense<0.000000e+00> : vector<288x128xf32>
    %54 = tpu.matmul %51, %53, %cst_37 {dimension_numbers = #tpu.dot_dimension_numbers<[1], [0], [0], [1], [0, 0, 1, 1], [], []>} : vector<288x128xbf16>, vector<128x128xbf16>, vector<288x128xf32> -> vector<288x128xf32>
    %c0_38 = arith.constant 0 : index
    %c0_39 = arith.constant 0 : index
    %55 = vector.load %arg14[%c0_38, %c0_39] : memref<288x128xf32, #tpu.memory_space<vmem>>, vector<288x128xf32>
    %56 = arith.addf %55, %54 : vector<288x128xf32>
    %c0_40 = arith.constant 0 : index
    %c0_41 = arith.constant 0 : index
    %57 = vector.load %arg14[%c0_40, %c0_41] : memref<288x128xf32, #tpu.memory_space<vmem>>, vector<288x128xf32>
    tpu.vector_store %arg14[%c0_40, %c0_41], %56 {strides = array<i32>} : memref<288x128xf32, #tpu.memory_space<vmem>>, vector<288x128xf32>,
    %c18 = arith.constant 18 : index
    %c0_42 = arith.constant 0 : index
    %58 = vector.load %arg12[%c18, %c0_42] : memref<328x128xbf16, #tpu.memory_space<vmem>>, vector<288x128xbf16>
    %c3 = arith.constant 3 : index
    %c0_43 = arith.constant 0 : index
    %c0_44 = arith.constant 0 : index
    %59 = vector.load %arg4[%c3, %c0_43, %c0_44] : memref<9x128x128xbf16, #tpu.memory_space<vmem>>, vector<1x128x128xbf16>
    %60 = vector.shape_cast %59 : vector<1x128x128xbf16> to vector<128x128xbf16>
    %cst_45 = arith.constant dense<0.000000e+00> : vector<288x128xf32>
    %61 = tpu.matmul %58, %60, %cst_45 {dimension_numbers = #tpu.dot_dimension_numbers<[1], [0], [0], [1], [0, 0, 1, 1], [], []>} : vector<288x128xbf16>, vector<128x128xbf16>, vector<288x128xf32> -> vector<288x128xf32>
    %c0_46 = arith.constant 0 : index
    %c0_47 = arith.constant 0 : index
    %62 = vector.load %arg14[%c0_46, %c0_47] : memref<288x128xf32, #tpu.memory_space<vmem>>, vector<288x128xf32>
    %63 = arith.addf %62, %61 : vector<288x128xf32>
    %c0_48 = arith.constant 0 : index
    %c0_49 = arith.constant 0 : index
    %64 = vector.load %arg14[%c0_48, %c0_49] : memref<288x128xf32, #tpu.memory_space<vmem>>, vector<288x128xf32>
    tpu.vector_store %arg14[%c0_48, %c0_49], %63 {strides = array<i32>} : memref<288x128xf32, #tpu.memory_space<vmem>>, vector<288x128xf32>,
    %c19_50 = arith.constant 19 : index
    %c0_51 = arith.constant 0 : index
    %65 = vector.load %arg12[%c19_50, %c0_51] : memref<328x128xbf16, #tpu.memory_space<vmem>>, vector<288x128xbf16>
    %c4 = arith.constant 4 : index
    %c0_52 = arith.constant 0 : index
    %c0_53 = arith.constant 0 : index
    %66 = vector.load %arg4[%c4, %c0_52, %c0_53] : memref<9x128x128xbf16, #tpu.memory_space<vmem>>, vector<1x128x128xbf16>
    %67 = vector.shape_cast %66 : vector<1x128x128xbf16> to vector<128x128xbf16>
    %cst_54 = arith.constant dense<0.000000e+00> : vector<288x128xf32>
    %68 = tpu.matmul %65, %67, %cst_54 {dimension_numbers = #tpu.dot_dimension_numbers<[1], [0], [0], [1], [0, 0, 1, 1], [], []>} : vector<288x128xbf16>, vector<128x128xbf16>, vector<288x128xf32> -> vector<288x128xf32>
    %c0_55 = arith.constant 0 : index
    %c0_56 = arith.constant 0 : index
    %69 = vector.load %arg14[%c0_55, %c0_56] : memref<288x128xf32, #tpu.memory_space<vmem>>, vector<288x128xf32>
    %70 = arith.addf %69, %68 : vector<288x128xf32>
    %c0_57 = arith.constant 0 : index
    %c0_58 = arith.constant 0 : index
    %71 = vector.load %arg14[%c0_57, %c0_58] : memref<288x128xf32, #tpu.memory_space<vmem>>, vector<288x128xf32>
    tpu.vector_store %arg14[%c0_57, %c0_58], %70 {strides = array<i32>} : memref<288x128xf32, #tpu.memory_space<vmem>>, vector<288x128xf32>,
    %c20 = arith.constant 20 : index
    %c0_59 = arith.constant 0 : index
    %72 = vector.load %arg12[%c20, %c0_59] : memref<328x128xbf16, #tpu.memory_space<vmem>>, vector<288x128xbf16>
    %c5 = arith.constant 5 : index
    %c0_60 = arith.constant 0 : index
    %c0_61 = arith.constant 0 : index
    %73 = vector.load %arg4[%c5, %c0_60, %c0_61] : memref<9x128x128xbf16, #tpu.memory_space<vmem>>, vector<1x128x128xbf16>
    %74 = vector.shape_cast %73 : vector<1x128x128xbf16> to vector<128x128xbf16>
    %cst_62 = arith.constant dense<0.000000e+00> : vector<288x128xf32>
    %75 = tpu.matmul %72, %74, %cst_62 {dimension_numbers = #tpu.dot_dimension_numbers<[1], [0], [0], [1], [0, 0, 1, 1], [], []>} : vector<288x128xbf16>, vector<128x128xbf16>, vector<288x128xf32> -> vector<288x128xf32>
    %c0_63 = arith.constant 0 : index
    %c0_64 = arith.constant 0 : index
    %76 = vector.load %arg14[%c0_63, %c0_64] : memref<288x128xf32, #tpu.memory_space<vmem>>, vector<288x128xf32>
    %77 = arith.addf %76, %75 : vector<288x128xf32>
    %c0_65 = arith.constant 0 : index
    %c0_66 = arith.constant 0 : index
    %78 = vector.load %arg14[%c0_65, %c0_66] : memref<288x128xf32, #tpu.memory_space<vmem>>, vector<288x128xf32>
    tpu.vector_store %arg14[%c0_65, %c0_66], %77 {strides = array<i32>} : memref<288x128xf32, #tpu.memory_space<vmem>>, vector<288x128xf32>,
    %c36 = arith.constant 36 : index
    %c0_67 = arith.constant 0 : index
    %79 = vector.load %arg12[%c36, %c0_67] : memref<328x128xbf16, #tpu.memory_space<vmem>>, vector<288x128xbf16>
    %c6 = arith.constant 6 : index
    %c0_68 = arith.constant 0 : index
    %c0_69 = arith.constant 0 : index
    %80 = vector.load %arg4[%c6, %c0_68, %c0_69] : memref<9x128x128xbf16, #tpu.memory_space<vmem>>, vector<1x128x128xbf16>
    %81 = vector.shape_cast %80 : vector<1x128x128xbf16> to vector<128x128xbf16>
    %cst_70 = arith.constant dense<0.000000e+00> : vector<288x128xf32>
    %82 = tpu.matmul %79, %81, %cst_70 {dimension_numbers = #tpu.dot_dimension_numbers<[1], [0], [0], [1], [0, 0, 1, 1], [], []>} : vector<288x128xbf16>, vector<128x128xbf16>, vector<288x128xf32> -> vector<288x128xf32>
    %c0_71 = arith.constant 0 : index
    %c0_72 = arith.constant 0 : index
    %83 = vector.load %arg14[%c0_71, %c0_72] : memref<288x128xf32, #tpu.memory_space<vmem>>, vector<288x128xf32>
    %84 = arith.addf %83, %82 : vector<288x128xf32>
    %c0_73 = arith.constant 0 : index
    %c0_74 = arith.constant 0 : index
    %85 = vector.load %arg14[%c0_73, %c0_74] : memref<288x128xf32, #tpu.memory_space<vmem>>, vector<288x128xf32>
    tpu.vector_store %arg14[%c0_73, %c0_74], %84 {strides = array<i32>} : memref<288x128xf32, #tpu.memory_space<vmem>>, vector<288x128xf32>,
    %c37 = arith.constant 37 : index
    %c0_75 = arith.constant 0 : index
    %86 = vector.load %arg12[%c37, %c0_75] : memref<328x128xbf16, #tpu.memory_space<vmem>>, vector<288x128xbf16>
    %c7 = arith.constant 7 : index
    %c0_76 = arith.constant 0 : index
    %c0_77 = arith.constant 0 : index
    %87 = vector.load %arg4[%c7, %c0_76, %c0_77] : memref<9x128x128xbf16, #tpu.memory_space<vmem>>, vector<1x128x128xbf16>
    %88 = vector.shape_cast %87 : vector<1x128x128xbf16> to vector<128x128xbf16>
    %cst_78 = arith.constant dense<0.000000e+00> : vector<288x128xf32>
    %89 = tpu.matmul %86, %88, %cst_78 {dimension_numbers = #tpu.dot_dimension_numbers<[1], [0], [0], [1], [0, 0, 1, 1], [], []>} : vector<288x128xbf16>, vector<128x128xbf16>, vector<288x128xf32> -> vector<288x128xf32>
    %c0_79 = arith.constant 0 : index
    %c0_80 = arith.constant 0 : index
    %90 = vector.load %arg14[%c0_79, %c0_80] : memref<288x128xf32, #tpu.memory_space<vmem>>, vector<288x128xf32>
    %91 = arith.addf %90, %89 : vector<288x128xf32>
    %c0_81 = arith.constant 0 : index
    %c0_82 = arith.constant 0 : index
    %92 = vector.load %arg14[%c0_81, %c0_82] : memref<288x128xf32, #tpu.memory_space<vmem>>, vector<288x128xf32>
    tpu.vector_store %arg14[%c0_81, %c0_82], %91 {strides = array<i32>} : memref<288x128xf32, #tpu.memory_space<vmem>>, vector<288x128xf32>,
    %c38 = arith.constant 38 : index
    %c0_83 = arith.constant 0 : index
    %93 = vector.load %arg12[%c38, %c0_83] : memref<328x128xbf16, #tpu.memory_space<vmem>>, vector<288x128xbf16>
    %c8 = arith.constant 8 : index
    %c0_84 = arith.constant 0 : index
    %c0_85 = arith.constant 0 : index
    %94 = vector.load %arg4[%c8, %c0_84, %c0_85] : memref<9x128x128xbf16, #tpu.memory_space<vmem>>, vector<1x128x128xbf16>
    %95 = vector.shape_cast %94 : vector<1x128x128xbf16> to vector<128x128xbf16>
    %cst_86 = arith.constant dense<0.000000e+00> : vector<288x128xf32>
    %96 = tpu.matmul %93, %95, %cst_86 {dimension_numbers = #tpu.dot_dimension_numbers<[1], [0], [0], [1], [0, 0, 1, 1], [], []>} : vector<288x128xbf16>, vector<128x128xbf16>, vector<288x128xf32> -> vector<288x128xf32>
    %c0_87 = arith.constant 0 : index
    %c0_88 = arith.constant 0 : index
    %97 = vector.load %arg14[%c0_87, %c0_88] : memref<288x128xf32, #tpu.memory_space<vmem>>, vector<288x128xf32>
    %98 = arith.addf %97, %96 : vector<288x128xf32>
    %c0_89 = arith.constant 0 : index
    %c0_90 = arith.constant 0 : index
    %99 = vector.load %arg14[%c0_89, %c0_90] : memref<288x128xf32, #tpu.memory_space<vmem>>, vector<288x128xf32>
    tpu.vector_store %arg14[%c0_89, %c0_90], %98 {strides = array<i32>} : memref<288x128xf32, #tpu.memory_space<vmem>>, vector<288x128xf32>,
    %c0_91 = arith.constant 0 : index
    %c0_92 = arith.constant 0 : index
    %100 = vector.load %arg14[%c0_91, %c0_92] : memref<288x128xf32, #tpu.memory_space<vmem>>, vector<288x128xf32>
    %c0_93 = arith.constant 0 : index
    %c0_94 = arith.constant 0 : index
    %101 = vector.load %arg5[%c0_93, %c0_94] : memref<1x128xf32, #tpu.memory_space<vmem>>, vector<1x128xf32>
    %102 = vector.broadcast %101 : vector<1x128xf32> to vector<288x128xf32>
    %103 = arith.mulf %100, %102 : vector<288x128xf32>
    %c0_95 = arith.constant 0 : index
    %c0_96 = arith.constant 0 : index
    %104 = vector.load %arg6[%c0_95, %c0_96] : memref<1x128xf32, #tpu.memory_space<vmem>>, vector<1x128xf32>
    %105 = vector.broadcast %104 : vector<1x128xf32> to vector<288x128xf32>
    %106 = arith.addf %103, %105 : vector<288x128xf32>
    %cst_97 = arith.constant 0.000000e+00 : f32
    %107 = vector.broadcast %cst_97 : f32 to vector<288x128xf32>
    %108 = arith.maximumf %106, %107 : vector<288x128xf32>
    %cst_98 = arith.constant 0.000000e+00 : bf16
    %109 = vector.broadcast %cst_98 : bf16 to vector<19x128xbf16>
    %c0_99 = arith.constant 0 : index
    %c0_100 = arith.constant 0 : index
    %110 = vector.load %arg13[%c0_99, %c0_100] : memref<328x128xbf16, #tpu.memory_space<vmem>>, vector<19x128xbf16>
    tpu.vector_store %arg13[%c0_99, %c0_100], %109 {strides = array<i32>} : memref<328x128xbf16, #tpu.memory_space<vmem>>, vector<19x128xbf16>,
    %cst_101 = arith.constant 0.000000e+00 : bf16
    %111 = vector.broadcast %cst_101 : bf16 to vector<22x128xbf16>
    %c306_102 = arith.constant 306 : index
    %c0_103 = arith.constant 0 : index
    %112 = vector.load %arg13[%c306_102, %c0_103] : memref<328x128xbf16, #tpu.memory_space<vmem>>, vector<22x128xbf16>
    tpu.vector_store %arg13[%c306_102, %c0_103], %111 {strides = array<i32>} : memref<328x128xbf16, #tpu.memory_space<vmem>>, vector<22x128xbf16>,
    %cst_104 = arith.constant 0.000000e+00 : f32
    %113 = vector.shape_cast %18 : vector<288x1xi1> to vector<288x1xi1>
    %114 = vector.broadcast %113 : vector<288x1xi1> to vector<288x128xi1>
    %115 = vector.broadcast %cst_104 : f32 to vector<288x128xf32>
    %116 = arith.select %114, %108, %115 : vector<288x128xi1>, vector<288x128xf32>
    %117 = arith.truncf %116 : vector<288x128xf32> to vector<288x128xbf16>
    %c19_105 = arith.constant 19 : index
    %c0_106 = arith.constant 0 : index
    %118 = vector.load %arg13[%c19_105, %c0_106] : memref<328x128xbf16, #tpu.memory_space<vmem>>, vector<288x128xbf16>
    tpu.vector_store %arg13[%c19_105, %c0_106], %117 {strides = array<i32>} : memref<328x128xbf16, #tpu.memory_space<vmem>>, vector<288x128xbf16>,
    %c0_107 = arith.constant 0 : index
    %c0_108 = arith.constant 0 : index
    %119 = vector.load %arg8[%c0_107, %c0_108] : memref<1x128xf32, #tpu.memory_space<vmem>>, vector<1x128xf32>
    %120 = vector.broadcast %119 : vector<1x128xf32> to vector<288x128xf32>
    %121 = arith.mulf %20, %120 : vector<288x128xf32>
    %c0_109 = arith.constant 0 : index
    %c0_110 = arith.constant 0 : index
    %122 = vector.load %arg9[%c0_109, %c0_110] : memref<1x128xf32, #tpu.memory_space<vmem>>, vector<1x128xf32>
    %123 = vector.broadcast %122 : vector<1x128xf32> to vector<288x128xf32>
    %124 = arith.addf %121, %123 : vector<288x128xf32>
    %125 = arith.truncf %124 : vector<288x128xf32> to vector<288x128xbf16>
    %c0_111 = arith.constant 0 : index
    %c0_112 = arith.constant 0 : index
    %126 = vector.load %arg10[%c0_111, %c0_112] : memref<128x128xbf16, #tpu.memory_space<vmem>>, vector<128x128xbf16>
    %cst_113 = arith.constant dense<0.000000e+00> : vector<288x128xf32>
    %127 = tpu.matmul %125, %126, %cst_113 {dimension_numbers = #tpu.dot_dimension_numbers<[1], [0], [0], [1], [0, 0, 1, 1], [], []>} : vector<288x128xbf16>, vector<128x128xbf16>, vector<288x128xf32> -> vector<288x128xf32>
    %c0_114 = arith.constant 0 : index
    %c0_115 = arith.constant 0 : index
    %128 = vector.load %arg14[%c0_114, %c0_115] : memref<288x128xf32, #tpu.memory_space<vmem>>, vector<288x128xf32>
    tpu.vector_store %arg14[%c0_114, %c0_115], %127 {strides = array<i32>} : memref<288x128xf32, #tpu.memory_space<vmem>>, vector<288x128xf32>,
    %c0_116 = arith.constant 0 : index
    %c0_117 = arith.constant 0 : index
    %129 = vector.load %arg14[%c0_116, %c0_117] : memref<288x128xf32, #tpu.memory_space<vmem>>, vector<288x128xf32>
    %c0_118 = arith.constant 0 : index
    %c0_119 = arith.constant 0 : index
    %130 = vector.load %arg13[%c0_118, %c0_119] : memref<328x128xbf16, #tpu.memory_space<vmem>>, vector<288x128xbf16>
    %c0_120 = arith.constant 0 : index
    %c0_121 = arith.constant 0 : index
    %c0_122 = arith.constant 0 : index
    %131 = vector.load %arg7[%c0_120, %c0_121, %c0_122] : memref<5x128x128xbf16, #tpu.memory_space<vmem>>, vector<1x128x128xbf16>
    %132 = vector.shape_cast %131 : vector<1x128x128xbf16> to vector<128x128xbf16>
    %cst_123 = arith.constant dense<0.000000e+00> : vector<288x128xf32>
    %133 = tpu.matmul %130, %132, %cst_123 {dimension_numbers = #tpu.dot_dimension_numbers<[1], [0], [0], [1], [0, 0, 1, 1], [], []>} : vector<288x128xbf16>, vector<128x128xbf16>, vector<288x128xf32> -> vector<288x128xf32>
    %134 = arith.addf %129, %133 : vector<288x128xf32>
    %c0_124 = arith.constant 0 : index
    %c0_125 = arith.constant 0 : index
    %135 = vector.load %arg14[%c0_124, %c0_125] : memref<288x128xf32, #tpu.memory_space<vmem>>, vector<288x128xf32>
    tpu.vector_store %arg14[%c0_124, %c0_125], %134 {strides = array<i32>} : memref<288x128xf32, #tpu.memory_space<vmem>>, vector<288x128xf32>,
    %c0_126 = arith.constant 0 : index
    %c0_127 = arith.constant 0 : index
    %136 = vector.load %arg14[%c0_126, %c0_127] : memref<288x128xf32, #tpu.memory_space<vmem>>, vector<288x128xf32>
    %c2_128 = arith.constant 2 : index
    %c0_129 = arith.constant 0 : index
    %137 = vector.load %arg13[%c2_128, %c0_129] : memref<328x128xbf16, #tpu.memory_space<vmem>>, vector<288x128xbf16>
    %c1_130 = arith.constant 1 : index
    %c0_131 = arith.constant 0 : index
    %c0_132 = arith.constant 0 : index
    %138 = vector.load %arg7[%c1_130, %c0_131, %c0_132] : memref<5x128x128xbf16, #tpu.memory_space<vmem>>, vector<1x128x128xbf16>
    %139 = vector.shape_cast %138 : vector<1x128x128xbf16> to vector<128x128xbf16>
    %cst_133 = arith.constant dense<0.000000e+00> : vector<288x128xf32>
    %140 = tpu.matmul %137, %139, %cst_133 {dimension_numbers = #tpu.dot_dimension_numbers<[1], [0], [0], [1], [0, 0, 1, 1], [], []>} : vector<288x128xbf16>, vector<128x128xbf16>, vector<288x128xf32> -> vector<288x128xf32>
    %141 = arith.addf %136, %140 : vector<288x128xf32>
    %c0_134 = arith.constant 0 : index
    %c0_135 = arith.constant 0 : index
    %142 = vector.load %arg14[%c0_134, %c0_135] : memref<288x128xf32, #tpu.memory_space<vmem>>, vector<288x128xf32>
    tpu.vector_store %arg14[%c0_134, %c0_135], %141 {strides = array<i32>} : memref<288x128xf32, #tpu.memory_space<vmem>>, vector<288x128xf32>,
    %c0_136 = arith.constant 0 : index
    %c0_137 = arith.constant 0 : index
    %143 = vector.load %arg14[%c0_136, %c0_137] : memref<288x128xf32, #tpu.memory_space<vmem>>, vector<288x128xf32>
    %c19_138 = arith.constant 19 : index
    %c0_139 = arith.constant 0 : index
    %144 = vector.load %arg13[%c19_138, %c0_139] : memref<328x128xbf16, #tpu.memory_space<vmem>>, vector<288x128xbf16>
    %c2_140 = arith.constant 2 : index
    %c0_141 = arith.constant 0 : index
    %c0_142 = arith.constant 0 : index
    %145 = vector.load %arg7[%c2_140, %c0_141, %c0_142] : memref<5x128x128xbf16, #tpu.memory_space<vmem>>, vector<1x128x128xbf16>
    %146 = vector.shape_cast %145 : vector<1x128x128xbf16> to vector<128x128xbf16>
    %cst_143 = arith.constant dense<0.000000e+00> : vector<288x128xf32>
    %147 = tpu.matmul %144, %146, %cst_143 {dimension_numbers = #tpu.dot_dimension_numbers<[1], [0], [0], [1], [0, 0, 1, 1], [], []>} : vector<288x128xbf16>, vector<128x128xbf16>, vector<288x128xf32> -> vector<288x128xf32>
    %148 = arith.addf %143, %147 : vector<288x128xf32>
    %c0_144 = arith.constant 0 : index
    %c0_145 = arith.constant 0 : index
    %149 = vector.load %arg14[%c0_144, %c0_145] : memref<288x128xf32, #tpu.memory_space<vmem>>, vector<288x128xf32>
    tpu.vector_store %arg14[%c0_144, %c0_145], %148 {strides = array<i32>} : memref<288x128xf32, #tpu.memory_space<vmem>>, vector<288x128xf32>,
    %c0_146 = arith.constant 0 : index
    %c0_147 = arith.constant 0 : index
    %150 = vector.load %arg14[%c0_146, %c0_147] : memref<288x128xf32, #tpu.memory_space<vmem>>, vector<288x128xf32>
    %c36_148 = arith.constant 36 : index
    %c0_149 = arith.constant 0 : index
    %151 = vector.load %arg13[%c36_148, %c0_149] : memref<328x128xbf16, #tpu.memory_space<vmem>>, vector<288x128xbf16>
    %c3_150 = arith.constant 3 : index
    %c0_151 = arith.constant 0 : index
    %c0_152 = arith.constant 0 : index
    %152 = vector.load %arg7[%c3_150, %c0_151, %c0_152] : memref<5x128x128xbf16, #tpu.memory_space<vmem>>, vector<1x128x128xbf16>
    %153 = vector.shape_cast %152 : vector<1x128x128xbf16> to vector<128x128xbf16>
    %cst_153 = arith.constant dense<0.000000e+00> : vector<288x128xf32>
    %154 = tpu.matmul %151, %153, %cst_153 {dimension_numbers = #tpu.dot_dimension_numbers<[1], [0], [0], [1], [0, 0, 1, 1], [], []>} : vector<288x128xbf16>, vector<128x128xbf16>, vector<288x128xf32> -> vector<288x128xf32>
    %155 = arith.addf %150, %154 : vector<288x128xf32>
    %c0_154 = arith.constant 0 : index
    %c0_155 = arith.constant 0 : index
    %156 = vector.load %arg14[%c0_154, %c0_155] : memref<288x128xf32, #tpu.memory_space<vmem>>, vector<288x128xf32>
    tpu.vector_store %arg14[%c0_154, %c0_155], %155 {strides = array<i32>} : memref<288x128xf32, #tpu.memory_space<vmem>>, vector<288x128xf32>,
    %c0_156 = arith.constant 0 : index
    %c0_157 = arith.constant 0 : index
    %157 = vector.load %arg14[%c0_156, %c0_157] : memref<288x128xf32, #tpu.memory_space<vmem>>, vector<288x128xf32>
    %c38_158 = arith.constant 38 : index
    %c0_159 = arith.constant 0 : index
    %158 = vector.load %arg13[%c38_158, %c0_159] : memref<328x128xbf16, #tpu.memory_space<vmem>>, vector<288x128xbf16>
    %c4_160 = arith.constant 4 : index
    %c0_161 = arith.constant 0 : index
    %c0_162 = arith.constant 0 : index
    %159 = vector.load %arg7[%c4_160, %c0_161, %c0_162] : memref<5x128x128xbf16, #tpu.memory_space<vmem>>, vector<1x128x128xbf16>
    %160 = vector.shape_cast %159 : vector<1x128x128xbf16> to vector<128x128xbf16>
    %cst_163 = arith.constant dense<0.000000e+00> : vector<288x128xf32>
    %161 = tpu.matmul %158, %160, %cst_163 {dimension_numbers = #tpu.dot_dimension_numbers<[1], [0], [0], [1], [0, 0, 1, 1], [], []>} : vector<288x128xbf16>, vector<128x128xbf16>, vector<288x128xf32> -> vector<288x128xf32>
    %162 = arith.addf %157, %161 : vector<288x128xf32>
    %c0_164 = arith.constant 0 : index
    %c0_165 = arith.constant 0 : index
    %163 = vector.load %arg14[%c0_164, %c0_165] : memref<288x128xf32, #tpu.memory_space<vmem>>, vector<288x128xf32>
    tpu.vector_store %arg14[%c0_164, %c0_165], %162 {strides = array<i32>} : memref<288x128xf32, #tpu.memory_space<vmem>>, vector<288x128xf32>,
    %c0_166 = arith.constant 0 : index
    %c0_167 = arith.constant 0 : index
    %164 = vector.load %arg14[%c0_166, %c0_167] : memref<288x128xf32, #tpu.memory_space<vmem>>, vector<288x128xf32>
    %c0_168 = arith.constant 0 : index
    %c0_169 = arith.constant 0 : index
    %c0_170 = arith.constant 0 : index
    %165 = vector.load %arg11[%c0_168, %c0_169, %c0_170] : memref<1x288x128xf32, #tpu.memory_space<vmem>>, vector<1x288x128xf32>
    %166 = vector.shape_cast %165 : vector<1x288x128xf32> to vector<288x128xf32>
    %167 = vector.shape_cast %164 : vector<288x128xf32> to vector<1x288x128xf32>
    tpu.vector_store %arg11[%c0_168, %c0_169, %c0_170], %167 {strides = array<i32>} : memref<1x288x128xf32, #tpu.memory_space<vmem>>, vector<1x288x128xf32>,
    return
  }
  func.func @transform_0(%arg0: i32) -> (i32, i32, i32) {
    %c0_i32 = arith.constant 0 : i32
    %c0_i32_0 = arith.constant 0 : i32
    %c0_i32_1 = arith.constant 0 : i32
    return %arg0, %c0_i32, %c0_i32_0 : i32, i32, i32
  }
  func.func @transform_1(%arg0: i32) -> (i32, i32) {
    %c0_i32 = arith.constant 0 : i32
    %c0_i32_0 = arith.constant 0 : i32
    %c0_i32_1 = arith.constant 0 : i32
    return %c0_i32, %c0_i32_0 : i32, i32
  }
  func.func @transform_2(%arg0: i32) -> (i32, i32) {
    %c0_i32 = arith.constant 0 : i32
    %c0_i32_0 = arith.constant 0 : i32
    %c0_i32_1 = arith.constant 0 : i32
    return %c0_i32, %c0_i32_0 : i32, i32
  }
  func.func @transform_3(%arg0: i32) -> (i32, i32, i32) {
    %c0_i32 = arith.constant 0 : i32
    %c0_i32_0 = arith.constant 0 : i32
    %c0_i32_1 = arith.constant 0 : i32
    %c0_i32_2 = arith.constant 0 : i32
    return %c0_i32, %c0_i32_0, %c0_i32_1 : i32, i32, i32
  }
  func.func @transform_4(%arg0: i32) -> (i32, i32) {
    %c0_i32 = arith.constant 0 : i32
    %c0_i32_0 = arith.constant 0 : i32
    %c0_i32_1 = arith.constant 0 : i32
    return %c0_i32, %c0_i32_0 : i32, i32
  }
  func.func @transform_5(%arg0: i32) -> (i32, i32) {
    %c0_i32 = arith.constant 0 : i32
    %c0_i32_0 = arith.constant 0 : i32
    %c0_i32_1 = arith.constant 0 : i32
    return %c0_i32, %c0_i32_0 : i32, i32
  }
  func.func @transform_6(%arg0: i32) -> (i32, i32, i32) {
    %c0_i32 = arith.constant 0 : i32
    %c0_i32_0 = arith.constant 0 : i32
    %c0_i32_1 = arith.constant 0 : i32
    %c0_i32_2 = arith.constant 0 : i32
    return %c0_i32, %c0_i32_0, %c0_i32_1 : i32, i32, i32
  }
  func.func @transform_7(%arg0: i32) -> (i32, i32) {
    %c0_i32 = arith.constant 0 : i32
    %c0_i32_0 = arith.constant 0 : i32
    %c0_i32_1 = arith.constant 0 : i32
    return %c0_i32, %c0_i32_0 : i32, i32
  }
  func.func @transform_8(%arg0: i32) -> (i32, i32) {
    %c0_i32 = arith.constant 0 : i32
    %c0_i32_0 = arith.constant 0 : i32
    %c0_i32_1 = arith.constant 0 : i32
    return %c0_i32, %c0_i32_0 : i32, i32
  }
  func.func @transform_9(%arg0: i32) -> (i32, i32) {
    %c0_i32 = arith.constant 0 : i32
    %c0_i32_0 = arith.constant 0 : i32
    %c0_i32_1 = arith.constant 0 : i32
    return %c0_i32, %c0_i32_0 : i32, i32
  }
  func.func @transform_10(%arg0: i32) -> (i32, i32, i32) {
    %c0_i32 = arith.constant 0 : i32
    %c0_i32_0 = arith.constant 0 : i32
    %c0_i32_1 = arith.constant 0 : i32
    return %arg0, %c0_i32, %c0_i32_0 : i32, i32, i32
  }
}

</mosaic_0001>

<bundles_post_ra>
// kernel: wide_basic_block_q_forward.1
= control target key start
LH: loop header
LB: loop body
LE: loop exit
PB: predicated region body
PF: predicated region fallthrough
CT: control target
= control target key end

     0   :  { %s13912_s13 = smov 0   ;;  %s16194_s0 = inlined_call_operand.vmem [shape: f32[2,288,128], index: 0, kind: input, shape index: {}]   ;;  %s16195_s1 = inlined_call_operand.vmem [shape: f32[1,128], index: 1, kind: input, shape index: {}]   ;;  %s16196_s2 = inlined_call_operand.vmem [shape: f32[1,128], index: 2, kind: input, shape index: {}]   ;;  %s16197_s3 = inlined_call_operand.vmem [shape: bf16[9,128,128], index: 3, kind: input, shape index: {}]   ;;  %s16198_s4 = inlined_call_operand.vmem [shape: f32[1,128], index: 4, kind: input, shape index: {}]   ;;  %s16199_s5 = inlined_call_operand.vmem [shape: f32[1,128], index: 5, kind: input, shape index: {}]   ;;  %s16200_s6 = inlined_call_operand.vmem [shape: bf16[5,128,128], index: 6, kind: input, shape index: {}]   ;;  %s16201_s7 = inlined_call_operand.vmem [shape: f32[1,128], index: 7, kind: input, shape index: {}]   ;;  %s16202_s8 = inlined_call_operand.vmem [shape: f32[1,128], index: 8, kind: input, shape index: {}]   ;;  %s16203_s9 = inlined_call_operand.vmem [shape: bf16[128,128], index: 9, kind: input, shape index: {}]   ;;  %s16204_s10 = inlined_call_operand.vmem [shape: f32[2,288,128], index: 10, kind: output, shape index: {}]  }
   0x1 LB: > { %s10942_s14 = sadd.s32 4294967295, %s13854_s13   ;;  %p10946_p0 = scmp.ge.s32.totalorder %s13854_s13, 1  ;;  %s13854_s13 = sphi %s13912_s13, %s20_s13  }
   0x2   : > { %p312_p1 = scmp.lt.s32.totalorder %s13854_s13, 3 }
   0x4   : > { %p313_p2 = pnand %p10946_p0, %p312_p1 }
   0x6   : > { %316 = sbr.rel (%p313_p2) target bundleno = 1503 (0x5df), region = 60 }
   0xd   : > { %v13413_v0 = vld [vmem:[%s16197_s3 + $0x40] sm:$0xff]   ;;  %p350_p3 = scmp.lt.s32.totalorder %s10942_s14, 1  ;;  %v361_v1 = vlaneseq  ;;  %v13414_v2 = vld [vmem:[%s16197_s3 + $0x48] sm:$0xff]   ;;  %v13856_v3 = vmov 0   ;;  %v13415_v5 = vld [vmem:[%s16197_s3 + $0x50] sm:$0xff]   ;;  %vm1170_vm0 = vcmask 1041408  }
   0xe   : > { %12119 = vmatprep.subr.bf16.mxu0 %v13413_v0  ;;  %1168 = vst [vmem:[#allocation2] sm:$0xf] %v13856_v3  ;;  %1169 = vst [vmem:[#allocation2 + $0x4] sm:$0xf] %v13856_v3  ;;  %v13416_v7 = vld [vmem:[%s16197_s3 + $0x58] sm:$0xff]   ;;  %v16253_v18 = vmov 0 }
   0xf   : > { %s16515_s14 = smov (!%p350_p3, %s10942_s14), 1  ;;  %1176 = vst [vmem:[#allocation2 + $0x98] sm:$0xe] %v13856_v3  ;;  %1177 = vst [vmem:[#allocation2 + $0x9c] sm:$0xf] %v13856_v3  ;;  %12120 = vmatpush3.bf16.msra.mxu0 %v13413_v0  ;;  %v13928_v4 = vshrl.u32 %v361_v1, 7 }
  0x10   : > { %1178 = vst [vmem:[#allocation2 + $0xa0] sm:$0xf] %v13856_v3  ;;  %7079 = vst [vmem:[#allocation3] sm:$0xf] %v13856_v3  ;;  %12121 = vmatprep.subr.bf16.mxu0 %v13414_v2  ;;  %s13331_s21 = smul.u32 288, %s16515_s14  ;;  %v13417_v22 = vld [vmem:[%s16197_s3 + $0x60] sm:$0xff]  }
  0x11   : > { %7080 = vst [vmem:[#allocation3 + $0x4] sm:$0xf] %v13856_v3  ;;  %7084 = vst [vmem:[#allocation3 + $0x98] sm:$0xe] %v13856_v3  ;;  %v363_v6 = vadd.s32 8, %v13928_v4  ;;  %v13974_v21 = vadd.s32 16, %v13928_v4 }
  0x12   : > { %7085 = vst [vmem:[#allocation3 + $0x9c] sm:$0xf] %v13856_v3  ;;  %7086 = vst [vmem:[#allocation3 + $0xa0] sm:$0xf] %v13856_v3  ;;  %s13940_s24 = scalar_lea.vmem %s16194_s0, %s13331_s21  ;;  %v13946_v8 = vmul.u32.u64.low 3817748708, %v13928_v4  ;;  %v13947_v9 = vmul.u32.u64.high 3817748708, %v13928_v4, %v13946_v8  ;;  %s16153_s23 = scalar_lea.vmem %s16204_s10, %s13331_s21 }
  0x13   : > { %12122 = vmatpush3.bf16.msra.mxu0 %v13414_v2  ;;  %v13949_v10 = vmul.u32.u64.low 3817748708, %v363_v6  ;;  %v13950_v11 = vmul.u32.u64.high 3817748708, %v363_v6, %v13949_v10  ;;  %v1010_v12 = vld [vmem:[%s13940_s24] sm:$0xff]  ;;  %v1011_v13 = vld [vmem:[%s13940_s24 + $0x8] sm:$0xff]  ;;  %vm1171_vm1 = vsmask.f32 1280 }
  0x14   : > { %12123 = vmatprep.subr.bf16.mxu0 %v13415_v5  ;;  %v13957_v14 = vld [vmem:[%s16195_s1] ss:$0 sm:$0xff]  ;;  %vm13967_vm2 = vmand %vm1170_vm0, %vm1171_vm1  ;;  %v1173_v19 = vld [vmem:[#allocation2 + $0x8] sm:$0x3]  ;;  %v404_v23 = vshrl.u32 %v13947_v9, 4  ;;  %v365_v28 = vadd.s32 24, %v13928_v4 }
  0x15   : > { %v13962_v15 = vld [vmem:[%s16196_s2] ss:$0 sm:$0xff]  ;;  %v1053_v16 = vmul.f32 %v13957_v14, %v1010_v12  ;;  %v1054_v17 = vmul.f32 %v13957_v14, %v1011_v13  ;;  %v16254_v18 = vsel %vm13967_vm2, 4294967295, %v16253_v18  ;;  %v1174_v20 = vsel %vm13967_vm2, 0, %v1173_v19  ;;  %v1012_v33 = vld [vmem:[%s13940_s24 + $0x10] sm:$0xff]  ;;  %v1013_v34 = vld [vmem:[%s13940_s24 + $0x18] sm:$0xff] }
  0x16   : > { %16255 = vst [vmem:[#allocation5_spill] sm:$0xff] %v16254_v18  ;;  %v415_v24 = vshrl.u32 %v13950_v11, 4  ;;  %1175 = vst [vmem:[#allocation2 + $0x8] sm:$0x3] %v1174_v20  ;;  %v13421_v27 = vld [vmem:[#allocation2] sm:$0xff]   ;;  %v405_v29 = vmul.u32 18, %v404_v23  ;;  %v1055_v45 = vmul.f32 %v13957_v14, %v1012_v33  ;;  %v1056_v46 = vmul.f32 %v13957_v14, %v1013_v34 }
  0x17   : > { %12124 = vmatpush3.bf16.msra.mxu0 %v13415_v5  ;;  %v1096_v25 = vadd.f32 %v13962_v15, %v1053_v16  ;;  %v1097_v26 = vadd.f32 %v13962_v15, %v1054_v17  ;;  %v2407_v35 = vshrl.u32 %v13421_v27, 16  ;;  %v2409_v36 = vshll.u32 %v13421_v27, 16  ;;  %v13418_v39 = vld [vmem:[%s16197_s3 + $0x68] sm:$0xff]   ;;  %v1014_v48 = vld [vmem:[%s13940_s24 + $0x20] sm:$0xff]  ;;  %v13419_v54 = vld [vmem:[%s16197_s3 + $0x70] sm:$0xff]  }
  0x18   : > { %12125 = vmatprep.subr.bf16.mxu0 %v13416_v7  ;;  %v416_v30 = vmul.u32 18, %v415_v24  ;;  %v13987_v37 = vmul.u32.u64.low 3817748708, %v13974_v21  ;;  %v13988_v38 = vmul.u32.u64.high 3817748708, %v13974_v21, %v13987_v37  ;;  %v406_v40 = vsub.s32 %v13928_v4, %v405_v29  ;;  %v1015_v62 = vld [vmem:[%s13940_s24 + $0x28] sm:$0xff]  ;;  %v13420_v9 = vld [vmem:[%s16197_s3 + $0x78] sm:$0xff]   ;;  %v14050_v24 = vld [vmem:[%s16197_s3 + $0x80] sm:$0xff]  }
  0x19   : > { %v1132_v31 = vmax.f32 %v1096_v25, 0.0  ;;  %v1133_v32 = vmax.f32 %v1097_v26, 0.0  ;;  %v13994_v42 = vmul.u32.u64.low 3817748708, %v365_v28  ;;  %v13995_v43 = vmul.u32.u64.high 3817748708, %v365_v28, %v13994_v42 }
  0x1a   : > { %v417_v41 = vsub.s32 %v363_v6, %v416_v30  ;;  %v2411_v44 = vrot.slane %v2409_v36, 1  ;;  %v14000_v47 = vadd.s32 32, %v13928_v4  ;;  %vm794_vm3 = vcmp.ne.s32.totalorder %v406_v40, 0 }
  0x1b   : > { %12126 = vmatpush3.bf16.msra.mxu0 %v13416_v7  ;;  %vm830_vm5 = vcmp.lt.s32.totalorder %v406_v40, 0  ;;  %vm1793_vm7 = vcmask 1043457   ;;  %vm1794_vm8 = vsmask.f32 7942  ;;  %v902_v50 = vadd.s32 18, %v406_v40 }
  0x1c   : > { %12127 = vmatprep.subr.bf16.mxu0 %v13417_v22  ;;  %vm795_vm4 = vcmp.ne.s32.totalorder %v417_v41, 0  ;;  %vm831_vm6 = vcmp.lt.s32.totalorder %v417_v41, 0  ;;  %vm14003_vm9 = vmand %vm830_vm5, %vm794_vm3  ;;  %v903_v51 = vadd.s32 18, %v417_v41  ;;  %v14007_v52 = vor.u32 %v2411_v44, %v2407_v35 }
  0x1d   : > { %v426_v53 = vshrl.u32 %v13988_v38, 4  ;;  %vm867_vm10 = vmand %vm831_vm6, %vm795_vm4  ;;  %vm1395_vm11 = vsmask.f32 5392  ;;  %v437_v55 = vshrl.u32 %v13995_v43, 4  ;;  %v1098_v56 = vadd.f32 %v13962_v15, %v1055_v45 }
  0x1e   : > { %v1099_v57 = vadd.f32 %v13962_v15, %v1056_v46  ;;  %v14017_v58 = vadd.s32 40, %v13928_v4  ;;  %v938_v59 = vsel %vm14003_vm9, %v902_v50, %v406_v40  ;;  %v939_v60 = vsel %vm867_vm10, %v903_v51, %v417_v41  ;;  %vm14056_vm6 = vmand %vm1793_vm7, %vm1794_vm8 }
  0x1f   : > { %12128 = vmatpush3.bf16.msra.mxu0 %v13417_v22  ;;  %v427_v61 = vmul.u32 18, %v426_v53  ;;  %v1057_v63 = vmul.f32 %v13957_v14, %v1014_v48  ;;  %vm14023_vm12 = vcmp.lt.s32.totalorder %v938_v59, 16  ;;  %vm14027_vm13 = vcmp.lt.s32.totalorder %v939_v60, 16  ;;  %vm14076_vm7 = vmor %vm1171_vm1, %vm1395_vm11 }
  0x20   : > { %12129 = vmatprep.subr.bf16.mxu0 %v13418_v39  ;;  %v438_v2 = vmul.u32 18, %v437_v55  ;;  %v1134_v3 = vmax.f32 %v1098_v56, 0.0  ;;  %v1251_v5 = vsel %vm14023_vm12, %v1132_v31, 0.0  ;;  %v1252_v6 = vsel %vm14027_vm13, %v1133_v32, 0.0  ;;  %v1796_v32 = vld [vmem:[#allocation2 + $0x8] sm:$0xe] }
  0x21   : > { %v428_v7 = vsub.s32 %v13974_v21, %v427_v61  ;;  %v1135_v8 = vmax.f32 %v1099_v57, 0.0  ;;  %v11605_v10 = vpack.c.bf16 %v1251_v5, %v1251_v5  ;;  %v11606_v11 = vpack.c.bf16 %v1252_v6, %v1252_v6  ;;  %v1016_v61 = vld [vmem:[%s13940_s24 + $0x30] sm:$0xff]  ;;  %v1017_v5 = vld [vmem:[%s13940_s24 + $0x38] sm:$0xff] }
  0x22   : > { %v439_v12 = vsub.s32 %v365_v28, %v438_v2  ;;  %v1058_v13 = vmul.f32 %v13957_v14, %v1015_v62  ;;  %v14041_v17 = vadd.f32 %v13962_v15, %v1057_v63  ;;  %vm16205_vm1 = vsmask.f32 7424 }
  0x23   : > { %12130 = vmatpush3.bf16.msra.mxu0 %v13418_v39  ;;  %vm796_vm14 = vcmp.ne.s32.totalorder %v428_v7, 0  ;;  %vm832_vm15 = vcmp.lt.s32.totalorder %v428_v7, 0  ;;  %v904_v16 = vadd.s32 18, %v428_v7  ;;  %v1398_v19 = vshrl.u32 %v11605_v10, 16 }
  0x24   : > { %12131 = vmatprep.subr.bf16.mxu0 %v13419_v54  ;;  %v1401_v20 = vshll.u32 %v11605_v10, 16  ;;  %v1407_v21 = vshrl.u32 %v11606_v11, 16  ;;  %v1410_v22 = vshll.u32 %v11606_v11, 16  ;;  %vm14043_vm0 = vmand %vm832_vm15, %vm796_vm14  ;;  %vm797_vm3 = vcmp.ne.s32.totalorder %v439_v12, 0 }
  0x25   : > { %vm833_vm4 = vcmp.lt.s32.totalorder %v439_v12, 0  ;;  %v905_v25 = vadd.s32 18, %v439_v12  ;;  %v940_v26 = vsel %vm14043_vm0, %v904_v16, %v428_v7  ;;  %v1400_v27 = vrot.slane %v1398_v19, 6 }
  0x26   : > { %v1403_v28 = vrot.slane %v1401_v20, 7  ;;  %v1409_v29 = vrot.slane %v1407_v21, 6  ;;  %v1412_v30 = vrot.slane %v1410_v22, 7  ;;  %vm869_vm5 = vmand %vm833_vm4, %vm797_vm3  ;;  %vm14060_vm9 = vcmp.lt.s32.totalorder %v940_v26, 16 }
  0x27   : > { %12132 = vmatpush3.bf16.msra.mxu0 %v13419_v54  ;;  %v941_v33 = vsel %vm869_vm5, %v905_v25, %v439_v12  ;;  %v14065_v35 = vmul.u32.u64.low 3817748708, %v14000_v47  ;;  %v14066_v36 = vmul.u32.u64.high 3817748708, %v14000_v47, %v14065_v35  ;;  %v1253_v40 = vsel %vm14060_vm9, %v1134_v3, 0.0 }
  0x28   : > { %12133 = vmatprep.subr.bf16.mxu0 %v13420_v9  ;;  %v1404_v37 = vor.u32 %v1403_v28, %v1400_v27  ;;  %v1413_v38 = vor.u32 %v1412_v30, %v1409_v29  ;;  %vm14068_vm10 = vcmp.lt.s32.totalorder %v941_v33, 16  ;;  %v11607_v43 = vpack.c.bf16 %v1253_v40, %v1253_v40 }
  0x29   : > { %v1254_v42 = vsel %vm14068_vm10, %v1135_v8, 0.0  ;;  %v14083_v44 = vmul.u32.u64.low 3817748708, %v14017_v58  ;;  %v14084_v45 = vmul.u32.u64.high 3817748708, %v14017_v58, %v14083_v44  ;;  %v448_v54 = vshrl.u32 %v14066_v36, 4 }
  0x2a   : > { %v1405_v46 = vrot.slane %v1404_v37, 4  ;;  %v1797_v48 = vsel %vm14056_vm6, %v1404_v37, %v1796_v32  ;;  %v11608_v49 = vpack.c.bf16 %v1254_v42, %v1254_v42  ;;  %v1415_v50 = vrot.slane %v1413_v38, 4 }
  0x2b   : > { %12134 = vmatpush3.bf16.msra.mxu0 %v13420_v9  ;;  %1798 = vst [vmem:[#allocation2 + $0x8] sm:$0xe] %v1797_v48  ;;  %v1417_v51 = vshrl.u32 %v11607_v43, 16  ;;  %v1420_v53 = vshll.u32 %v11607_v43, 16  ;;  %v1101_v55 = vadd.f32 %v13962_v15, %v1058_v13  ;;  %v1136_v60 = vmax.f32 %v14041_v17, 0.0 }
  0x2c   : > { %12171 = vmatprep.subr.bf16.mxu0 %v14050_v24  ;;  %v1414_v56 = vsel %vm14076_vm7, %v1405_v46, %v1413_v38  ;;  %v1427_v57 = vshrl.u32 %v11608_v49, 16  ;;  %v1430_v59 = vshll.u32 %v11608_v49, 16  ;;  %v449_v2 = vmul.u32 18, %v448_v54 }
  0x2d   : > { %1799 = vst [vmem:[#allocation2 + $0xc] sm:$0xf] %v1414_v56  ;;  %v1419_v62 = vrot.slane %v1417_v51, 6  ;;  %v1422_v63 = vrot.slane %v1420_v53, 7  ;;  %v459_v3 = vshrl.u32 %v14084_v45, 4  ;;  %v1137_v8 = vmax.f32 %v1101_v55, 0.0 }
  0x2e   : > { %v1429_v6 = vrot.slane %v1427_v57, 6  ;;  %v1432_v7 = vrot.slane %v1430_v59, 7  ;;  %v368_v9 = vadd.s32 48, %v13928_v4  ;;  %v450_v11 = vsub.s32 %v14000_v47, %v449_v2  ;;  %v1018_v55 = vld [vmem:[%s13940_s24 + $0x40] sm:$0xff] }
  0x2f   : > { %v1423_v10 = vor.u32 %v1422_v63, %v1419_v62  ;;  %v460_v12 = vmul.u32 18, %v459_v3  ;;  %v14100_v13 = vadd.s32 56, %v13928_v4  ;;  %v1059_v20 = vmul.f32 %v13957_v14, %v1016_v61 }
  0x30   : > { %v14102_v16 = vor.u32 %v1432_v7, %v1429_v6  ;;  %v14104_v17 = vmul.u32.u64.low 3817748708, %v368_v9  ;;  %v14105_v19 = vmul.u32.u64.high 3817748708, %v368_v9, %v14104_v17  ;;  %vm798_vm8 = vcmp.ne.s32.totalorder %v450_v11, 0 }
  0x31   : > { %v1424_v21 = vsel %vm14076_vm7, %v1415_v50, %v1423_v10  ;;  %v1425_v22 = vrot.slane %v1423_v10, 4  ;;  %v461_v23 = vsub.s32 %v14017_v58, %v460_v12  ;;  %vm834_vm11 = vcmp.lt.s32.totalorder %v450_v11, 0 }
  0x32   : > { %1800 = vst [vmem:[#allocation2 + $0x10] sm:$0xf] %v1424_v21  ;;  %v906_v47 = vadd.s32 18, %v450_v11  ;;  %v1435_v25 = vrot.slane %v14102_v16, 4  ;;  %v1060_v26 = vmul.f32 %v13957_v14, %v1017_v5  ;;  %vm870_vm0 = vmand %vm834_vm11, %vm798_vm8  ;;  %v470_v30 = vshrl.u32 %v14105_v19, 4 }
  0x33   : > { %v1434_v27 = vsel %vm14076_vm7, %v1425_v22, %v14102_v16  ;;  %vm799_vm14 = vcmp.ne.s32.totalorder %v461_v23, 0  ;;  %vm835_vm15 = vcmp.lt.s32.totalorder %v461_v23, 0  ;;  %v907_v28 = vadd.s32 18, %v461_v23 }
  0x34   : > { %v13422_v29 = vld [vmem:[#allocation2 + $0x8] sm:$0xff]   ;;  %1801 = vst [vmem:[#allocation2 + $0x14] sm:$0xf] %v1434_v27  ;;  %vm871_vm3 = vmand %vm835_vm15, %vm799_vm14  ;;  %v942_v58 = vsel %vm870_vm0, %v906_v47, %v450_v11  ;;  %v14118_v32 = vmul.u32.u64.low 3817748708, %v14100_v13  ;;  %v14119_v33 = vmul.u32.u64.high 3817748708, %v14100_v13, %v14118_v32  ;;  %v16272_v36 = vmov 0 }
  0x35   : > { %v943_v35 = vsel %vm871_vm3, %v907_v28, %v461_v23  ;;  %vm14121_vm4 = vcmp.lt.s32.totalorder %v942_v58, 16  ;;  %v14126_v37 = vadd.f32 %v13962_v15, %v1059_v20  ;;  %v14129_v38 = vadd.f32 %v13962_v15, %v1060_v26 }
  0x36   : > { %v16273_v36 = vsel %vm14121_vm4, 4294967295, %v16272_v36  ;;  %v2414_v40 = vshll.u32 %v13422_v29, 16  ;;  %v2418_v42 = vshrl.u32 %v13422_v29, 16  ;;  %vm14131_vm5 = vcmp.lt.s32.totalorder %v943_v35, 16  ;;  %v13427_v35 = vld [vmem:[%s16197_s3 + $0x90] sm:$0xff]  }
  0x37   : > { %v16274_v43 = vmov 0  ;;  %v1255_v44 = vsel %vm14121_vm4, %v1136_v60, 0.0  ;;  %v1256_v45 = vsel %vm14131_vm5, %v1137_v8, 0.0  ;;  %v471_v48 = vmul.u32 18, %v470_v30  ;;  %v1019_v60 = vld [vmem:[%s13940_s24 + $0x48] sm:$0xff] }
  0x38   : > { %v16275_v43 = vsel %vm14131_vm5, 4294967295, %v16274_v43  ;;  %v11609_v46 = vpack.c.bf16 %v1255_v44, %v1255_v44  ;;  %v1138_v49 = vmax.f32 %v14126_v37, 0.0  ;;  %v2416_v50 = vrot.slane %v2414_v40, 1 }
  0x39   : > { %v11610_v51 = vpack.c.bf16 %v1256_v45, %v1256_v45  ;;  %v481_v53 = vshrl.u32 %v14119_v33, 4  ;;  %v1139_v54 = vmax.f32 %v14129_v38, 0.0  ;;  %v472_v59 = vsub.s32 %v368_v9, %v471_v48 }
  0x3a   : > { %v1437_v56 = vshrl.u32 %v11609_v46, 16  ;;  %v1440_v57 = vshll.u32 %v11609_v46, 16  ;;  %v14144_v61 = vadd.s32 64, %v13928_v4  ;;  %v2417_v62 = vsel %vm16205_vm1, %v14007_v52, %v2416_v50 }
  0x3b   : > { %v2420_v63 = vor.u32 %v2418_v42, %v2416_v50  ;;  %v1447_v2 = vshrl.u32 %v11610_v51, 16  ;;  %v1450_v3 = vshll.u32 %v11610_v51, 16  ;;  %12135 = vmatprep.mubr.bf16.mxu0 %v2417_v62  ;;  %v13424_v5 = vld [vmem:[#allocation2 + $0x10] sm:$0xff]   ;;  %v482_v8 = vmul.u32 18, %v481_v53 }
  0x3c   : > { %v1439_v6 = vrot.slane %v1437_v56, 6  ;;  %v1442_v7 = vrot.slane %v1440_v57, 7  ;;  %v1061_v10 = vmul.f32 %v13957_v14, %v1018_v55  ;;  %vm800_vm8 = vcmp.ne.s32.totalorder %v472_v59, 0  ;;  %v1020_v50 = vld [vmem:[%s13940_s24 + $0x50] sm:$0xff] }
  0x3d   : > { %v1449_v11 = vrot.slane %v1447_v2, 6  ;;  %v1452_v12 = vrot.slane %v1450_v3, 7  ;;  %vm836_vm11 = vcmp.lt.s32.totalorder %v472_v59, 0  ;;  %v2422_v9 = vshll.u32 %v13424_v5, 16  ;;  %v1021_v2 = vld [vmem:[%s13940_s24 + $0x58] sm:$0xff] }
  0x3e   : > { %v1443_v16 = vor.u32 %v1442_v7, %v1439_v6  ;;  %v2426_v17 = vshrl.u32 %v13424_v5, 16  ;;  %v483_v19 = vsub.s32 %v14100_v13, %v482_v8  ;;  %vm14151_vm14 = vmand %vm836_vm11, %vm800_vm8  ;;  %v908_v21 = vadd.s32 18, %v472_v59  ;;  %v13425_v13 = vld [vmem:[%s16197_s3 + $0x88] sm:$0xff]  }
  0x3f   : > { %v14155_v20 = vor.u32 %v1452_v12, %v1449_v11  ;;  %v14158_v22 = vadd.s32 72, %v13928_v4  ;;  %v1062_v23 = vmul.f32 %v13957_v14, %v1019_v60  ;;  %v2424_v47 = vrot.slane %v2422_v9, 1  ;;  %v13429_v60 = vld [vmem:[%s16197_s3 + $0x98] sm:$0xff]  }
  0x40   : > { %v1444_v26 = vsel %vm14076_vm7, %v1435_v25, %v1443_v16  ;;  %v1445_v27 = vrot.slane %v1443_v16, 4  ;;  %vm801_vm15 = vcmp.ne.s32.totalorder %v483_v19, 0  ;;  %vm837_vm0 = vcmp.lt.s32.totalorder %v483_v19, 0 }
  0x41   : > { %1802 = vst [vmem:[#allocation2 + $0x18] sm:$0xf] %v1444_v26  ;;  %v909_v28 = vadd.s32 18, %v483_v19  ;;  %v944_v29 = vsel %vm14151_vm14, %v908_v21, %v472_v59  ;;  %v1455_v58 = vrot.slane %v14155_v20, 4  ;;  %v2425_v30 = vsel %vm16205_vm1, %v2420_v63, %v2424_v47  ;;  %vm873_vm3 = vmand %vm837_vm0, %vm801_vm15 }
  0x42   : > { %v1454_v25 = vsel %vm14076_vm7, %v1445_v27, %v14155_v20  ;;  %v14173_v32 = vor.u32 %v2426_v17, %v2424_v47  ;;  %vm14175_vm8 = vcmp.lt.s32.totalorder %v944_v29, 16  ;;  %12136 = vmatmul.mubr.bf16.vlgmr.msra.gmra.mrb[0].mxu0 %v2425_v30  ;;  %v16280_v44 = vmov 0 }
  0x43   : > { %1803 = vst [vmem:[#allocation2 + $0x1c] sm:$0xf] %v1454_v25  ;;  %v945_v37 = vsel %vm873_vm3, %v909_v28, %v483_v19  ;;  %v1257_v38 = vsel %vm14175_vm8, %v1138_v49, 0.0  ;;  %v14185_v40 = vmul.u32.u64.low 3817748708, %v14144_v61  ;;  %v14186_v42 = vmul.u32.u64.high 3817748708, %v14144_v61, %v14185_v40  ;;  %12172 = vmatpush3.bf16.msra.mxu0 %v14050_v24 }
  0x44   : > { %vm14189_vm11 = vcmp.lt.s32.totalorder %v945_v37, 16  ;;  %v11611_v45 = vpack.c.bf16 %v1257_v38, %v1257_v38  ;;  %v14194_v46 = vmul.u32.u64.low 3817748708, %v14158_v22  ;;  %v14195_v48 = vmul.u32.u64.high 3817748708, %v14158_v22, %v14194_v46  ;;  %12173 = vmatprep.subr.bf16.mxu0 %v13425_v13 }
  0x45   : > { %v16281_v44 = vsel %vm14189_vm11, 4294967295, %v16280_v44  ;;  %v1258_v49 = vsel %vm14189_vm11, %v1139_v54, 0.0  ;;  %v14201_v51 = vadd.f32 %v13962_v15, %v1061_v10  ;;  %v14204_v24 = vadd.f32 %v13962_v15, %v1062_v23 }
  0x46   : > { %v14207_v53 = vadd.s32 80, %v13928_v4  ;;  %v11612_v55 = vpack.c.bf16 %v1258_v49, %v1258_v49  ;;  %v1457_v56 = vshrl.u32 %v11611_v45, 16  ;;  %v1460_v57 = vshll.u32 %v11611_v45, 16  ;;  %v13433_v45 = vld [vmem:[%s16197_s3 + $0xa8] sm:$0xff]  }
  0x47   : > { %v14210_v59 = vadd.s32 88, %v13928_v4  ;;  %v492_v54 = vshrl.u32 %v14186_v42, 4  ;;  %v1140_v62 = vmax.f32 %v14201_v51, 0.0  ;;  %v1141_v63 = vmax.f32 %v14204_v24, 0.0  ;;  %12174 = vmatpush3.bf16.msra.mxu0 %v13425_v13 }
  0x48   : > { %v1063_v3 = vmul.f32 %v13957_v14, %v1020_v50  ;;  %v1459_v5 = vrot.slane %v1457_v56, 6  ;;  %v1462_v6 = vrot.slane %v1460_v57, 7  ;;  %v1467_v7 = vshrl.u32 %v11612_v55, 16  ;;  %12175 = vmatprep.subr.bf16.mxu0 %v13427_v35 }
  0x49   : > { %v1470_v8 = vshll.u32 %v11612_v55, 16  ;;  %v493_v10 = vmul.u32 18, %v492_v54  ;;  %v503_v11 = vshrl.u32 %v14195_v48, 4  ;;  %v1064_v20 = vmul.f32 %v13957_v14, %v1021_v2  ;;  %v1022_v2 = vld [vmem:[%s13940_s24 + $0x60] sm:$0xff] }
  0x4a   : > { %v14222_v12 = vmul.u32.u64.low 3817748708, %v14207_v53  ;;  %v14223_v9 = vmul.u32.u64.high 3817748708, %v14207_v53, %v14222_v12  ;;  %v13426_v16 = vld [vmem:[#allocation2 + $0x18] sm:$0xff]   ;;  %v1463_v17 = vor.u32 %v1462_v6, %v1459_v5  ;;  %v1469_v19 = vrot.slane %v1467_v7, 6 }
  0x4b   : > { %v1472_v52 = vrot.slane %v1470_v8, 7  ;;  %v494_v21 = vsub.s32 %v14144_v61, %v493_v10  ;;  %v504_v23 = vmul.u32 18, %v503_v11  ;;  %v2430_v27 = vshll.u32 %v13426_v16, 16  ;;  %12176 = vmatpush3.bf16.msra.mxu0 %v13427_v35  ;;  %v13431_v61 = vld [vmem:[%s16197_s3 + $0xa0] sm:$0xff]  }
  0x4c   : > { %v14228_v47 = vmul.u32.u64.low 3817748708, %v14210_v59  ;;  %v14229_v26 = vmul.u32.u64.high 3817748708, %v14210_v59, %v14228_v47  ;;  %v1464_v13 = vsel %vm14076_vm7, %v1455_v58, %v1463_v17  ;;  %v1465_v28 = vrot.slane %v1463_v17, 4  ;;  %12177 = vmatprep.subr.bf16.mxu0 %v13429_v60 }
  0x4d   : > { %v14233_v29 = vor.u32 %v1472_v52, %v1469_v19  ;;  %1804 = vst [vmem:[#allocation2 + $0x20] sm:$0xf] %v1464_v13  ;;  %v2434_v30 = vshrl.u32 %v13426_v16, 16  ;;  %v505_v25 = vsub.s32 %v14158_v22, %v504_v23  ;;  %vm802_vm14 = vcmp.ne.s32.totalorder %v494_v21, 0 }
  0x4e   : > { %vm838_vm15 = vcmp.lt.s32.totalorder %v494_v21, 0  ;;  %v2432_v37 = vrot.slane %v2430_v27, 1  ;;  %v910_v35 = vadd.s32 18, %v494_v21  ;;  %v514_v42 = vshrl.u32 %v14223_v9, 4 }
  0x4f   : > { %v1474_v58 = vsel %vm14076_vm7, %v1465_v28, %v14233_v29  ;;  %vm14242_vm0 = vmand %vm838_vm15, %vm802_vm14  ;;  %v1475_v40 = vrot.slane %v14233_v29, 4  ;;  %vm803_vm3 = vcmp.ne.s32.totalorder %v505_v25, 0  ;;  %vm839_vm1 = vcmp.lt.s32.totalorder %v505_v25, 0  ;;  %12178 = vmatpush3.bf16.msra.mxu0 %v13429_v60 }
  0x50   : > { %1805 = vst [vmem:[#allocation2 + $0x24] sm:$0xf] %v1474_v58  ;;  %v911_v22 = vadd.s32 18, %v505_v25  ;;  %vm16284_vm5 = vsmask.f32 7424  ;;  %v14253_v48 = vor.u32 %v2434_v30, %v2432_v37  ;;  %vm875_vm14 = vmand %vm839_vm1, %vm803_vm3  ;;  %v946_v50 = vsel %vm14242_vm0, %v910_v35, %v494_v21  ;;  %12179 = vmatprep.subr.bf16.mxu0 %v13431_v61  ;;  %v13437_v58 = vld [vmem:[%s16197_s3 + $0xb8] sm:$0xff]  }
  0x51   : > { %v2433_v46 = vsel %vm16284_vm5, %v14173_v32, %v2432_v37  ;;  %v525_v49 = vshrl.u32 %v14229_v26, 4  ;;  %vm14258_vm15 = vcmp.lt.s32.totalorder %v946_v50, 16  ;;  %v16285_v24 = vmov 0 }
  0x52   : > { %12139 = vmatprep.mubr.bf16.mxu0 %v2433_v46  ;;  %v947_v51 = vsel %vm875_vm14, %v911_v22, %v505_v25  ;;  %v16286_v24 = vsel %vm14258_vm15, 4294967295, %v16285_v24  ;;  %v515_v55 = vmul.u32 18, %v514_v42  ;;  %v1106_v32 = vadd.f32 %v13962_v15, %v1063_v3  ;;  %v13435_v3 = vld [vmem:[%s16197_s3 + $0xb0] sm:$0xff]  }
  0x53   : > { %vm14263_vm5 = vcmp.lt.s32.totalorder %v947_v51, 16  ;;  %v16287_v56 = vmov 0  ;;  %v1259_v57 = vsel %vm14258_vm15, %v1140_v62, 0.0  ;;  %v526_v60 = vmul.u32 18, %v525_v49  ;;  %12180 = vmatpush3.bf16.msra.mxu0 %v13431_v61 }
  0x54   : > { %v16288_v56 = vsel %vm14263_vm5, 4294967295, %v16287_v56  ;;  %v1107_v54 = vadd.f32 %v13962_v15, %v1064_v20  ;;  %v1260_v5 = vsel %vm14263_vm5, %v1141_v63, 0.0  ;;  %v11613_v6 = vpack.c.bf16 %v1259_v57, %v1259_v57  ;;  %12181 = vmatprep.subr.bf16.mxu0 %v13433_v45  ;;  %v1023_v63 = vld [vmem:[%s13940_s24 + $0x68] sm:$0xff] }
  0x55   : > { %v516_v7 = vsub.s32 %v14207_v53, %v515_v55  ;;  %v1142_v8 = vmax.f32 %v1106_v32, 0.0  ;;  %v11614_v10 = vpack.c.bf16 %v1260_v5, %v1260_v5  ;;  %v527_v11 = vsub.s32 %v14210_v59, %v526_v60 }
  0x56   : > { %v1143_v62 = vmax.f32 %v1107_v54, 0.0  ;;  %v14279_v12 = vadd.s32 96, %v13928_v4  ;;  %v1477_v9 = vshrl.u32 %v11613_v6, 16  ;;  %v1480_v16 = vshll.u32 %v11613_v6, 16 }
  0x57   : > { %vm804_vm1 = vcmp.ne.s32.totalorder %v516_v7, 0  ;;  %vm840_vm0 = vcmp.lt.s32.totalorder %v516_v7, 0  ;;  %v13428_v53 = vld [vmem:[#allocation2 + $0x20] sm:$0xff]   ;;  %v1487_v17 = vshrl.u32 %v11614_v10, 16  ;;  %v1490_v19 = vshll.u32 %v11614_v10, 16  ;;  %12182 = vmatpush3.bf16.msra.mxu0 %v13433_v45 }
  0x58   : > { %vm805_vm3 = vcmp.ne.s32.totalorder %v527_v11, 0  ;;  %vm14282_vm14 = vmand %vm840_vm0, %vm804_vm1  ;;  %v1065_v59 = vmul.f32 %v13957_v14, %v1022_v2  ;;  %v1479_v20 = vrot.slane %v1477_v9, 6  ;;  %v1482_v21 = vrot.slane %v1480_v16, 7  ;;  %12183 = vmatprep.subr.bf16.mxu0 %v13435_v3  ;;  %v1025_v9 = vld [vmem:[%s13940_s24 + $0x78] sm:$0xff] }
  0x59   : > { %vm841_vm5 = vcmp.lt.s32.totalorder %v527_v11, 0  ;;  %v912_v23 = vadd.s32 18, %v516_v7  ;;  %v2438_v47 = vshll.u32 %v13428_v53, 16  ;;  %v1489_v26 = vrot.slane %v1487_v17, 6 }
  0x5a   : > { %v1492_v27 = vrot.slane %v1490_v19, 7  ;;  %v2442_v13 = vshrl.u32 %v13428_v53, 16  ;;  %vm14287_vm15 = vmand %vm841_vm5, %vm805_vm3  ;;  %v1483_v30 = vor.u32 %v1482_v21, %v1479_v20  ;;  %v913_v25 = vadd.s32 18, %v527_v11 }
  0x5b   : > { %v948_v61 = vsel %vm14282_vm14, %v912_v23, %v516_v7  ;;  %v14294_v37 = vadd.s32 104, %v13928_v4  ;;  %v2440_v38 = vrot.slane %v2438_v47, 1  ;;  %v16293_v22 = vmov 0  ;;  %12184 = vmatpush3.bf16.msra.mxu0 %v13435_v3 }
  0x5c   : > { %v1493_v35 = vor.u32 %v1492_v27, %v1489_v26  ;;  %vm14299_vm5 = vcmp.lt.s32.totalorder %v948_v61, 16  ;;  %v1066_v42 = vmul.f32 %v13957_v14, %v1023_v63  ;;  %v1484_v45 = vsel %vm14076_vm7, %v1475_v40, %v1483_v30  ;;  %v14323_v40 = vld [vmem:[%s16197_s3 + $0xc0] sm:$0xff]   ;;  %12185 = vmatprep.subr.bf16.mxu0 %v13437_v58 }
  0x5d   : > { %v16294_v22 = vsel %vm14299_vm5, 4294967295, %v16293_v22  ;;  %v1485_v46 = vrot.slane %v1483_v30, 4  ;;  %v949_v50 = vsel %vm14287_vm15, %v913_v25, %v527_v11  ;;  %v1261_v49 = vsel %vm14299_vm5, %v1142_v8, 0.0  ;;  %1806 = vst [vmem:[#allocation2 + $0x28] sm:$0xf] %v1484_v45  ;;  %v1024_v8 = vld [vmem:[%s13940_s24 + $0x70] sm:$0xff] }
  0x5e   : > { %vm16295_vm1 = vsmask.f32 7424  ;;  %v14314_v55 = vor.u32 %v2442_v13, %v2440_v38  ;;  %vm14316_vm0 = vcmp.lt.s32.totalorder %v949_v50, 16  ;;  %v16296_v32 = vmov 0 }
  0x5f   : > { %v2441_v51 = vsel %vm16295_vm1, %v14253_v48, %v2440_v38  ;;  %v16297_v32 = vsel %vm14316_vm0, 4294967295, %v16296_v32  ;;  %v11615_v29 = vpack.c.bf16 %v1261_v49, %v1261_v49  ;;  %v1494_v48 = vsel %vm14076_vm7, %v1485_v46, %v1493_v35  ;;  %12186 = vmatpush3.bf16.msra.mxu0 %v13437_v58 }
  0x60   : > { %12140 = vmatmul.mubr.bf16.gmra.mrb[4].mxu0 %v2441_v51  ;;  %v1262_v57 = vsel %vm14316_vm0, %v1143_v62, 0.0  ;;  %v1495_v60 = vrot.slane %v1493_v35, 4  ;;  %v14330_v54 = vadd.f32 %v13962_v15, %v1065_v59  ;;  %1807 = vst [vmem:[#allocation2 + $0x2c] sm:$0xf] %v1494_v48  ;;  %v14333_v7 = vadd.f32 %v13962_v15, %v1066_v42  ;;  %12223 = vmatprep.subr.bf16.mxu0 %v14323_v40  ;;  %v13438_v35 = vld [vmem:[#allocation2] sm:$0xfe]  }
  0x61   : > { %v11616_v2 = vpack.c.bf16 %v1262_v57, %v1262_v57  ;;  %v1497_v5 = vshrl.u32 %v11615_v29, 16  ;;  %v1500_v6 = vshll.u32 %v11615_v29, 16  ;;  %v376_v59 = vadd.s32 112, %v13928_v4 }
  0x62   : > { %v14337_v3 = vmul.u32.u64.low 3817748708, %v14279_v12  ;;  %v14338_v10 = vmul.u32.u64.high 3817748708, %v14279_v12, %v14337_v3  ;;  %v14341_v11 = vmul.u32.u64.low 3817748708, %v14294_v37  ;;  %v14342_v62 = vmul.u32.u64.high 3817748708, %v14294_v37, %v14341_v11 }
  0x63   : > { %v1499_v16 = vrot.slane %v1497_v5, 6  ;;  %v1502_v63 = vrot.slane %v1500_v6, 7  ;;  %v1507_v53 = vshrl.u32 %v11616_v2, 16  ;;  %v1510_v17 = vshll.u32 %v11616_v2, 16  ;;  %v14380_v6 = vld [vmem:[%s16196_s2] ss:$0 sm:$0xff] }
  0x64   : > { %v1144_v19 = vmax.f32 %v14330_v54, 0.0  ;;  %v1145_v52 = vmax.f32 %v14333_v7, 0.0  ;;  %v14349_v20 = vadd.s32 120, %v13928_v4  ;;  %v1067_v26 = vmul.f32 %v13957_v14, %v1024_v8  ;;  %v14386_v11 = vld [vmem:[#allocation2 + $0x10] sm:$0xff]   ;;  %v13443_v7 = vld [vmem:[#allocation2 + $0x20] sm:$0xff]  }
  0x65   : > { %v1503_v21 = vor.u32 %v1502_v63, %v1499_v16  ;;  %v1509_v23 = vrot.slane %v1507_v53, 6  ;;  %v1512_v47 = vrot.slane %v1510_v17, 7  ;;  %v536_v27 = vshrl.u32 %v14338_v10, 4 }
  0x66   : > { %v547_v13 = vshrl.u32 %v14342_v62, 4  ;;  %v14355_v28 = vmul.u32.u64.low 3817748708, %v376_v59  ;;  %v14356_v30 = vmul.u32.u64.high 3817748708, %v376_v59, %v14355_v28  ;;  %v1068_v38 = vmul.f32 %v13957_v14, %v1025_v9  ;;  %v13439_v14 = vld [vmem:[#allocation2 + $0x8] sm:$0xff]  }
  0x67   : > { %v1504_v25 = vsel %vm14076_vm7, %v1495_v60, %v1503_v21  ;;  %v1505_v61 = vrot.slane %v1503_v21, 4  ;;  %v14360_v58 = vor.u32 %v1512_v47, %v1509_v23  ;;  %v13430_v42 = vld [vmem:[#allocation2 + $0x28] sm:$0xff]   ;;  %v537_v45 = vmul.u32 18, %v536_v27 }
  0x68   : > { %1808 = vst [vmem:[#allocation2 + $0x30] sm:$0xf] %v1504_v25  ;;  %v548_v46 = vmul.u32 18, %v547_v13  ;;  %v14364_v50 = vadd.f32 %v13962_v15, %v1067_v26  ;;  %v14371_v29 = vmul.u32.u64.low 3817748708, %v14349_v20  ;;  %v14372_v48 = vmul.u32.u64.high 3817748708, %v14349_v20, %v14371_v29 }
  0x69   : > { %v1514_v49 = vsel %vm14076_vm7, %v1505_v61, %v14360_v58  ;;  %v1515_v51 = vrot.slane %v14360_v58, 4  ;;  %v2446_v57 = vshll.u32 %v13430_v42, 16  ;;  %v2450_v60 = vshrl.u32 %v13430_v42, 16 }
  0x6a   : > { %1809 = vst [vmem:[#allocation2 + $0x34] sm:$0xf] %v1514_v49  ;;  %v538_v2 = vsub.s32 %v14279_v12, %v537_v45  ;;  %v549_v15 = vsub.s32 %v14294_v37, %v548_v46  ;;  %v558_v5 = vshrl.u32 %v14356_v30, 4  ;;  %v14383_v8 = vadd.f32 %v14380_v6, %v1068_v38 }
  0x6b   : > { %v1146_v3 = vmax.f32 %v14364_v50, 0.0  ;;  %v3053_v10 = vrot.slane %v13438_v35, 1  ;;  %v2448_v62 = vrot.slane %v2446_v57, 1  ;;  %vm16298_vm5 = vsmask.f32 7424 }
  0x6c   : > { %vm806_vm3 = vcmp.ne.s32.totalorder %v538_v2, 0  ;;  %vm807_vm14 = vcmp.ne.s32.totalorder %v549_v15, 0  ;;  %vm842_vm1 = vcmp.lt.s32.totalorder %v538_v2, 0  ;;  %vm843_vm15 = vcmp.lt.s32.totalorder %v549_v15, 0 }
  0x6d   : > { %vm878_vm0 = vmand %vm842_vm1, %vm806_vm3  ;;  %v914_v12 = vadd.s32 18, %v538_v2  ;;  %v915_v37 = vadd.s32 18, %v549_v15  ;;  %v559_v9 = vmul.u32 18, %v558_v5  ;;  %v2449_v16 = vsel %vm16298_vm5, %v14314_v55, %v2448_v62 }
  0x6e   : > { %v2452_v63 = vor.u32 %v2450_v60, %v2448_v62  ;;  %vm879_vm11 = vmand %vm843_vm15, %vm807_vm14  ;;  %v569_v53 = vshrl.u32 %v14372_v48, 4  ;;  %v1147_v17 = vmax.f32 %v14383_v8, 0.0  ;;  %12143 = vmatprep.mubr.bf16.mxu0 %v2449_v16  ;;  %v3054_v26 = vrot.slane %v13439_v14, 1 }
  0x6f   : > { %v950_v21 = vsel %vm878_vm0, %v914_v12, %v538_v2  ;;  %v951_v23 = vsel %vm879_vm11, %v915_v37, %v549_v15  ;;  %v560_v47 = vsub.s32 %v376_v59, %v559_v9  ;;  %v16299_v27 = vmov 0  ;;  %v13445_v2 = vld [vmem:[#allocation2 + $0x28] sm:$0xff]  }
  0x70   : > { %vm14392_vm4 = vcmp.lt.s32.totalorder %v950_v21, 16  ;;  %vm14396_vm3 = vcmp.lt.s32.totalorder %v951_v23, 16  ;;  %v16301_v13 = vmov 0  ;;  %v570_v55 = vmul.u32 18, %v569_v53 }
  0x71   : > { %v16300_v27 = vsel %vm14392_vm4, 4294967295, %v16299_v27  ;;  %v16302_v13 = vsel %vm14396_vm3, 4294967295, %v16301_v13  ;;  %v3056_v28 = vrot.slane %v14386_v11, 1  ;;  %v13432_v30 = vld [vmem:[#allocation2 + $0x30] sm:$0xff]   ;;  %v1263_v25 = vsel %vm14392_vm4, %v1144_v19, 0.0  ;;  %v13442_v19 = vld [vmem:[#allocation2 + $0x18] sm:$0xff]  }
  0x72   : > { %v1264_v59 = vsel %vm14396_vm3, %v1145_v52, 0.0  ;;  %vm808_vm11 = vcmp.ne.s32.totalorder %v560_v47, 0  ;;  %vm16303_vm5 = vcmask 1046528   ;;  %v11617_v38 = vpack.c.bf16 %v1263_v25, %v1263_v25  ;;  %v14434_v23 = vld [vmem:[#allocation2 + $0x30] sm:$0xff]  }
  0x73   : > { %v14410_v61 = vsel %vm16303_vm5, %v3053_v10, %v3054_v26  ;;  %v11618_v35 = vpack.c.bf16 %v1264_v59, %v1264_v59  ;;  %v571_v42 = vsub.s32 %v14349_v20, %v570_v55  ;;  %vm844_vm0 = vcmp.lt.s32.totalorder %v560_v47, 0  ;;  %vm16304_vm15 = vmmov %vm16303_vm5 }
  0x74   : > { %v2454_v45 = vshll.u32 %v13432_v30, 16  ;;  %v2458_v46 = vshrl.u32 %v13432_v30, 16  ;;  %v916_v54 = vadd.s32 18, %v560_v47  ;;  %v14414_v49 = vsel %vm16304_vm15, %v3054_v26, %v3056_v28  ;;  %vm14417_vm14 = vmand %vm844_vm0, %vm808_vm11 }
  0x75   : > { %v1517_v29 = vshrl.u32 %v11617_v38, 16  ;;  %v1520_v48 = vshll.u32 %v11617_v38, 16  ;;  %v1527_v52 = vshrl.u32 %v11618_v35, 16  ;;  %v1530_v14 = vshll.u32 %v11618_v35, 16 }
  0x76   : > { %v2456_v60 = vrot.slane %v2454_v45, 1  ;;  %vm809_vm1 = vcmp.ne.s32.totalorder %v571_v42, 0  ;;  %vm845_vm5 = vcmp.lt.s32.totalorder %v571_v42, 0  ;;  %v917_v20 = vadd.s32 18, %v571_v42 }
  0x77   : > { %v1519_v15 = vrot.slane %v1517_v29, 6  ;;  %v1522_v5 = vrot.slane %v1520_v48, 7  ;;  %v1529_v8 = vrot.slane %v1527_v52, 6  ;;  %v1532_v10 = vrot.slane %v1530_v14, 7  ;;  %vm881_vm15 = vmand %vm845_vm5, %vm809_vm1  ;;  %v1028_v48 = vld [vmem:[%s13940_s24 + $0x90] sm:$0xff] }
  0x78   : > { %vm16307_vm3 = vsmask.f32 7424  ;;  %v14422_v62 = vor.u32 %v2458_v46, %v2456_v60  ;;  %v952_v12 = vsel %vm14417_vm14, %v916_v54, %v560_v47  ;;  %v953_v37 = vsel %vm881_vm15, %v917_v20, %v571_v42  ;;  %v1026_v42 = vld [vmem:[%s13940_s24 + $0x80] sm:$0xff]  ;;  %v1027_v54 = vld [vmem:[%s13940_s24 + $0x88] sm:$0xff]  ;;  %v1029_v20 = vld [vmem:[%s13940_s24 + $0x98] sm:$0xff] }
  0x79   : > { %v2457_v11 = vsel %vm16307_vm3, %v2452_v63, %v2456_v60  ;;  %v1523_v9 = vor.u32 %v1522_v5, %v1519_v15  ;;  %v1533_v16 = vor.u32 %v1532_v10, %v1529_v8  ;;  %vm14426_vm11 = vcmp.lt.s32.totalorder %v952_v12, 16  ;;  %v1030_v10 = vld [vmem:[%s13940_s24 + $0xa0] sm:$0xff] }
  0x7a   : > { %12144 = vmatmul.mubr.bf16.gmra.mrb[8].mxu0 %v2457_v11  ;;  %v16308_v53 = vmov 0  ;;  %vm14430_vm0 = vcmp.lt.s32.totalorder %v953_v37, 16  ;;  %v16310_v21 = vmov 0  ;;  %v1265_v63 = vsel %vm14426_vm11, %v1146_v3, 0.0 }
  0x7b   : > { %v16309_v53 = vsel %vm14426_vm11, 4294967295, %v16308_v53  ;;  %v16311_v21 = vsel %vm14430_vm0, 4294967295, %v16310_v21  ;;  %v1266_v47 = vsel %vm14430_vm0, %v1147_v17, 0.0  ;;  %v3058_v26 = vrot.slane %v13442_v19, 1 }
  0x7c   : > { %v3060_v55 = vrot.slane %v13443_v7, 1  ;;  %v1524_v30 = vsel %vm14076_vm7, %v1515_v51, %v1523_v9  ;;  %v1525_v25 = vrot.slane %v1523_v9, 4  ;;  %v11619_v59 = vpack.c.bf16 %v1265_v63, %v1265_v63  ;;  %v14477_v9 = vld [vmem:[%s16195_s1] ss:$0 sm:$0xff] }
  0x7d   : > { %v11620_v38 = vpack.c.bf16 %v1266_v47, %v1266_v47  ;;  %1810 = vst [vmem:[#allocation2 + $0x38] sm:$0xf] %v1524_v30  ;;  %v1535_v50 = vrot.slane %v1533_v16, 4  ;;  %vm16312_vm3 = vcmask 1046528   ;;  %v3062_v17 = vrot.slane %v13445_v2, 1 }
  0x7e   : > { %v14447_v35 = vsel %vm16312_vm3, %v3056_v28, %v3058_v26  ;;  %vm16313_vm14 = vmmov %vm16312_vm3  ;;  %v1534_v58 = vsel %vm14076_vm7, %v1525_v25, %v1533_v16  ;;  %v1537_v45 = vshrl.u32 %v11619_v59, 16  ;;  %v1540_v51 = vshll.u32 %v11619_v59, 16 }
  0x7f   : > { %v14450_v3 = vsel %vm16313_vm14, %v3058_v26, %v3060_v55  ;;  %v1547_v46 = vshrl.u32 %v11620_v38, 16  ;;  %1811 = vst [vmem:[#allocation2 + $0x3c] sm:$0xf] %v1534_v58  ;;  %v1550_v19 = vshll.u32 %v11620_v38, 16  ;;  %vm16314_vm1 = vmmov %vm16312_vm3  ;;  %v3064_v28 = vrot.slane %v14434_v23, 1 }
  0x80   : > { %v14457_v7 = vsel %vm16314_vm1, %v3060_v55, %v3062_v17  ;;  %v378_v29 = vadd.s32 128, %v13928_v4  ;;  %v1539_v52 = vrot.slane %v1537_v45, 6  ;;  %v1542_v14 = vrot.slane %v1540_v51, 7  ;;  %vm16315_vm5 = vmmov %vm16314_vm1 }
  0x81   : > { %v1549_v57 = vrot.slane %v1547_v46, 6  ;;  %v379_v60 = vadd.s32 136, %v13928_v4  ;;  %v1552_v2 = vrot.slane %v1550_v19, 7  ;;  %v14465_v15 = vsel %vm16315_vm5, %v3062_v17, %v3064_v28  ;;  %vm16316_vm15 = vmmov %vm16314_vm1 }
  0x82   : > { %v14467_v5 = vmul.u32.u64.low 3817748708, %v378_v29  ;;  %v14468_v8 = vmul.u32.u64.high 3817748708, %v378_v29, %v14467_v5  ;;  %v1543_v11 = vor.u32 %v1542_v14, %v1539_v52  ;;  %v1069_v16 = vmul.f32 %v14477_v9, %v1026_v42 }
  0x83   : > { %v14471_v12 = vmul.u32.u64.low 3817748708, %v379_v60  ;;  %v14472_v37 = vmul.u32.u64.high 3817748708, %v379_v60, %v14471_v12  ;;  %v14480_v23 = vor.u32 %v1552_v2, %v1549_v57  ;;  %v1070_v63 = vmul.f32 %v14477_v9, %v1027_v54 }
  0x84   : > { %v14484_v47 = vadd.s32 144, %v13928_v4  ;;  %v14487_v26 = vadd.s32 152, %v13928_v4  ;;  %v1544_v55 = vsel %vm14076_vm7, %v1535_v50, %v1543_v11  ;;  %v1545_v30 = vrot.slane %v1543_v11, 4 }
  0x85   : > { %v1112_v25 = vadd.f32 %v14380_v6, %v1069_v16  ;;  %v1071_v59 = vmul.f32 %v14477_v9, %v1028_v48  ;;  %1812 = vst [vmem:[#allocation2 + $0x40] sm:$0xf] %v1544_v55  ;;  %v580_v38 = vshrl.u32 %v14468_v8, 4  ;;  %v1113_v17 = vadd.f32 %v14380_v6, %v1070_v63 }
  0x86   : > { %v1555_v42 = vrot.slane %v14480_v23, 4  ;;  %v1072_v58 = vmul.f32 %v14477_v9, %v1029_v20  ;;  %v13434_v45 = vld [vmem:[#allocation2 + $0x38] sm:$0xff]   ;;  %v1554_v51 = vsel %vm14076_vm7, %v1545_v30, %v14480_v23  ;;  %v591_v50 = vshrl.u32 %v14472_v37, 4 }
  0x87   : > { %v14502_v46 = vadd.f32 %v14380_v6, %v1071_v59  ;;  %v1073_v54 = vmul.f32 %v14477_v9, %v1030_v10  ;;  %1813 = vst [vmem:[#allocation2 + $0x44] sm:$0xf] %v1554_v51  ;;  %v13448_v19 = vld [vmem:[#allocation2 + $0x38] sm:$0xff]   ;;  %v581_v48 = vmul.u32 18, %v580_v38  ;;  %v1148_v52 = vmax.f32 %v1112_v25, 0.0  ;;  %v1031_v25 = vld [vmem:[%s13940_s24 + $0xa8] sm:$0xff] }
  0x88   : > { %v1149_v14 = vmax.f32 %v1113_v17, 0.0  ;;  %v14506_v57 = vadd.f32 %v14380_v6, %v1072_v58  ;;  %v2462_v20 = vshll.u32 %v13434_v45, 16  ;;  %v2466_v2 = vshrl.u32 %v13434_v45, 16  ;;  %v1032_v17 = vld [vmem:[%s13940_s24 + $0xb0] sm:$0xff] }
  0x89   : > { %v592_v5 = vmul.u32 18, %v591_v50  ;;  %v1150_v8 = vmax.f32 %v14502_v46, 0.0  ;;  %v3066_v11 = vrot.slane %v13448_v19, 1  ;;  %v582_v12 = vsub.s32 %v378_v29, %v581_v48 }
  0x8a   : > { %v14510_v37 = vmul.u32.u64.low 3817748708, %v14484_v47  ;;  %v14511_v10 = vmul.u32.u64.high 3817748708, %v14484_v47, %v14510_v37  ;;  %v2464_v16 = vrot.slane %v2462_v20, 1  ;;  %vm16317_vm1 = vsmask.f32 7424 }
  0x8b   : > { %v593_v63 = vsub.s32 %v379_v60, %v592_v5  ;;  %v14514_v55 = vmul.u32.u64.low 3817748708, %v14487_v26  ;;  %v14515_v30 = vmul.u32.u64.high 3817748708, %v14487_v26, %v14514_v55  ;;  %v14519_v59 = vsel %vm16316_vm15, %v3064_v28, %v3066_v11 }
  0x8c   : > { %vm810_vm3 = vcmp.ne.s32.totalorder %v582_v12, 0  ;;  %vm846_vm14 = vcmp.lt.s32.totalorder %v582_v12, 0  ;;  %v918_v38 = vadd.s32 18, %v582_v12  ;;  %v2465_v29 = vsel %vm16317_vm1, %v14422_v62, %v2464_v16 }
  0x8d   : > { %v2468_v58 = vor.u32 %v2466_v2, %v2464_v16  ;;  %vm811_vm5 = vcmp.ne.s32.totalorder %v593_v63, 0  ;;  %vm847_vm0 = vcmp.lt.s32.totalorder %v593_v63, 0  ;;  %vm882_vm4 = vmand %vm846_vm14, %vm810_vm3  ;;  %12147 = vmatprep.mubr.bf16.mxu0 %v2465_v29  ;;  %v919_v45 = vadd.s32 18, %v593_v63 }
  0x8e   : > { %vm14524_vm11 = vmand %vm847_vm0, %vm811_vm5  ;;  %v954_v51 = vsel %vm882_vm4, %v918_v38, %v582_v12  ;;  %v602_v28 = vshrl.u32 %v14511_v10, 4  ;;  %v1151_v50 = vmax.f32 %v14506_v57, 0.0  ;;  %v13436_v19 = vld [vmem:[#allocation2 + $0x40] sm:$0xff]   ;;  %v16320_v48 = vmov 0 }
  0x8f   : > { %vm14530_vm15 = vcmp.lt.s32.totalorder %v954_v51, 16  ;;  %v1074_v62 = vmul.f32 %v14477_v9, %v1031_v25  ;;  %v14536_v20 = vadd.f32 %v14380_v6, %v1073_v54  ;;  %v14539_v2 = vmul.f32 %v14477_v9, %v1032_v17  ;;  %v14541_v5 = vld [vmem:[#allocation2 + $0x40] sm:$0xff]   ;;  %vm16326_vm14 = vmmov %vm16317_vm1 }
  0x90   : > { %v16321_v48 = vsel %vm14530_vm15, 4294967295, %v16320_v48  ;;  %v955_v12 = vsel %vm14524_vm11, %v919_v45, %v593_v63  ;;  %v1267_v57 = vsel %vm14530_vm15, %v1148_v52, 0.0  ;;  %v603_v37 = vmul.u32 18, %v602_v28 }
  0x91   : > { %v613_v10 = vshrl.u32 %v14515_v30, 4  ;;  %v2470_v16 = vshll.u32 %v13436_v19, 16  ;;  %vm14548_vm4 = vcmp.lt.s32.totalorder %v955_v12, 16  ;;  %v16322_v55 = vmov 0 }
  0x92   : > { %v16323_v55 = vsel %vm14548_vm4, 4294967295, %v16322_v55  ;;  %v11621_v54 = vpack.c.bf16 %v1267_v57, %v1267_v57  ;;  %v14553_v25 = vadd.s32 160, %v13928_v4  ;;  %v3068_v38 = vrot.slane %v14541_v5, 1 }
  0x93   : > { %16324 = vst [vmem:[#allocation6_spill] sm:$0xff] %v16323_v55  ;;  %v1268_v63 = vsel %vm14548_vm4, %v1149_v14, 0.0  ;;  %v604_v17 = vsub.s32 %v14484_v47, %v603_v37  ;;  %v614_v52 = vmul.u32 18, %v613_v10  ;;  %v14559_v29 = vrot.slane %v2470_v16, 1 }
  0x94   : > { %v11622_v30 = vpack.c.bf16 %v1268_v63, %v1268_v63  ;;  %v1557_v60 = vshrl.u32 %v11621_v54, 16  ;;  %v1560_v45 = vshll.u32 %v11621_v54, 16  ;;  %vm16325_vm11 = vcmask 1046528  }
  0x95   : > { %v14564_v51 = vsel %vm16325_vm11, %v3066_v11, %v3068_v38  ;;  %v615_v28 = vsub.s32 %v14487_v26, %v614_v52  ;;  %vm812_vm0 = vcmp.ne.s32.totalorder %v604_v17, 0  ;;  %vm848_vm3 = vcmp.lt.s32.totalorder %v604_v17, 0 }
  0x96   : > { %v2473_v14 = vsel %vm16326_vm14, %v2468_v58, %v14559_v29  ;;  %v1559_v19 = vrot.slane %v1557_v60, 6  ;;  %v1562_v47 = vrot.slane %v1560_v45, 7  ;;  %v1567_v12 = vshrl.u32 %v11622_v30, 16  ;;  %vm14569_vm1 = vmand %vm848_vm3, %vm812_vm0 }
  0x97   : > { %12148 = vmatmul.mubr.bf16.gmra.mrb[12].mxu0 %v2473_v14  ;;  %v1570_v37 = vshll.u32 %v11622_v30, 16  ;;  %vm813_vm5 = vcmp.ne.s32.totalorder %v615_v28, 0  ;;  %vm849_vm4 = vcmp.lt.s32.totalorder %v615_v28, 0  ;;  %v920_v11 = vadd.s32 18, %v604_v17 }
  0x98   : > { %12187 = vmatprep.mubr.bf16.mxu0 %v14410_v61  ;;  %v1563_v26 = vor.u32 %v1562_v47, %v1559_v19  ;;  %v1569_v10 = vrot.slane %v1567_v12, 6  ;;  %vm885_vm11 = vmand %vm849_vm4, %vm813_vm5  ;;  %v921_v16 = vadd.s32 18, %v615_v28  ;;  %v383_v58 = vadd.s32 168, %v13928_v4  ;;  %v13444_v19 = vld [vmem:[%s16197_s3 + $0xc8] sm:$0xff]  }
  0x99   : > { %v1572_v54 = vrot.slane %v1570_v37, 7  ;;  %v956_v63 = vsel %vm14569_vm1, %v920_v11, %v604_v17  ;;  %v14578_v52 = vmul.u32.u64.low 3817748708, %v14553_v25  ;;  %v14579_v60 = vmul.u32.u64.high 3817748708, %v14553_v25, %v14578_v52  ;;  %v1033_v11 = vld [vmem:[%s13940_s24 + $0xb8] sm:$0xff] }
  0x9a   : > { %v1564_v61 = vsel %vm14076_vm7, %v1555_v42, %v1563_v26  ;;  %v1565_v30 = vrot.slane %v1563_v26, 4  ;;  %v957_v45 = vsel %vm885_vm11, %v921_v16, %v615_v28  ;;  %vm14585_vm4 = vcmp.lt.s32.totalorder %v956_v63, 16 }
  0x9b   : > { %v1573_v17 = vor.u32 %v1572_v54, %v1569_v10  ;;  %1814 = vst [vmem:[#allocation2 + $0x48] sm:$0xf] %v1564_v61  ;;  %vm14592_vm0 = vcmp.lt.s32.totalorder %v957_v45, 16  ;;  %v16331_v47 = vmov 0  ;;  %v1269_v23 = vsel %vm14585_vm4, %v1150_v8, 0.0 }
  0x9c   : > { %v16332_v47 = vsel %vm14592_vm0, 4294967295, %v16331_v47  ;;  %v14601_v42 = vadd.f32 %v14380_v6, %v1074_v62  ;;  %v1270_v28 = vsel %vm14592_vm0, %v1151_v50, 0.0  ;;  %v11623_v12 = vpack.c.bf16 %v1269_v23, %v1269_v23 }
  0x9d   : > { %v14605_v57 = vmul.u32.u64.low 3817748708, %v383_v58  ;;  %v14606_v37 = vmul.u32.u64.high 3817748708, %v383_v58, %v14605_v57  ;;  %v1574_v26 = vsel %vm14076_vm7, %v1565_v30, %v1573_v17  ;;  %v11624_v10 = vpack.c.bf16 %v1270_v28, %v1270_v28 }
  0x9e   : > { %v1575_v16 = vrot.slane %v1573_v17, 4  ;;  %v624_v46 = vshrl.u32 %v14579_v60, 4  ;;  %1815 = vst [vmem:[#allocation2 + $0x4c] sm:$0xf] %v1574_v26  ;;  %v1577_v8 = vshrl.u32 %v11623_v12, 16  ;;  %v1580_v54 = vshll.u32 %v11623_v12, 16 }
  0x9f   : > { %v1152_v62 = vmax.f32 %v14536_v20, 0.0  ;;  %v1153_v63 = vmax.f32 %v14601_v42, 0.0  ;;  %12188 = vmatmul.mubr.bf16.vlgmr.msra.gmra.mrb[0].mxu0 %v14414_v49  ;;  %v1587_v50 = vshrl.u32 %v11624_v10, 16  ;;  %v1590_v52 = vshll.u32 %v11624_v10, 16  ;;  %v13447_v49 = vld [vmem:[%s16197_s3 + $0xd0] sm:$0xff]   ;;  %v13456_v42 = vld [vmem:[%s16197_s3 + $0xe8] sm:$0xff]  }
  0xa0   : > { %v625_v61 = vmul.u32 18, %v624_v46  ;;  %v14616_v45 = vadd.s32 176, %v13928_v4  ;;  %12224 = vmatpush3.bf16.msra.mxu0 %v14323_v40  ;;  %12191 = vmatprep.mubr.bf16.mxu0 %v14447_v35  ;;  %v1579_v60 = vrot.slane %v1577_v8, 6  ;;  %v1582_v30 = vrot.slane %v1580_v54, 7 }
  0xa1   : > { %v635_v17 = vshrl.u32 %v14606_v37, 4  ;;  %v14622_v20 = vadd.s32 184, %v13928_v4  ;;  %12225 = vmatprep.subr.bf16.mxu0 %v13444_v19  ;;  %v1589_v23 = vrot.slane %v1587_v50, 6  ;;  %v1592_v28 = vrot.slane %v1590_v52, 7  ;;  %v13450_v37 = vld [vmem:[%s16197_s3 + $0xd8] sm:$0xff]  }
  0xa2   : > { %v626_v12 = vsub.s32 %v14553_v25, %v625_v61  ;;  %v1076_v40 = vmul.f32 %v14477_v9, %v1033_v11  ;;  %v1583_v57 = vor.u32 %v1582_v30, %v1579_v60  ;;  %v14646_v52 = vadd.f32 %v14380_v6, %v14539_v2 }
  0xa3   : > { %v636_v35 = vmul.u32 18, %v635_v17  ;;  %v14630_v26 = vmul.u32.u64.low 3817748708, %v14616_v45  ;;  %v14631_v10 = vmul.u32.u64.high 3817748708, %v14616_v45, %v14630_v26  ;;  %v14636_v46 = vor.u32 %v1592_v28, %v1589_v23 }
  0xa4   : > { %vm814_vm3 = vcmp.ne.s32.totalorder %v626_v12, 0  ;;  %vm850_vm14 = vcmp.lt.s32.totalorder %v626_v12, 0  ;;  %v922_v8 = vadd.s32 18, %v626_v12  ;;  %12226 = vmatpush3.bf16.msra.mxu0 %v13444_v19  ;;  %v1584_v25 = vsel %vm14076_vm7, %v1575_v16, %v1583_v57 }
  0xa5   : > { %v1585_v11 = vrot.slane %v1583_v57, 4  ;;  %v637_v54 = vsub.s32 %v383_v58, %v636_v35  ;;  %vm14640_vm1 = vmand %vm850_vm14, %vm814_vm3  ;;  %12227 = vmatprep.subr.bf16.mxu0 %v13447_v49  ;;  %v14648_v61 = vld [vmem:[#allocation2 + $0x48] sm:$0xff]   ;;  %1816 = vst [vmem:[#allocation2 + $0x50] sm:$0xf] %v1584_v25  ;;  %v1595_v60 = vrot.slane %v14636_v46, 4  ;;  %v16335_v23 = vmov 0 }
  0xa6   : > { %v958_v19 = vsel %vm14640_vm1, %v922_v8, %v626_v12  ;;  %v14654_v16 = vmul.u32.u64.low 3817748708, %v14622_v20  ;;  %v14655_v58 = vmul.u32.u64.high 3817748708, %v14622_v20, %v14654_v16  ;;  %v3070_v17 = vrot.slane %v14648_v61, 1  ;;  %v1034_v8 = vld [vmem:[%s13940_s24 + $0xc0] sm:$0xff] }
  0xa7   : > { %v1594_v30 = vsel %vm14076_vm7, %v1585_v11, %v14636_v46  ;;  %vm815_vm5 = vcmp.ne.s32.totalorder %v637_v54, 0  ;;  %vm851_vm11 = vcmp.lt.s32.totalorder %v637_v54, 0  ;;  %v923_v2 = vadd.s32 18, %v637_v54  ;;  %12192 = vmatmul.mubr.bf16.gmra.mrb[4].mxu0 %v14450_v3 }
  0xa8   : > { %1817 = vst [vmem:[#allocation2 + $0x54] sm:$0xf] %v1594_v30  ;;  %vm887_vm3 = vmand %vm851_vm11, %vm815_vm5  ;;  %vm14662_vm14 = vcmp.lt.s32.totalorder %v958_v19, 16  ;;  %v646_v28 = vshrl.u32 %v14631_v10, 4  ;;  %v14668_v12 = vadd.f32 %v14380_v6, %v1076_v40  ;;  %12195 = vmatprep.mubr.bf16.mxu0 %v14457_v7  ;;  %12228 = vmatpush3.bf16.msra.mxu0 %v13447_v49  ;;  %v1154_v35 = vmax.f32 %v14646_v52, 0.0  ;;  %v13453_v7 = vld [vmem:[%s16197_s3 + $0xe0] sm:$0xff]  }
  0xa9   : > { %v16336_v23 = vsel %vm14662_vm14, 4294967295, %v16335_v23  ;;  %v959_v57 = vsel %vm887_vm3, %v923_v2, %v637_v54  ;;  %v1271_v3 = vsel %vm14662_vm14, %v1152_v62, 0.0  ;;  %v14675_v26 = vadd.s32 192, %v13928_v4  ;;  %12229 = vmatprep.subr.bf16.mxu0 %v13450_v37  ;;  %v1035_v54 = vld [vmem:[%s13940_s24 + $0xc8] sm:$0xff] }
  0xaa   : > { %16337 = vst [vmem:[#allocation7_spill] sm:$0xff] %v16336_v23  ;;  %vm16338_vm1 = vcmask 1046528   ;;  %vm14687_vm5 = vcmp.lt.s32.totalorder %v959_v57, 16  ;;  %v16339_v49 = vmov 0  ;;  %v11625_v62 = vpack.c.bf16 %v1271_v3, %v1271_v3 }
  0xab   : > { %v14682_v40 = vsel %vm16338_vm1, %v3068_v38, %v3070_v17  ;;  %v16340_v49 = vsel %vm14687_vm5, 4294967295, %v16339_v49  ;;  %v647_v10 = vmul.u32 18, %v646_v28  ;;  %v1272_v25 = vsel %vm14687_vm5, %v1153_v63, 0.0 }
  0xac   : > { %16341 = vst [vmem:[#allocation8_spill] sm:$0xff] %v16340_v49  ;;  %v657_v5 = vshrl.u32 %v14655_v58, 4  ;;  %v1155_v38 = vmax.f32 %v14668_v12, 0.0  ;;  %v14699_v11 = vadd.s32 200, %v13928_v4  ;;  %v11626_v50 = vpack.c.bf16 %v1272_v25, %v1272_v25  ;;  %12230 = vmatpush3.bf16.msra.mxu0 %v13450_v37 }
  0xad   : > { %v1597_v52 = vshrl.u32 %v11625_v62, 16  ;;  %v1600_v19 = vshll.u32 %v11625_v62, 16  ;;  %v648_v16 = vsub.s32 %v14616_v45, %v647_v10  ;;  %v1077_v2 = vmul.f32 %v14477_v9, %v1034_v8  ;;  %12231 = vmatprep.subr.bf16.mxu0 %v13453_v7 }
  0xae   : > { %v658_v30 = vmul.u32 18, %v657_v5  ;;  %v14707_v63 = vmul.u32.u64.low 3817748708, %v14675_v26  ;;  %v14708_v58 = vmul.u32.u64.high 3817748708, %v14675_v26, %v14707_v63  ;;  %v1607_v57 = vshrl.u32 %v11626_v50, 16 }
  0xaf   : > { %v1599_v28 = vrot.slane %v1597_v52, 6  ;;  %v1602_v12 = vrot.slane %v1600_v19, 7  ;;  %v1610_v3 = vshll.u32 %v11626_v50, 16  ;;  %v14711_v62 = vld [vmem:[#allocation2 + $0x50] sm:$0xff]   ;;  %vm816_vm11 = vcmp.ne.s32.totalorder %v648_v16, 0  ;;  %12196 = vmatmul.mubr.bf16.gmra.mrb[8].mxu0 %v14465_v15 }
  0xb0   : > { %v659_v45 = vsub.s32 %v14622_v20, %v658_v30  ;;  %vm852_vm3 = vcmp.lt.s32.totalorder %v648_v16, 0  ;;  %v924_v37 = vadd.s32 18, %v648_v16  ;;  %v1609_v25 = vrot.slane %v1607_v57, 6  ;;  %12199 = vmatprep.mubr.bf16.mxu0 %v14519_v59  ;;  %12232 = vmatpush3.bf16.msra.mxu0 %v13453_v7  ;;  %v13459_v15 = vld [vmem:[%s16197_s3 + $0xf0] sm:$0xff]  }
  0xb1   : > { %v1603_v10 = vor.u32 %v1602_v12, %v1599_v28  ;;  %v1612_v5 = vrot.slane %v1610_v3, 7  ;;  %vm14715_vm1 = vmand %vm852_vm3, %vm816_vm11  ;;  %v1078_v8 = vmul.f32 %v14477_v9, %v1035_v54  ;;  %v3072_v50 = vrot.slane %v14711_v62, 1  ;;  %12233 = vmatprep.subr.bf16.mxu0 %v13456_v42  ;;  %v13462_v12 = vld [vmem:[%s16197_s3 + $0xf8] sm:$0xff]  }
  0xb2   : > { %vm817_vm5 = vcmp.ne.s32.totalorder %v659_v45, 0  ;;  %vm853_vm14 = vcmp.lt.s32.totalorder %v659_v45, 0  ;;  %v925_v20 = vadd.s32 18, %v659_v45  ;;  %v960_v59 = vsel %vm14715_vm1, %v924_v37, %v648_v16 }
  0xb3   : > { %v1604_v52 = vsel %vm14076_vm7, %v1595_v60, %v1603_v10  ;;  %v1605_v19 = vrot.slane %v1603_v10, 4  ;;  %v1613_v30 = vor.u32 %v1612_v5, %v1609_v25  ;;  %vm889_vm11 = vmand %vm853_vm14, %vm817_vm5  ;;  %vm16344_vm3 = vcmask 1046528  }
  0xb4   : > { %v14736_v7 = vsel %vm16344_vm3, %v3070_v17, %v3072_v50  ;;  %1818 = vst [vmem:[#allocation2 + $0x58] sm:$0xf] %v1604_v52  ;;  %v961_v54 = vsel %vm889_vm11, %v925_v20, %v659_v45  ;;  %vm14738_vm0 = vcmp.lt.s32.totalorder %v960_v59, 16  ;;  %v16345_v46 = vmov 0  ;;  %12234 = vmatpush3.bf16.msra.mxu0 %v13456_v42  ;;  %v1036_v52 = vld [vmem:[%s13940_s24 + $0xd0] sm:$0xff] }
  0xb5   : > { %v16346_v46 = vsel %vm14738_vm0, 4294967295, %v16345_v46  ;;  %v668_v60 = vshrl.u32 %v14708_v58, 4  ;;  %v1614_v28 = vsel %vm14076_vm7, %v1605_v19, %v1613_v30  ;;  %vm14745_vm14 = vcmp.lt.s32.totalorder %v961_v54, 16  ;;  %12235 = vmatprep.subr.bf16.mxu0 %v13459_v15  ;;  %v1037_v54 = vld [vmem:[%s13940_s24 + $0xd8] sm:$0xff] }
  0xb6   : > { %16347 = vst [vmem:[#allocation9_spill] sm:$0xff] %v16346_v46  ;;  %v16348_v16 = vmov 0  ;;  %v1273_v61 = vsel %vm14738_vm0, %v1154_v35, 0.0  ;;  %v1615_v17 = vrot.slane %v1613_v30, 4  ;;  %1819 = vst [vmem:[#allocation2 + $0x5c] sm:$0xf] %v1614_v28  ;;  %v1120_v45 = vadd.f32 %v14380_v6, %v1077_v2 }
  0xb7   : > { %v16349_v16 = vsel %vm14745_vm14, 4294967295, %v16348_v16  ;;  %v1274_v58 = vsel %vm14745_vm14, %v1155_v38, 0.0  ;;  %v11627_v57 = vpack.c.bf16 %v1273_v61, %v1273_v61  ;;  %v669_v3 = vmul.u32 18, %v668_v60  ;;  %12200 = vmatmul.mubr.bf16.gmra.mrb[12].mxu0 %v14564_v51  ;;  %v13844_v46 = vld [vmem:[%s13940_s24 + $0x110] sm:$0xff] }
  0xb8   : > { %16350 = vst [vmem:[#allocation10_spill] sm:$0xff] %v16349_v16  ;;  %v11628_v37 = vpack.c.bf16 %v1274_v58, %v1274_v58  ;;  %v14758_v10 = vmul.u32.u64.low 3817748708, %v14699_v11  ;;  %v14759_v25 = vmul.u32.u64.high 3817748708, %v14699_v11, %v14758_v10  ;;  %v14762_v35 = vadd.f32 %v14380_v6, %v1078_v8  ;;  %12203 = vmatprep.mubr.bf16.mxu0 %v14682_v40  ;;  %12236 = vmatpush3.bf16.msra.mxu0 %v13459_v15 }
  0xb9   : > { %v1617_v5 = vshrl.u32 %v11627_v57, 16  ;;  %v1620_v63 = vshll.u32 %v11627_v57, 16  ;;  %v670_v20 = vsub.s32 %v14675_v26, %v669_v3  ;;  %v1156_v38 = vmax.f32 %v1120_v45, 0.0  ;;  %v14774_v26 = vld [vmem:[%s16197_s3 + $0x100] sm:$0xff]   ;;  %12237 = vmatprep.subr.bf16.mxu0 %v13462_v12 }
  0xba   : > { %v1627_v42 = vshrl.u32 %v11628_v37, 16  ;;  %v1630_v2 = vshll.u32 %v11628_v37, 16  ;;  %v1157_v19 = vmax.f32 %v14762_v35, 0.0  ;;  %v388_v30 = vadd.s32 208, %v13928_v4 }
  0xbb   : > { %v1619_v8 = vrot.slane %v1617_v5, 6  ;;  %v1622_v59 = vrot.slane %v1620_v63, 7  ;;  %vm818_vm5 = vcmp.ne.s32.totalorder %v670_v20, 0  ;;  %vm854_vm1 = vcmp.lt.s32.totalorder %v670_v20, 0 }
  0xbc   : > { %v1629_v51 = vrot.slane %v1627_v42, 6  ;;  %v1632_v60 = vrot.slane %v1630_v2, 7  ;;  %v679_v28 = vshrl.u32 %v14759_v25, 4  ;;  %vm890_vm11 = vmand %vm854_vm1, %vm818_vm5  ;;  %v926_v61 = vadd.s32 18, %v670_v20  ;;  %12238 = vmatpush3.bf16.msra.mxu0 %v13462_v12 }
  0xbd   : > { %v1623_v58 = vor.u32 %v1622_v59, %v1619_v8  ;;  %v14778_v40 = vadd.s32 216, %v13928_v4  ;;  %v14780_v57 = vmul.u32.u64.low 3817748708, %v388_v30  ;;  %v14781_v3 = vmul.u32.u64.high 3817748708, %v388_v30, %v14780_v57  ;;  %v14783_v15 = vld [vmem:[#allocation2 + $0x58] sm:$0xff]   ;;  %12275 = vmatprep.subr.bf16.mxu0 %v14774_v26 }
  0xbe   : > { %v1633_v45 = vor.u32 %v1632_v60, %v1629_v51  ;;  %v680_v37 = vmul.u32 18, %v679_v28  ;;  %v962_v10 = vsel %vm890_vm11, %v926_v61, %v670_v20  ;;  %v1079_v35 = vmul.f32 %v14477_v9, %v1036_v52 }
  0xbf   : > { %v1624_v25 = vsel %vm14076_vm7, %v1615_v17, %v1623_v58  ;;  %v1625_v5 = vrot.slane %v1623_v58, 4  ;;  %vm14788_vm3 = vcmp.lt.s32.totalorder %v962_v10, 16  ;;  %v16351_v63 = vmov 0  ;;  %12204 = vmatmul.mubr.bf16.gmra.mrb[16].mxu0 %v14736_v7 }
  0xc0   : > { %v16352_v63 = vsel %vm14788_vm3, 4294967295, %v16351_v63  ;;  %v1080_v42 = vmul.f32 %v14477_v9, %v1037_v54  ;;  %v3074_v2 = vrot.slane %v14783_v15, 1  ;;  %1820 = vst [vmem:[#allocation2 + $0x60] sm:$0xf] %v1624_v25  ;;  %v681_v8 = vsub.s32 %v14699_v11, %v680_v37 }
  0xc1   : > { %16353 = vst [vmem:[#allocation11_spill] sm:$0xff] %v16352_v63  ;;  %v1275_v20 = vsel %vm14788_vm3, %v1156_v38, 0.0  ;;  %v1635_v52 = vrot.slane %v1633_v45, 4  ;;  %v1634_v17 = vsel %vm14076_vm7, %v1625_v5, %v1633_v45  ;;  %v690_v51 = vshrl.u32 %v14781_v3, 4  ;;  %v13837_v63 = vld [vmem:[%s13940_s24 + $0xd8] sm:$0xff] }
  0xc2   : > { %v11629_v59 = vpack.c.bf16 %v1275_v20, %v1275_v20  ;;  %v1122_v54 = vadd.f32 %v14380_v6, %v1079_v35  ;;  %vm16354_vm5 = vcmask 1046528   ;;  %1821 = vst [vmem:[#allocation2 + $0x64] sm:$0xf] %v1634_v17  ;;  %vm819_vm1 = vcmp.ne.s32.totalorder %v681_v8, 0  ;;  %v14811_v6 = vld [vmem:[%s16196_s2] ss:$0 sm:$0xff] }
  0xc3   : > { %v3075_v11 = vsel %vm16354_vm5, %v3072_v50, %v3074_v2  ;;  %vm855_vm11 = vcmp.lt.s32.totalorder %v681_v8, 0  ;;  %v927_v12 = vadd.s32 18, %v681_v8  ;;  %v691_v28 = vmul.u32 18, %v690_v51  ;;  %v1038_v20 = vld [vmem:[%s13940_s24 + $0xe0] sm:$0xff] }
  0xc4   : > { %12207 = vmatprep.mubr.bf16.mxu0 %v3075_v11  ;;  %vm891_vm3 = vmand %vm855_vm11, %vm819_vm1  ;;  %v1637_v38 = vshrl.u32 %v11629_v59, 16  ;;  %v1640_v60 = vshll.u32 %v11629_v59, 16  ;;  %v14814_v7 = vadd.f32 %v14811_v6, %v1080_v42  ;;  %v1158_v58 = vmax.f32 %v1122_v54, 0.0 }
  0xc5   : > { %v963_v62 = vsel %vm891_vm3, %v927_v12, %v681_v8  ;;  %v14817_v50 = vmul.u32.u64.low 3817748708, %v14778_v40  ;;  %v14818_v61 = vmul.u32.u64.high 3817748708, %v14778_v40, %v14817_v50  ;;  %v16355_v57 = vmov 0 }
  0xc6   : > { %vm14820_vm5 = vcmp.lt.s32.totalorder %v963_v62, 16  ;;  %v1639_v3 = vrot.slane %v1637_v38, 6  ;;  %v1642_v45 = vrot.slane %v1640_v60, 7  ;;  %v692_v37 = vsub.s32 %v388_v30, %v691_v28 }
  0xc7   : > { %v16356_v57 = vsel %vm14820_vm5, 4294967295, %v16355_v57  ;;  %v1276_v10 = vsel %vm14820_vm5, %v1157_v19, 0.0  ;;  %v1159_v35 = vmax.f32 %v14814_v7, 0.0  ;;  %v390_v25 = vadd.s32 224, %v13928_v4 }
  0xc8   : > { %16357 = vst [vmem:[#allocation12_spill] sm:$0xff] %v16356_v57  ;;  %v391_v5 = vadd.s32 232, %v13928_v4  ;;  %v11630_v42 = vpack.c.bf16 %v1276_v10, %v1276_v10  ;;  %v1643_v8 = vor.u32 %v1642_v45, %v1639_v3  ;;  %vm820_vm3 = vcmp.ne.s32.totalorder %v692_v37, 0 }
  0xc9   : > { %vm856_vm1 = vcmp.lt.s32.totalorder %v692_v37, 0  ;;  %v701_v17 = vshrl.u32 %v14818_v61, 4  ;;  %v928_v30 = vadd.s32 18, %v692_v37  ;;  %v14838_v54 = vld [vmem:[#allocation2 + $0x60] sm:$0xff]   ;;  %v1039_v61 = vld [vmem:[%s13940_s24 + $0xe8] sm:$0xff] }
  0xca   : > { %vm14831_vm11 = vmand %vm856_vm1, %vm820_vm3  ;;  %v14835_v19 = vmul.u32.u64.low 3817748708, %v390_v25  ;;  %v14836_v51 = vmul.u32.u64.high 3817748708, %v390_v25, %v14835_v19  ;;  %v1644_v11 = vsel %vm14076_vm7, %v1635_v52, %v1643_v8  ;;  %v1645_v12 = vrot.slane %v1643_v8, 4 }
  0xcb   : > { %v1647_v38 = vshrl.u32 %v11630_v42, 16  ;;  %v1650_v60 = vshll.u32 %v11630_v42, 16  ;;  %1822 = vst [vmem:[#allocation2 + $0x68] sm:$0xf] %v1644_v11  ;;  %v702_v28 = vmul.u32 18, %v701_v17  ;;  %v964_v7 = vsel %vm14831_vm11, %v928_v30, %v692_v37 }
  0xcc   : > { %v14844_v62 = vmul.u32.u64.low 3817748708, %v391_v5  ;;  %v14845_v50 = vmul.u32.u64.high 3817748708, %v391_v5, %v14844_v62  ;;  %v3076_v3 = vrot.slane %v14838_v54, 1  ;;  %vm14849_vm3 = vcmp.lt.s32.totalorder %v964_v7, 16 }
  0xcd   : > { %v1649_v45 = vrot.slane %v1647_v38, 6  ;;  %v1652_v10 = vrot.slane %v1650_v60, 7  ;;  %v16360_v19 = vmov 0  ;;  %v703_v52 = vsub.s32 %v14778_v40, %v702_v28 }
  0xce   : > { %v16361_v19 = vsel %vm14849_vm3, 4294967295, %v16360_v19  ;;  %v1277_v42 = vsel %vm14849_vm3, %v1158_v58, 0.0  ;;  %v712_v8 = vshrl.u32 %v14836_v51, 4  ;;  %v1081_v37 = vmul.f32 %v14477_v9, %v1038_v20 }
  0xcf   : > { %16362 = vst [vmem:[#allocation13_spill] sm:$0xff] %v16361_v19  ;;  %vm16363_vm1 = vcmask 1046528   ;;  %v1653_v59 = vor.u32 %v1652_v10, %v1649_v45  ;;  %v11631_v30 = vpack.c.bf16 %v1277_v42, %v1277_v42  ;;  %v1082_v11 = vmul.f32 %v14477_v9, %v1039_v61 }
  0xd0   : > { %v3077_v17 = vsel %vm16363_vm1, %v3074_v2, %v3076_v3  ;;  %vm821_vm11 = vcmp.ne.s32.totalorder %v703_v52, 0  ;;  %vm857_vm5 = vcmp.lt.s32.totalorder %v703_v52, 0  ;;  %v929_v40 = vadd.s32 18, %v703_v52 }
  0xd1   : > { %12208 = vmatmul.mubr.bf16.gmra.mrb[20].mxu0 %v3077_v17  ;;  %v713_v38 = vmul.u32 18, %v712_v8  ;;  %v1654_v58 = vsel %vm14076_vm7, %v1645_v12, %v1653_v59  ;;  %vm893_vm3 = vmand %vm857_vm5, %vm821_vm11  ;;  %v1655_v20 = vrot.slane %v1653_v59, 4  ;;  %v1657_v51 = vshrl.u32 %v11631_v30, 16 }
  0xd2   : > { %v1660_v60 = vshll.u32 %v11631_v30, 16  ;;  %1823 = vst [vmem:[#allocation2 + $0x6c] sm:$0xf] %v1654_v58  ;;  %v965_v15 = vsel %vm893_vm3, %v929_v40, %v703_v52  ;;  %v723_v2 = vshrl.u32 %v14845_v50, 4  ;;  %v1124_v7 = vadd.f32 %v14811_v6, %v1081_v37  ;;  %v1040_v40 = vld [vmem:[%s13940_s24 + $0xf0] sm:$0xff] }
  0xd3   : > { %v714_v28 = vsub.s32 %v390_v25, %v713_v38  ;;  %vm14868_vm1 = vcmp.lt.s32.totalorder %v965_v15, 16  ;;  %v16364_v62 = vmov 0  ;;  %v1659_v61 = vrot.slane %v1657_v51, 6 }
  0xd4   : > { %v16365_v62 = vsel %vm14868_vm1, 4294967295, %v16364_v62  ;;  %v1662_v45 = vrot.slane %v1660_v60, 7  ;;  %v1125_v12 = vadd.f32 %v14811_v6, %v1082_v11  ;;  %v1278_v10 = vsel %vm14868_vm1, %v1159_v35, 0.0 }
  0xd5   : > { %16366 = vst [vmem:[#allocation14_spill] sm:$0xff] %v16365_v62  ;;  %v724_v42 = vmul.u32 18, %v723_v2  ;;  %vm822_vm5 = vcmp.ne.s32.totalorder %v714_v28, 0  ;;  %vm858_vm3 = vcmp.lt.s32.totalorder %v714_v28, 0  ;;  %v11632_v25 = vpack.c.bf16 %v1278_v10, %v1278_v10 }
  0xd6   : > { %v1663_v52 = vor.u32 %v1662_v45, %v1659_v61  ;;  %vm14875_vm11 = vmand %vm858_vm3, %vm822_vm5  ;;  %v930_v8 = vadd.s32 18, %v714_v28  ;;  %v1160_v37 = vmax.f32 %v1124_v7, 0.0  ;;  %v1161_v59 = vmax.f32 %v1125_v12, 0.0 }
  0xd7   : > { %v725_v17 = vsub.s32 %v391_v5, %v724_v42  ;;  %v392_v30 = vadd.s32 240, %v13928_v4  ;;  %v393_v11 = vadd.s32 248, %v13928_v4  ;;  %v1667_v58 = vshrl.u32 %v11632_v25, 16 }
  0xd8   : > { %v1664_v35 = vsel %vm14076_vm7, %v1655_v20, %v1663_v52  ;;  %v1665_v38 = vrot.slane %v1663_v52, 4  ;;  %v1670_v51 = vshll.u32 %v11632_v25, 16  ;;  %v966_v5 = vsel %vm14875_vm11, %v930_v8, %v714_v28  ;;  %v1041_v25 = vld [vmem:[%s13940_s24 + $0xf8] sm:$0xff] }
  0xd9   : > { %1824 = vst [vmem:[#allocation2 + $0x70] sm:$0xf] %v1664_v35  ;;  %vm823_vm5 = vcmp.ne.s32.totalorder %v725_v17, 0  ;;  %vm859_vm3 = vcmp.lt.s32.totalorder %v725_v17, 0  ;;  %v931_v60 = vadd.s32 18, %v725_v17  ;;  %v14886_v15 = vld [vmem:[#allocation2 + $0x68] sm:$0xff]   ;;  %v1083_v20 = vmul.f32 %v14477_v9, %v1040_v40 }
  0xda   : > { %v1669_v2 = vrot.slane %v1667_v58, 6  ;;  %v1672_v7 = vrot.slane %v1670_v51, 7  ;;  %vm895_vm1 = vmand %vm859_vm3, %vm823_vm5  ;;  %vm14888_vm14 = vcmp.lt.s32.totalorder %v966_v5, 16  ;;  %v16369_v61 = vmov 0  ;;  %v14919_v51 = vld [vmem:[%s16195_s1] ss:$0 sm:$0xff] }
  0xdb   : > { %v16370_v61 = vsel %vm14888_vm14, 4294967295, %v16369_v61  ;;  %v967_v45 = vsel %vm895_vm1, %v931_v60, %v725_v17  ;;  %v1279_v12 = vsel %vm14888_vm14, %v1160_v37, 0.0  ;;  %v16226_v28 = vrot.slane %v14886_v15, 1 }
  0xdc   : > { %16371 = vst [vmem:[#allocation15_spill] sm:$0xff] %v16370_v61  ;;  %v14895_v10 = vmul.u32.u64.low 3817748708, %v392_v30  ;;  %v14896_v42 = vmul.u32.u64.high 3817748708, %v392_v30, %v14895_v10  ;;  %v1673_v52 = vor.u32 %v1672_v7, %v1669_v2  ;;  %vm14900_vm11 = vcmp.lt.s32.totalorder %v967_v45, 16 }
  0xdd   : > { %v16372_v50 = vmov 0  ;;  %v11633_v8 = vpack.c.bf16 %v1279_v12, %v1279_v12  ;;  %v1280_v35 = vsel %vm14900_vm11, %v1161_v59, 0.0  ;;  %vm16375_vm1 = vcmask 1046528  }
  0xde   : > { %v16373_v50 = vsel %vm14900_vm11, 4294967295, %v16372_v50  ;;  %v14906_v9 = vmul.u32.u64.low 3817748708, %v393_v11  ;;  %v14907_v17 = vmul.u32.u64.high 3817748708, %v393_v11, %v14906_v9  ;;  %v3079_v37 = vsel %vm16375_vm1, %v3076_v3, %v16226_v28 }
  0xdf   : > { %16374 = vst [vmem:[#allocation16_spill] sm:$0xff] %v16373_v50  ;;  %v1674_v40 = vsel %vm14076_vm7, %v1665_v38, %v1673_v52  ;;  %v11634_v58 = vpack.c.bf16 %v1280_v35, %v1280_v35  ;;  %v1084_v59 = vmul.f32 %v14919_v51, %v1041_v25  ;;  %12211 = vmatprep.mubr.bf16.mxu0 %v3079_v37  ;;  %v1677_v60 = vshrl.u32 %v11633_v8, 16 }
  0xe0   : > { %1825 = vst [vmem:[#allocation2 + $0x74] sm:$0xf] %v1674_v40  ;;  %v1680_v5 = vshll.u32 %v11633_v8, 16  ;;  %v734_v2 = vshrl.u32 %v14896_v42, 4  ;;  %v1126_v54 = vadd.f32 %v14811_v6, %v1083_v20  ;;  %v1675_v3 = vrot.slane %v1673_v52, 4 }
  0xe1   : > { %v1687_v7 = vshrl.u32 %v11634_v58, 16  ;;  %v1690_v45 = vshll.u32 %v11634_v58, 16  ;;  %v394_v38 = vadd.s32 256, %v13928_v4  ;;  %v1679_v12 = vrot.slane %v1677_v60, 6 }
  0xe2   : > { %v1682_v10 = vrot.slane %v1680_v5, 7  ;;  %v735_v35 = vmul.u32 18, %v734_v2  ;;  %v745_v9 = vshrl.u32 %v14907_v17, 4  ;;  %v1127_v40 = vadd.f32 %v14811_v6, %v1084_v59  ;;  %v1042_v2 = vld [vmem:[%s13940_s24 + $0x100] sm:$0xff] }
  0xe3   : > { %v1689_v25 = vrot.slane %v1687_v7, 6  ;;  %v1692_v37 = vrot.slane %v1690_v45, 7  ;;  %v1162_v50 = vmax.f32 %v1126_v54, 0.0  ;;  %v395_v52 = vadd.s32 264, %v13928_v4 }
  0xe4   : > { %v1683_v8 = vor.u32 %v1682_v10, %v1679_v12  ;;  %v736_v28 = vsub.s32 %v392_v30, %v735_v35  ;;  %v746_v42 = vmul.u32 18, %v745_v9  ;;  %v1163_v54 = vmax.f32 %v1127_v40, 0.0  ;;  %v1043_v12 = vld [vmem:[%s13940_s24 + $0x108] sm:$0xff] }
  0xe5   : > { %v14927_v20 = vor.u32 %v1692_v37, %v1689_v25  ;;  %v14930_v58 = vmul.u32.u64.low 3817748708, %v394_v38  ;;  %v14931_v61 = vmul.u32.u64.high 3817748708, %v394_v38, %v14930_v58  ;;  %v1085_v35 = vmul.f32 %v14919_v51, %v1042_v2 }
  0xe6   : > { %v1684_v60 = vsel %vm14076_vm7, %v1675_v3, %v1683_v8  ;;  %v1685_v17 = vrot.slane %v1683_v8, 4  ;;  %v747_v5 = vsub.s32 %v393_v11, %v746_v42  ;;  %vm824_vm5 = vcmp.ne.s32.totalorder %v736_v28, 0 }
  0xe7   : > { %v13458_v59 = vld [vmem:[#allocation2 + $0x70] sm:$0xff]   ;;  %1826 = vst [vmem:[#allocation2 + $0x78] sm:$0xf] %v1684_v60  ;;  %vm860_vm3 = vcmp.lt.s32.totalorder %v736_v28, 0  ;;  %v932_v30 = vadd.s32 18, %v736_v28  ;;  %v756_v3 = vshrl.u32 %v14931_v61, 4 }
  0xe8   : > { %v1694_v7 = vsel %vm14076_vm7, %v1685_v17, %v14927_v20  ;;  %vm825_vm1 = vcmp.ne.s32.totalorder %v747_v5, 0  ;;  %vm861_vm11 = vcmp.lt.s32.totalorder %v747_v5, 0  ;;  %vm896_vm14 = vmand %vm860_vm3, %vm824_vm5  ;;  %v933_v45 = vadd.s32 18, %v747_v5 }
  0xe9   : > { %v3080_v10 = vrot.slane %v13458_v59, 1  ;;  %1827 = vst [vmem:[#allocation2 + $0x7c] sm:$0xf] %v1694_v7  ;;  %vm897_vm0 = vmand %vm861_vm11, %vm825_vm1  ;;  %v968_v11 = vsel %vm896_vm14, %v932_v30, %v736_v28  ;;  %v16376_v25 = vmov 0  ;;  %v16379_v8 = vrot.slane %v14886_v15, 1  ;;  %v1044_v7 = vld [vmem:[%s13940_s24 + $0x110] sm:$0xff] }
  0xea   : > { %v969_v9 = vsel %vm897_vm0, %v933_v45, %v747_v5  ;;  %vm14942_vm15 = vcmp.lt.s32.totalorder %v968_v11, 16  ;;  %v14946_v37 = vmul.u32.u64.low 3817748708, %v395_v52  ;;  %v14947_v40 = vmul.u32.u64.high 3817748708, %v395_v52, %v14946_v37 }
  0xeb   : > { %v16377_v25 = vsel %vm14942_vm15, 4294967295, %v16376_v25  ;;  %vm16380_vm5 = vcmask 1046528   ;;  %vm14952_vm3 = vcmp.lt.s32.totalorder %v969_v9, 16  ;;  %v16381_v58 = vmov 0 }
  0xec   : > { %16378 = vst [vmem:[#allocation17_spill] sm:$0xff] %v16377_v25  ;;  %v3081_v42 = vsel %vm16380_vm5, %v16379_v8, %v3080_v10  ;;  %v16382_v58 = vsel %vm14952_vm3, 4294967295, %v16381_v58  ;;  %v1281_v61 = vsel %vm14942_vm15, %v1162_v50, 0.0  ;;  %v757_v28 = vmul.u32 18, %v756_v3  ;;  %vm16386_vm1 = vmmov %vm16380_vm5 }
  0xed   : > { %16383 = vst [vmem:[#allocation18_spill] sm:$0xff] %v16382_v58  ;;  %12212 = vmatmul.mubr.bf16.gmra.mrb[24].mxu0 %v3081_v42  ;;  %v1282_v60 = vsel %vm14952_vm3, %v1163_v54, 0.0  ;;  %v11635_v17 = vpack.c.bf16 %v1281_v61, %v1281_v61  ;;  %v1086_v5 = vmul.f32 %v14919_v51, %v1043_v12  ;;  %v1695_v15 = vrot.slane %v14927_v20, 4 }
  0xee   : > { %v11636_v2 = vpack.c.bf16 %v1282_v60, %v1282_v60  ;;  %v758_v59 = vsub.s32 %v394_v38, %v757_v28  ;;  %v1128_v30 = vadd.f32 %v14811_v6, %v1085_v35  ;;  %v767_v9 = vshrl.u32 %v14947_v40, 4 }
  0xef   : > { %v1697_v45 = vshrl.u32 %v11635_v17, 16  ;;  %v1700_v11 = vshll.u32 %v11635_v17, 16  ;;  %v396_v50 = vadd.s32 272, %v13928_v4  ;;  %v1129_v20 = vadd.f32 %v14811_v6, %v1086_v5 }
  0xf0   : > { %v1707_v3 = vshrl.u32 %v11636_v2, 16  ;;  %v1710_v37 = vshll.u32 %v11636_v2, 16  ;;  %vm826_vm0 = vcmp.ne.s32.totalorder %v758_v59, 0  ;;  %vm862_vm14 = vcmp.lt.s32.totalorder %v758_v59, 0  ;;  %v14966_v54 = vld [vmem:[#allocation2 + $0x78] sm:$0xff]  }
  0xf1   : > { %v1699_v12 = vrot.slane %v1697_v45, 6  ;;  %v1702_v8 = vrot.slane %v1700_v11, 7  ;;  %v768_v42 = vmul.u32 18, %v767_v9  ;;  %vm14968_vm11 = vmand %vm862_vm14, %vm826_vm0  ;;  %v934_v40 = vadd.s32 18, %v758_v59 }
  0xf2   : > { %v1709_v35 = vrot.slane %v1707_v3, 6  ;;  %v1712_v61 = vrot.slane %v1710_v37, 7  ;;  %v1164_v28 = vmax.f32 %v1128_v30, 0.0  ;;  %v3082_v60 = vrot.slane %v14966_v54, 1 }
  0xf3   : > { %v1703_v17 = vor.u32 %v1702_v8, %v1699_v12  ;;  %v769_v2 = vsub.s32 %v395_v52, %v768_v42  ;;  %v1087_v58 = vmul.f32 %v14919_v51, %v1044_v7  ;;  %v970_v45 = vsel %vm14968_vm11, %v934_v40, %v758_v59 }
  0xf4   : > { %v1713_v25 = vor.u32 %v1712_v61, %v1709_v35  ;;  %v14977_v11 = vmul.u32.u64.low 3817748708, %v396_v50  ;;  %v14978_v9 = vmul.u32.u64.high 3817748708, %v396_v50, %v14977_v11  ;;  %v3083_v57 = vsel %vm16386_vm1, %v3080_v10, %v3082_v60 }
  0xf5   : > { %v1704_v5 = vsel %vm14076_vm7, %v1695_v15, %v1703_v17  ;;  %v1705_v3 = vrot.slane %v1703_v17, 4  ;;  %vm827_vm5 = vcmp.ne.s32.totalorder %v769_v2, 0  ;;  %12215 = vmatprep.mubr.bf16.mxu0 %v3083_v57  ;;  %vm863_vm0 = vcmp.lt.s32.totalorder %v769_v2, 0 }
  0xf6   : > { %1828 = vst [vmem:[#allocation2 + $0x80] sm:$0xf] %v1704_v5  ;;  %v935_v52 = vadd.s32 18, %v769_v2  ;;  %vm14983_vm14 = vcmp.lt.s32.totalorder %v970_v45, 16  ;;  %v16387_v30 = vmov 0  ;;  %v1165_v7 = vmax.f32 %v1129_v20, 0.0  ;;  %vm899_vm11 = vmand %vm863_vm0, %vm827_vm5 }
  0xf7   : > { %v16388_v30 = vsel %vm14983_vm14, 4294967295, %v16387_v30  ;;  %v1714_v59 = vsel %vm14076_vm7, %v1705_v3, %v1713_v25  ;;  %v1283_v10 = vsel %vm14983_vm14, %v1164_v28, 0.0  ;;  %v778_v57 = vshrl.u32 %v14978_v9, 4 }
  0xf8   : > { %16389 = vst [vmem:[#allocation19_spill] sm:$0xff] %v16388_v30  ;;  %1829 = vst [vmem:[#allocation2 + $0x84] sm:$0xf] %v1714_v59  ;;  %v971_v15 = vsel %vm899_vm11, %v935_v52, %v769_v2  ;;  %v11637_v37 = vpack.c.bf16 %v1283_v10, %v1283_v10  ;;  %v16390_v54 = vmov 0  ;;  %v1130_v12 = vadd.f32 %v14811_v6, %v1087_v58 }
  0xf9   : > { %vm14992_vm1 = vcmp.lt.s32.totalorder %v971_v15, 16  ;;  %v779_v20 = vmul.u32 18, %v778_v57  ;;  %v1715_v61 = vrot.slane %v1713_v25, 4  ;;  %vm16396_vm14 = vcmask 1046528  }
  0xfa   : > { %v16391_v54 = vsel %vm14992_vm1, 4294967295, %v16390_v54  ;;  %v1284_v8 = vsel %vm14992_vm1, %v1165_v7, 0.0  ;;  %v1717_v42 = vshrl.u32 %v11637_v37, 16  ;;  %v1720_v38 = vshll.u32 %v11637_v37, 16  ;;  %vm16400_vm3 = vmmov %vm16396_vm14 }
  0xfb   : > { %16392 = vst [vmem:[#allocation20_spill] sm:$0xff] %v16391_v54  ;;  %v11638_v35 = vpack.c.bf16 %v1284_v8, %v1284_v8  ;;  %v780_v17 = vsub.s32 %v396_v50, %v779_v20  ;;  %v1166_v11 = vmax.f32 %v1130_v12, 0.0  ;;  %v16393_v50 = vmov 0 }
  0xfc   : > { %v1719_v40 = vrot.slane %v1717_v42, 6  ;;  %v1722_v28 = vrot.slane %v1720_v38, 7  ;;  %v397_v20 = vadd.s32 280, %v13928_v4  ;;  %v13466_v4 = vld [vmem:[#allocation2 + $0x10] sm:$0xff]  }
  0xfd   : > { %v1727_v2 = vshrl.u32 %v11638_v35, 16  ;;  %v1730_v45 = vshll.u32 %v11638_v35, 16  ;;  %vm828_vm5 = vcmp.ne.s32.totalorder %v780_v17, 0  ;;  %vm864_vm0 = vcmp.lt.s32.totalorder %v780_v17, 0 }
  0xfe   : > { %v1723_v9 = vor.u32 %v1722_v28, %v1719_v40  ;;  %v936_v5 = vadd.s32 18, %v780_v17  ;;  %vm900_vm11 = vmand %vm864_vm0, %vm828_vm5  ;;  %v1045_v28 = vld [vmem:[%s13940_s24 + $0x118] sm:$0xff] }
  0xff   : > { %v13461_v3 = vld [vmem:[#allocation2 + $0x80] sm:$0xff]   ;;  %v1729_v58 = vrot.slane %v1727_v2, 6  ;;  %v1732_v52 = vrot.slane %v1730_v45, 7 }
 0x100   : > { %v1724_v7 = vsel %vm14076_vm7, %v1715_v61, %v1723_v9  ;;  %v1725_v59 = vrot.slane %v1723_v9, 4  ;;  %v972_v10 = vsel %vm900_vm11, %v936_v5, %v780_v17  ;;  %v3084_v25 = vrot.slane %v13461_v3, 1 }
 0x101   : > { %v1733_v15 = vor.u32 %v1732_v52, %v1729_v58  ;;  %1830 = vst [vmem:[#allocation2 + $0x88] sm:$0xf] %v1724_v7  ;;  %vm15001_vm1 = vcmp.lt.s32.totalorder %v972_v10, 16  ;;  %v15012_v17 = vmul.u32.u64.low 3817748708, %v397_v20  ;;  %v15013_v2 = vmul.u32.u64.high 3817748708, %v397_v20, %v15012_v17 }
 0x102   : > { %v16394_v50 = vsel %vm15001_vm1, 4294967295, %v16393_v50  ;;  %v1285_v37 = vsel %vm15001_vm1, %v1166_v11, 0.0  ;;  %v3085_v57 = vsel %vm16396_vm14, %v3082_v60, %v3084_v25  ;;  %v1088_v60 = vmul.f32 %v14919_v51, %v1045_v28  ;;  %v13465_v58 = vld [vmem:[#allocation2 + $0x8] sm:$0xfe]  }
 0x103   : > { %16395 = vst [vmem:[#allocation21_spill] sm:$0xff] %v16394_v50  ;;  %v1734_v12 = vsel %vm14076_vm7, %v1725_v59, %v1733_v15  ;;  %v11639_v8 = vpack.c.bf16 %v1285_v37, %v1285_v37  ;;  %12216 = vmatmul.mubr.bf16.gmra.mrb[28].mxu0 %v3085_v57  ;;  %v1735_v35 = vrot.slane %v1733_v15, 4  ;;  %v789_v5 = vshrl.u32 %v15013_v2, 4 }
 0x104   : > { %1831 = vst [vmem:[#allocation2 + $0x8c] sm:$0xf] %v1734_v12  ;;  %v1131_v7 = vadd.f32 %v14811_v6, %v1088_v60  ;;  %v3588_v15 = vrot.slane %v13465_v58, 1  ;;  %v3589_v37 = vrot.slane %v13466_v4, 1  ;;  %v13470_v58 = vld [vmem:[#allocation2 + $0x28] sm:$0xff]  }
 0x105   : > { %v1737_v42 = vshrl.u32 %v11639_v8, 16  ;;  %v1740_v38 = vshll.u32 %v11639_v8, 16  ;;  %v790_v52 = vmul.u32 18, %v789_v5  ;;  %v13468_v8 = vld [vmem:[#allocation2 + $0x18] sm:$0xff]  }
 0x106   : > { %v1167_v57 = vmax.f32 %v1131_v7, 0.0  ;;  %v3590_v6 = vsel %vm16400_vm3, %v3588_v15, %v3589_v37  ;;  %v3591_v28 = vrot.slane %v13468_v8, 1 }
 0x107   : > { %v1739_v61 = vrot.slane %v1737_v42, 6  ;;  %v1742_v40 = vrot.slane %v1740_v38, 7  ;;  %v791_v10 = vsub.s32 %v397_v20, %v790_v52  ;;  %v13471_v52 = vld [vmem:[%s16197_s3 + $0x108] sm:$0xff]  }
 0x109   : > { %v1743_v45 = vor.u32 %v1742_v40, %v1739_v61  ;;  %vm829_vm5 = vcmp.ne.s32.totalorder %v791_v10, 0  ;;  %vm865_vm0 = vcmp.lt.s32.totalorder %v791_v10, 0  ;;  %v937_v51 = vadd.s32 18, %v791_v10 }
 0x10a   : > { %vm901_vm11 = vmand %vm865_vm0, %vm829_vm5 }
 0x10b   : > { %v13463_v11 = vld [vmem:[#allocation2 + $0x88] sm:$0xff]   ;;  %v1744_v9 = vsel %vm14076_vm7, %v1735_v35, %v1743_v45  ;;  %v973_v42 = vsel %vm901_vm11, %v937_v51, %v791_v10  ;;  %v16397_v35 = vmov 0  ;;  %vm16402_vm5 = vmmov %vm16400_vm3  ;;  %v1834_v10 = vld [vmem:[#allocation2 + $0x98] sm:$0x3] }
 0x10c   : > { %1832 = vst [vmem:[#allocation2 + $0x90] sm:$0xf] %v1744_v9  ;;  %v3086_v3 = vrot.slane %v13463_v11, 1  ;;  %vm15021_vm1 = vcmp.lt.s32.totalorder %v973_v42, 16  ;;  %v1745_v11 = vrot.slane %v1743_v45, 4  ;;  %v3592_v4 = vsel %vm16402_vm5, %v3589_v37, %v3591_v28  ;;  %vm16403_vm0 = vmmov %vm16400_vm3  ;;  %v13473_v42 = vld [vmem:[#allocation2 + $0x38] sm:$0xff]  }
 0x10d   : > { %v16398_v35 = vsel %vm15021_vm1, 4294967295, %v16397_v35  ;;  %v1286_v20 = vsel %vm15021_vm1, %v1167_v57, 0.0  ;;  %v3595_v45 = vrot.slane %v13470_v58, 1  ;;  %vm16404_vm11 = vmmov %vm16403_vm0  ;;  %v13479_v58 = vld [vmem:[#allocation2 + $0x58] sm:$0xff]  }
 0x10e   : > { %v3087_v59 = vsel %vm16396_vm14, %v3084_v25, %v3086_v3  ;;  %16399 = vst [vmem:[#allocation22_spill] sm:$0xff] %v16398_v35  ;;  %v13469_v25 = vld [vmem:[#allocation2 + $0x20] sm:$0xff]   ;;  %vm16401_vm14 = vmmov %vm16400_vm3  ;;  %v11640_v40 = vpack.c.bf16 %v1286_v20, %v1286_v20 }
 0x10f   : > { %12219 = vmatprep.mubr.bf16.mxu0 %v3087_v59  ;;  %v3593_v60 = vrot.slane %v13469_v25, 1  ;;  %v13472_v59 = vld [vmem:[#allocation2 + $0x30] sm:$0xff]   ;;  %v3599_v25 = vrot.slane %v13473_v42, 1  ;;  %vm16406_vm5 = vmmov %vm16403_vm0  ;;  %v13485_v42 = vld [vmem:[#allocation2 + $0x78] sm:$0xff]  }
 0x110   : > { %v1747_v17 = vshrl.u32 %v11640_v40, 16  ;;  %v1750_v2 = vshll.u32 %v11640_v40, 16  ;;  %v3597_v57 = vrot.slane %v13472_v59, 1  ;;  %v3607_v59 = vrot.slane %v13479_v58, 1 }
 0x111   : > { %v3596_v8 = vsel %vm16403_vm0, %v3593_v60, %v3595_v45 }
 0x112   : > { %v1749_v9 = vrot.slane %v1747_v17, 6  ;;  %v1752_v5 = vrot.slane %v1750_v2, 7  ;;  %v13478_v17 = vld [vmem:[#allocation2 + $0x50] sm:$0xff]  }
 0x113   : > { %v13464_v12 = vld [vmem:[#allocation2 + $0x90] ss:$0 sps:$4 sm:$0x11]  }
 0x114   : > { %v3088_v38 = vrot.slane %v13464_v12, 1  ;;  %v1753_v7 = vor.u32 %v1752_v5, %v1749_v9  ;;  %v13474_v12 = vld [vmem:[%s16197_s3 + $0x110] sm:$0xff]   ;;  %v3605_v9 = vrot.slane %v13478_v17, 1 }
 0x115   : > { %v13486_v5 = vld [vmem:[%s16197_s3 + $0x130] sm:$0xff]  }
 0x116   : > { %v3089_v61 = vsel %vm16401_vm14, %v3086_v3, %v3088_v38  ;;  %v3594_v3 = vsel %vm16400_vm3, %v3591_v28, %v3593_v60  ;;  %v1754_v15 = vsel %vm14076_vm7, %v1745_v11, %v1753_v7  ;;  %v1755_v51 = vrot.slane %v1753_v7, 4  ;;  %vm16405_vm14 = vmmov %vm16403_vm0  ;;  %v13476_v28 = vld [vmem:[#allocation2 + $0x48] sm:$0xff]  }
 0x117   : > { %12220 = vmatmul.mubr.bf16.gmra.mrb[32].mxu0 %v3089_v61  ;;  %1833 = vst [vmem:[#allocation2 + $0x94] sm:$0xf] %v1754_v15  ;;  %v3598_v38 = vsel %vm16404_vm11, %v3595_v45, %v3597_v57  ;;  %v13480_v61 = vld [vmem:[%s16197_s3 + $0x120] sm:$0xff]   ;;  %v3600_v40 = vsel %vm16405_vm14, %v3597_v57, %v3599_v25  ;;  %v13483_v60 = vld [vmem:[%s16197_s3 + $0x128] sm:$0xff]   ;;  %v3603_v11 = vrot.slane %v13476_v28, 1  ;;  %vm16407_vm3 = vmmov %vm16403_vm0 }
 0x118   : > { %12239 = vmatprep.mubr.bf16.mxu0 %v3590_v6  ;;  %v1835_v37 = vsel %vm13967_vm2, %v1755_v51, %v1834_v10  ;;  %v13477_v6 = vld [vmem:[%s16197_s3 + $0x118] sm:$0xff]   ;;  %v15066_v15 = vld [vmem:[%s16197_s3 + $0x140] sm:$0xff]   ;;  %v13482_v51 = vld [vmem:[#allocation2 + $0x68] sm:$0xff]  }
 0x119   : > { %1836 = vst [vmem:[#allocation2 + $0x98] sm:$0x3] %v1835_v37  ;;  %v13484_v45 = vld [vmem:[#allocation2 + $0x70] sm:$0xff]   ;;  %vm16408_vm11 = vmmov %vm16403_vm0 }
 0x11a   : > { %v3608_v37 = vsel %vm16408_vm11, %v3605_v9, %v3607_v59  ;;  %vm16409_vm14 = vmmov %vm16403_vm0 }
 0x11b   : > { %vm16412_vm11 = vmmov %vm16403_vm0 }
 0x11e   : > { %v13652_v50 = vld [vmem:[#allocation2 + $0x90] sm:$0xff]  }
 0x11f   : > { %12240 = vmatmul.mubr.bf16.vlgmr.msra.gmra.mrb[0].mxu0 %v3592_v4  ;;  %v13481_v4 = vld [vmem:[#allocation2 + $0x60] sm:$0xff]  }
 0x120   : > { %12276 = vmatpush3.bf16.msra.mxu0 %v14774_v26  ;;  %12243 = vmatprep.mubr.bf16.mxu0 %v3594_v3  ;;  %v13475_v26 = vld [vmem:[#allocation2 + $0x40] sm:$0xff]   ;;  %v3606_v3 = vsel %vm16403_vm0, %v3603_v11, %v3605_v9  ;;  %v3609_v10 = vrot.slane %v13481_v4, 1  ;;  %v13653_v62 = vld [vmem:[#allocation2 + $0x98] sm:$0xff]  }
 0x121   : > { %12277 = vmatprep.subr.bf16.mxu0 %v13471_v52  ;;  %v3601_v20 = vrot.slane %v13475_v26, 1  ;;  %v13492_v26 = vld [vmem:[#allocation2 + $0x8] sm:$0xfe]   ;;  %v13496_v4 = vld [vmem:[#allocation2 + $0x20] sm:$0xff]  }
 0x122   : > { %v3610_v57 = vsel %vm16409_vm14, %v3607_v59, %v3609_v10  ;;  %v4125_v28 = vshrl.u32 %v13492_v26, 16  ;;  %v4128_v17 = vshll.u32 %v13492_v26, 16  ;;  %vm4123_vm14 = vsmask.f32 6400  ;;  %v13497_v26 = vld [vmem:[#allocation2 + $0x28] sm:$0xff]  }
 0x123   : > { %v3602_v2 = vsel %vm16406_vm5, %v3599_v25, %v3601_v20  ;;  %v3604_v7 = vsel %vm16407_vm3, %v3601_v20, %v3603_v11  ;;  %vm16410_vm5 = vmmov %vm16403_vm0  ;;  %v13488_v11 = vld [vmem:[#allocation2 + $0x88] sm:$0xff]  }
 0x124   : > { %12278 = vmatpush3.bf16.msra.mxu0 %v13471_v52  ;;  %v13489_v52 = vld [vmem:[%s16197_s3 + $0x138] sm:$0xff]   ;;  %vm16411_vm3 = vmmov %vm16403_vm0 }
 0x125   : > { %12279 = vmatprep.subr.bf16.mxu0 %v13474_v12 }
 0x127   : > { %12244 = vmatmul.mubr.bf16.gmra.mrb[4].mxu0 %v3596_v8  ;;  %v3613_v8 = vrot.slane %v13484_v45, 1 }
 0x128   : > { %12247 = vmatprep.mubr.bf16.mxu0 %v3598_v38  ;;  %12280 = vmatpush3.bf16.msra.mxu0 %v13474_v12  ;;  %v3611_v12 = vrot.slane %v13482_v51, 1  ;;  %v13487_v38 = vld [vmem:[#allocation2 + $0x80] sm:$0xff]   ;;  %v3619_v51 = vrot.slane %v13488_v11, 1 }
 0x129   : > { %12281 = vmatprep.subr.bf16.mxu0 %v13477_v6 }
 0x12a   : > { %v3612_v25 = vsel %vm16410_vm5, %v3609_v10, %v3611_v12  ;;  %v3614_v20 = vsel %vm16411_vm3, %v3611_v12, %v3613_v8  ;;  %v13491_v12 = vld [vmem:[#allocation2 + $0x98] ss:$0 sps:$4 sm:$0x11]   ;;  %vm16413_vm5 = vmmov %vm16403_vm0 }
 0x12b   : > { %vm16414_vm3 = vmmov %vm16403_vm0 }
 0x12c   : > { %12282 = vmatpush3.bf16.msra.mxu0 %v13477_v6  ;;  %v13493_v6 = vld [vmem:[#allocation2 + $0x10] sm:$0xff]  }
 0x12d   : > { %12283 = vmatprep.subr.bf16.mxu0 %v13480_v61  ;;  %v4136_v9 = vshll.u32 %v13493_v6, 16 }
 0x12f   : > { %12248 = vmatmul.mubr.bf16.gmra.mrb[8].mxu0 %v3600_v40  ;;  %v3617_v40 = vrot.slane %v13487_v38, 1  ;;  %v4138_v45 = vrot.slane %v4136_v9, 2  ;;  %v4154_v38 = vshll.u32 %v13496_v4, 16 }
 0x130   : > { %12251 = vmatprep.mubr.bf16.mxu0 %v3602_v2  ;;  %12284 = vmatpush3.bf16.msra.mxu0 %v13480_v61  ;;  %v3615_v61 = vrot.slane %v13485_v42, 1  ;;  %v4133_v2 = vshrl.u32 %v13493_v6, 16  ;;  %v4151_v42 = vshrl.u32 %v13496_v4, 16  ;;  %v13499_v6 = vld [vmem:[#allocation2 + $0x30] sm:$0xff]   ;;  %v13500_v4 = vld [vmem:[#allocation2 + $0x38] sm:$0xff]  }
 0x131   : > { %12285 = vmatprep.subr.bf16.mxu0 %v13483_v60 }
 0x132   : > { %v3616_v58 = vsel %vm16403_vm0, %v3613_v8, %v3615_v61  ;;  %v4135_v59 = vrot.slane %v4133_v2, 1  ;;  %v3620_v8 = vsel %vm16413_vm5, %v3617_v40, %v3619_v51  ;;  %v4160_v2 = vshrl.u32 %v13497_v26, 16 }
 0x133   : > { %vm16415_vm5 = vsmask.f32 7424 }
 0x134   : > { %12286 = vmatpush3.bf16.msra.mxu0 %v13483_v60  ;;  %v13495_v60 = vld [vmem:[#allocation2 + $0x18] sm:$0xff]   ;;  %v4139_v9 = vor.u32 %v4138_v45, %v4135_v59  ;;  %v13503_v59 = vld [vmem:[#allocation2 + $0x48] sm:$0xff]  }
 0x135   : > { %12287 = vmatprep.subr.bf16.mxu0 %v13486_v5  ;;  %v4142_v10 = vshrl.u32 %v13495_v60, 16 }
 0x137   : > { %12252 = vmatmul.mubr.bf16.gmra.mrb[12].mxu0 %v3604_v7  ;;  %v4127_v7 = vrot.slane %v4125_v28, 1  ;;  %v4153_v28 = vrot.slane %v4151_v42, 1 }
 0x138   : > { %12255 = vmatprep.mubr.bf16.mxu0 %v3606_v3  ;;  %12288 = vmatpush3.bf16.msra.mxu0 %v13486_v5  ;;  %v13490_v5 = vld [vmem:[#allocation2 + $0x90] sm:$0xff]   ;;  %v4130_v3 = vrot.slane %v4128_v17, 2  ;;  %v3623_v17 = vrot.slane %v13491_v12, 1  ;;  %v4178_v12 = vshrl.u32 %v13500_v4, 16 }
 0x139   : > { %12289 = vmatprep.subr.bf16.mxu0 %v13489_v52 }
 0x13a   : > { %v4131_v11 = vor.u32 %v4130_v3, %v4127_v7  ;;  %v4181_v3 = vshll.u32 %v13500_v4, 16 }
 0x13c   : > { %12290 = vmatpush3.bf16.msra.mxu0 %v13489_v52  ;;  %v3618_v52 = vsel %vm16412_vm11, %v3615_v61, %v3617_v40  ;;  %v13502_v40 = vld [vmem:[#allocation2 + $0x40] sm:$0xff]   ;;  %v4140_v35 = vsel %vm4123_vm14, %v4131_v11, %v4139_v9  ;;  %vm4792_vm11 = vcmask 1045504  }
 0x13d   : > { %12327 = vmatprep.subr.bf16.mxu0 %v15066_v15  ;;  %v4187_v45 = vshrl.u32 %v13502_v40, 16 }
 0x13f   : > { %12256 = vmatmul.mubr.bf16.gmra.mrb[16].mxu0 %v3608_v37  ;;  %v3621_v37 = vrot.slane %v13490_v5, 1  ;;  %v4163_v5 = vshll.u32 %v13497_v26, 16  ;;  %v13505_v26 = vld [vmem:[#allocation2 + $0x50] sm:$0xff]  }
 0x140   : > { %12259 = vmatprep.mubr.bf16.mxu0 %v3610_v57  ;;  %v4145_v57 = vshll.u32 %v13495_v60, 16  ;;  %v4156_v60 = vrot.slane %v4154_v38, 2  ;;  %v4190_v38 = vshll.u32 %v13502_v40, 16  ;;  %v13504_v40 = vld [vmem:[%s16197_s3 + $0x158] sm:$0xff]  }
 0x141   : > { %v3624_v54 = vsel %vm16403_vm0, %v3621_v37, %v3623_v17  ;;  %v4183_v17 = vrot.slane %v4181_v3, 2 }
 0x142   : > { %v4147_v61 = vrot.slane %v4145_v57, 2  ;;  %v4192_v11 = vrot.slane %v4190_v38, 2 }
 0x147   : > { %12260 = vmatmul.mubr.bf16.gmra.mrb[20].mxu0 %v3612_v25  ;;  %v3622_v25 = vsel %vm16414_vm3, %v3619_v51, %v3621_v37  ;;  %v4162_v51 = vrot.slane %v4160_v2, 1  ;;  %v13498_v37 = vld [vmem:[%s16197_s3 + $0x148] sm:$0xff]   ;;  %v4189_v2 = vrot.slane %v4187_v45, 1  ;;  %vm16416_vm3 = vmmov %vm16415_vm5 }
 0x148   : > { %12263 = vmatprep.mubr.bf16.mxu0 %v3614_v20  ;;  %v4144_v20 = vrot.slane %v4142_v10, 1  ;;  %v4165_v10 = vrot.slane %v4163_v5, 2  ;;  %v4205_v5 = vshrl.u32 %v13505_v26, 16  ;;  %vm16417_vm0 = vmmov %vm16416_vm3 }
 0x149   : > { %v4193_v45 = vor.u32 %v4192_v11, %v4189_v2 }
 0x14a   : > { %v4148_v57 = vor.u32 %v4147_v61, %v4144_v20  ;;  %v4180_v20 = vrot.slane %v4178_v12, 1  ;;  %v13501_v61 = vld [vmem:[%s16197_s3 + $0x150] sm:$0xff]  }
 0x14c   : > { %v4184_v12 = vor.u32 %v4183_v17, %v4180_v20 }
 0x14e   : > { %v4194_v20 = vsel %vm4123_vm14, %v4184_v12, %v4193_v45 }
 0x14f   : > { %12264 = vmatmul.mubr.bf16.gmra.mrb[24].mxu0 %v3616_v58  ;;  %v4169_v58 = vshrl.u32 %v13499_v6, 16 }
 0x150   : > { %12267 = vmatprep.mubr.bf16.mxu0 %v3618_v52  ;;  %v4172_v52 = vshll.u32 %v13499_v6, 16  ;;  %v4149_v6 = vsel %vm4123_vm14, %v4139_v9, %v4148_v57 }
 0x151   : > { %v4171_v42 = vrot.slane %v4169_v58, 1  ;;  %v4208_v58 = vshll.u32 %v13505_v26, 16 }
 0x152   : > { %v4174_v7 = vrot.slane %v4172_v52, 2 }
 0x153   : > { %v4210_v3 = vrot.slane %v4208_v58, 2 }
 0x154   : > { %v4175_v9 = vor.u32 %v4174_v7, %v4171_v42  ;;  %v4207_v7 = vrot.slane %v4205_v5, 1 }
 0x156   : > { %v4211_v5 = vor.u32 %v4210_v3, %v4207_v7 }
 0x157   : > { %12268 = vmatmul.mubr.bf16.gmra.mrb[28].mxu0 %v3620_v8  ;;  %v4157_v8 = vor.u32 %v4156_v60, %v4153_v28  ;;  %v4196_v28 = vshrl.u32 %v13503_v59, 16  ;;  %v4199_v60 = vshll.u32 %v13503_v59, 16  ;;  %v13507_v59 = vld [vmem:[%s16197_s3 + $0x160] sm:$0xff]  }
 0x158   : > { %12271 = vmatprep.mubr.bf16.mxu0 %v3622_v25 }
 0x159   : > { %v4158_v25 = vsel %vm4123_vm14, %v4148_v57, %v4157_v8  ;;  %v4198_v57 = vrot.slane %v4196_v28, 1  ;;  %v4201_v42 = vrot.slane %v4199_v60, 2  ;;  %v13513_v28 = vld [vmem:[%s16197_s3 + $0x170] sm:$0xff]  }
 0x15f   : > { %12272 = vmatmul.mubr.bf16.gmra.mrb[32].mxu0 %v3624_v54  ;;  %v13506_v54 = vld [vmem:[#allocation2 + $0x58] sm:$0xff]  }
 0x160   : > { %12291 = vmatprep.mubr.bf16.mxu0 %v4140_v35  ;;  %v4166_v35 = vor.u32 %v4165_v10, %v4162_v51  ;;  %v4214_v52 = vshrl.u32 %v13506_v54, 16  ;;  %v4217_v4 = vshll.u32 %v13506_v54, 16  ;;  %v13508_v10 = vld [vmem:[#allocation2 + $0x60] sm:$0xff]   ;;  %v13511_v54 = vld [vmem:[#allocation2 + $0x70] sm:$0xff]  }
 0x161   : > { %v4226_v26 = vshll.u32 %v13508_v10, 16  ;;  %v4241_v60 = vshrl.u32 %v13511_v54, 16 }
 0x162   : > { %v4167_v51 = vsel %vm4123_vm14, %v4157_v8, %v4166_v35  ;;  %v4216_v8 = vrot.slane %v4214_v52, 1  ;;  %v4219_v38 = vrot.slane %v4217_v4, 2  ;;  %v13512_v52 = vld [vmem:[#allocation2 + $0x78] sm:$0xff]   ;;  %v13514_v4 = vld [vmem:[#allocation2 + $0x80] sm:$0xff]  }
 0x163   : > { %v4228_v58 = vrot.slane %v4226_v26, 2  ;;  %v4250_v7 = vshrl.u32 %v13512_v52, 16  ;;  %v4253_v3 = vshll.u32 %v13512_v52, 16  ;;  %v13515_v26 = vld [vmem:[#allocation2 + $0x88] sm:$0xff]  }
 0x167   : > { %12292 = vmatmul.mubr.bf16.vlgmr.msra.gmra.mrb[0].mxu0 %v4149_v6  ;;  %v13509_v6 = vld [vmem:[#allocation2 + $0x68] sm:$0xff]  }
 0x168   : > { %12328 = vmatpush3.bf16.msra.mxu0 %v15066_v15  ;;  %12295 = vmatprep.mubr.bf16.mxu0 %v4158_v25  ;;  %v4176_v15 = vsel %vm4123_vm14, %v4166_v35, %v4175_v9  ;;  %v13510_v25 = vld [vmem:[%s16197_s3 + $0x168] sm:$0xff]   ;;  %v4185_v35 = vsel %vm4123_vm14, %v4175_v9, %v4184_v12  ;;  %v4232_v2 = vshrl.u32 %v13509_v6, 16  ;;  %v4235_v11 = vshll.u32 %v13509_v6, 16 }
 0x169   : > { %12329 = vmatprep.subr.bf16.mxu0 %v13498_v37  ;;  %v4244_v9 = vshll.u32 %v13511_v54, 16  ;;  %v4243_v12 = vrot.slane %v4241_v60, 1  ;;  %v4262_v54 = vshll.u32 %v13514_v4, 16  ;;  %v4271_v60 = vshll.u32 %v13515_v26, 16 }
 0x16b   : > { %v4246_v6 = vrot.slane %v4244_v9, 2 }
 0x16c   : > { %12330 = vmatpush3.bf16.msra.mxu0 %v13498_v37  ;;  %v4223_v37 = vshrl.u32 %v13508_v10, 16 }
 0x16d   : > { %12331 = vmatprep.subr.bf16.mxu0 %v13501_v61 }
 0x16e   : > { %v4225_v17 = vrot.slane %v4223_v37, 1  ;;  %v4259_v37 = vshrl.u32 %v13514_v4, 16  ;;  %v13559_v4 = vld [vmem:[%s16197_s3] sm:$0xff]  }
 0x16f   : > { %12296 = vmatmul.mubr.bf16.gmra.mrb[4].mxu0 %v4167_v51  ;;  %12067 = vmatprep.subr.bf16.mxu1 %v13559_v4 }
 0x170   : > { %12299 = vmatprep.mubr.bf16.mxu0 %v4176_v15  ;;  %12332 = vmatpush3.bf16.msra.mxu0 %v13501_v61  ;;  %v4202_v61 = vor.u32 %v4201_v42, %v4198_v57  ;;  %v4234_v15 = vrot.slane %v4232_v2, 1  ;;  %v4237_v57 = vrot.slane %v4235_v11, 2  ;;  %v4220_v42 = vor.u32 %v4219_v38, %v4216_v8 }
 0x171   : > { %12333 = vmatprep.subr.bf16.mxu0 %v13504_v40  ;;  %v4252_v38 = vrot.slane %v4250_v7, 1  ;;  %v4247_v2 = vor.u32 %v4246_v6, %v4243_v12  ;;  %v4264_v11 = vrot.slane %v4262_v54, 2  ;;  %12068 = vmatpush3.bf16.msra.mxu1 %v13559_v4  ;;  %v13523_v4 = vld [vmem:[#allocation2 + $0x20] sm:$0xff]  }
 0x172   : > { %v4203_v51 = vsel %vm4123_vm14, %v4193_v45, %v4202_v61  ;;  %v4212_v10 = vsel %vm4123_vm14, %v4202_v61, %v4211_v5  ;;  %v15112_v45 = vld [vmem:[%s16197_s3 + $0x180] sm:$0xff]   ;;  %v4238_v61 = vor.u32 %v4237_v57, %v4234_v15  ;;  %v4273_v15 = vrot.slane %v4271_v60, 2 }
 0x174   : > { %12334 = vmatpush3.bf16.msra.mxu0 %v13504_v40  ;;  %v13516_v40 = vld [vmem:[%s16197_s3 + $0x178] sm:$0xff]   ;;  %v4248_v52 = vsel %vm4123_vm14, %v4238_v61, %v4247_v2 }
 0x175   : > { %12335 = vmatprep.subr.bf16.mxu0 %v13507_v59 }
 0x177   : > { %12300 = vmatmul.mubr.bf16.gmra.mrb[8].mxu0 %v4185_v35  ;;  %v13517_v35 = vld [vmem:[#allocation2 + $0x90] sm:$0xff]  }
 0x178   : > { %12303 = vmatprep.mubr.bf16.mxu0 %v4194_v20  ;;  %12336 = vmatpush3.bf16.msra.mxu0 %v13507_v59  ;;  %v4229_v59 = vor.u32 %v4228_v58, %v4225_v17  ;;  %v4268_v20 = vshrl.u32 %v13515_v26, 16  ;;  %v4261_v17 = vrot.slane %v4259_v37, 1  ;;  %v4277_v58 = vshrl.u32 %v13517_v35, 16  ;;  %v13564_v37 = vld [vmem:[%s16197_s3 + $0x10] sm:$0xff]  }
 0x179   : > { %12337 = vmatprep.subr.bf16.mxu0 %v13510_v25  ;;  %v4280_v9 = vshll.u32 %v13517_v35, 16 }
 0x17a   : > { %v4230_v8 = vsel %vm4123_vm14, %v4220_v42, %v4229_v59  ;;  %v4279_v57 = vrot.slane %v4277_v58, 1 }
 0x17b   : > { %v4282_v12 = vrot.slane %v4280_v9, 2 }
 0x17c   : > { %12338 = vmatpush3.bf16.msra.mxu0 %v13510_v25  ;;  %v4221_v25 = vsel %vm4123_vm14, %v4211_v5, %v4220_v42  ;;  %v4239_v5 = vsel %vm4123_vm14, %v4229_v59, %v4238_v61  ;;  %v13518_v42 = vld [vmem:[#allocation2 + $0x98] ss:$0 sps:$4 sm:$0x33]   ;;  %v13562_v59 = vld [vmem:[%s16197_s3 + $0x8] sm:$0xff]  }
 0x17d   : > { %12339 = vmatprep.subr.bf16.mxu0 %v13513_v28  ;;  %v4286_v6 = vshrl.u32 %v13518_v42, 16  ;;  %v4289_v54 = vshll.u32 %v13518_v42, 16  ;;  %12069 = vmatprep.subr.bf16.mxu1 %v13562_v59  ;;  %v13519_v61 = vld [vmem:[#allocation2 + $0x8] sm:$0xfc]  }
 0x17e   : > { %12070 = vmatpush3.bf16.msra.mxu1 %v13562_v59  ;;  %v4793_v60 = vrot.slane %v13519_v61, 2  ;;  %v13577_v59 = vld [vmem:[%s16197_s3 + $0x38] sm:$0xff]  }
 0x17f   : > { %12304 = vmatmul.mubr.bf16.gmra.mrb[12].mxu0 %v4203_v51  ;;  %v4265_v51 = vor.u32 %v4264_v11, %v4261_v17  ;;  %12071 = vmatprep.subr.bf16.mxu1 %v13564_v37  ;;  %v13567_v17 = vld [vmem:[%s16197_s3 + $0x18] sm:$0xff]  }
 0x180   : > { %12307 = vmatprep.mubr.bf16.mxu0 %v4212_v10  ;;  %12340 = vmatpush3.bf16.msra.mxu0 %v13513_v28  ;;  %v4255_v28 = vrot.slane %v4253_v3, 2  ;;  %v4270_v10 = vrot.slane %v4268_v20, 1  ;;  %v13531_v61 = vld [vmem:[%s16197_s3 + $0x198] sm:$0xff]  }
 0x181   : > { %12341 = vmatprep.subr.bf16.mxu0 %v13516_v40 }
 0x182   : > { %v4274_v26 = vor.u32 %v4273_v15, %v4270_v10  ;;  %12072 = vmatpush3.bf16.msra.mxu1 %v13564_v37  ;;  %v4798_v15 = vrot.slane %v13523_v4, 2  ;;  %v13578_v37 = vld [vmem:[#allocation2] sm:$0xff]  }
 0x183   : > { %12073 = vmatprep.subr.bf16.mxu1 %v13567_v17  ;;  %12083 = vmatprep.mubr.bf16.mxu1 %v13578_v37  ;;  %v13533_v37 = vld [vmem:[#allocation2 + $0x58] sm:$0xff]  }
 0x184   : > { %12342 = vmatpush3.bf16.msra.mxu0 %v13516_v40  ;;  %v4256_v40 = vor.u32 %v4255_v28, %v4252_v38  ;;  %v4275_v35 = vsel %vm4123_vm14, %v4265_v51, %v4274_v26  ;;  %v4291_v38 = vrot.slane %v4289_v54, 2  ;;  %v13520_v28 = vld [vmem:[#allocation2 + $0x10] sm:$0xff]  }
 0x185   : > { %12379 = vmatprep.subr.bf16.mxu0 %v15112_v45  ;;  %v4794_v58 = vrot.slane %v13520_v28, 2  ;;  %v13528_v54 = vld [vmem:[%s16197_s3 + $0x190] sm:$0xff]  }
 0x186   : > { %v4257_v7 = vsel %vm4123_vm14, %v4247_v2, %v4256_v40  ;;  %v4266_v3 = vsel %vm4123_vm14, %v4256_v40, %v4265_v51  ;;  %v13569_v2 = vld [vmem:[%s16197_s3 + $0x20] sm:$0xff]   ;;  %12074 = vmatpush3.bf16.msra.mxu1 %v13567_v17  ;;  %v13572_v40 = vld [vmem:[%s16197_s3 + $0x28] sm:$0xff]   ;;  %v13573_v51 = vld [vmem:[%s16197_s3 + $0x30] sm:$0xff]  }
 0x187   : > { %12308 = vmatmul.mubr.bf16.gmra.mrb[16].mxu0 %v4221_v25  ;;  %v4283_v25 = vor.u32 %v4282_v12, %v4279_v57  ;;  %12075 = vmatprep.subr.bf16.mxu1 %v13569_v2  ;;  %v13524_v12 = vld [vmem:[#allocation2 + $0x28] sm:$0xff]   ;;  %v13583_v28 = vld [vmem:[#allocation2 + $0x10] sm:$0xff]  }
 0x188   : > { %12311 = vmatprep.mubr.bf16.mxu0 %v4230_v8  ;;  %v4288_v8 = vrot.slane %v4286_v6, 1  ;;  %v13802_v17 = vld [vmem:[%s16197_s3 + $0x48] sm:$0xff]  }
 0x189   : > { %v4284_v20 = vsel %vm4123_vm14, %v4274_v26, %v4283_v25  ;;  %v4800_v26 = vrot.slane %v13524_v12, 2 }
 0x18a   : > { %v4292_v11 = vor.u32 %v4291_v38, %v4288_v8  ;;  %12076 = vmatpush3.bf16.msra.mxu1 %v13569_v2 }
 0x18b   : > { %12077 = vmatprep.subr.bf16.mxu1 %v13572_v40  ;;  %v4801_v8 = vsel %vm4792_vm11, %v4798_v15, %v4800_v26 }
 0x18c   : > { %v4293_v9 = vsel %vm4123_vm14, %v4283_v25, %v4292_v11  ;;  %v13579_v25 = vld [vmem:[#allocation2 + $0x8] sm:$0xff]  }
 0x18e   : > { %12078 = vmatpush3.bf16.msra.mxu1 %v13572_v40  ;;  %v13532_v40 = vld [vmem:[#allocation2 + $0x50] sm:$0xff]  }
 0x18f   : > { %12312 = vmatmul.mubr.bf16.gmra.mrb[20].mxu0 %v4239_v5  ;;  %v13522_v5 = vld [vmem:[#allocation2 + $0x18] sm:$0xff]   ;;  %12079 = vmatprep.subr.bf16.mxu1 %v13573_v51  ;;  %v4810_v12 = vrot.slane %v13532_v40, 2 }
 0x190   : > { %12315 = vmatprep.mubr.bf16.mxu0 %v4248_v52  ;;  %v4795_v52 = vsel %vm4792_vm11, %v4793_v60, %v4794_v58  ;;  %v4796_v10 = vrot.slane %v13522_v5, 2  ;;  %v13534_v60 = vld [vmem:[%s16197_s3 + $0x1a0] sm:$0xff]   ;;  %v13539_v40 = vld [vmem:[#allocation2 + $0x78] sm:$0xff]  }
 0x192   : > { %v4797_v57 = vsel %vm4792_vm11, %v4794_v58, %v4796_v10  ;;  %v4799_v42 = vsel %vm4792_vm11, %v4796_v10, %v4798_v15  ;;  %12080 = vmatpush3.bf16.msra.mxu1 %v13573_v51  ;;  %v13584_v58 = vld [vmem:[#allocation2 + $0x18] sm:$0xff]   ;;  %v13537_v51 = vld [vmem:[%s16197_s3 + $0x1a8] sm:$0xff]  }
 0x193   : > { %12081 = vmatprep.subr.bf16.mxu1 %v13577_v59  ;;  %v13804_v10 = vld [vmem:[%s16197_s3 + $0x58] sm:$0xff]  }
 0x196   : > { %12082 = vmatpush3.bf16.msra.mxu1 %v13577_v59 }
 0x197   : > { %12316 = vmatmul.mubr.bf16.gmra.mrb[24].mxu0 %v4257_v7  ;;  %v13525_v7 = vld [vmem:[%s16197_s3 + $0x188] sm:$0xff]  }
 0x198   : > { %12319 = vmatprep.mubr.bf16.mxu0 %v4266_v3  ;;  %v13526_v3 = vld [vmem:[#allocation2 + $0x30] sm:$0xff]  }
 0x199   : > { %v4802_v6 = vrot.slane %v13526_v3, 2  ;;  %12084 = vmatmul.mubr.bf16.vlgmr.msra.gmra.mrb[0].mxu1 %v13579_v25  ;;  %v13805_v3 = vld [vmem:[%s16197_s3 + $0x60] sm:$0xff]   ;;  %v13594_v25 = vld [vmem:[#allocation2 + $0x30] sm:$0xff]  }
 0x19a   : > { %12087 = vmatprep.mubr.bf16.mxu1 %v13583_v28 }
 0x19b   : > { %v4803_v38 = vsel %vm4792_vm11, %v4800_v26, %v4802_v6 }
 0x19f   : > { %12320 = vmatmul.mubr.bf16.gmra.mrb[28].mxu0 %v4275_v35  ;;  %v13801_v35 = vld [vmem:[%s16197_s3 + $0x40] sm:$0xff]  }
 0x1a0   : > { %12323 = vmatprep.mubr.bf16.mxu0 %v4284_v20  ;;  %12847 = vmatprep.subr.bf16.mxu1 %v13801_v35  ;;  %v13529_v20 = vld [vmem:[#allocation2 + $0x40] sm:$0xff]  }
 0x1a1   : > { %12855 = vmatpush3.bf16.msra.mxu1 %v13801_v35  ;;  %v4806_v11 = vrot.slane %v13529_v20, 2  ;;  %v13806_v35 = vld [vmem:[%s16197_s3 + $0x68] sm:$0xff]   ;;  %v13595_v20 = vld [vmem:[#allocation2 + $0x38] sm:$0xff]  }
 0x1a2   : > { %12848 = vmatprep.subr.bf16.mxu1 %v13802_v17  ;;  %12088 = vmatmul.mubr.bf16.gmra.mrb[4].mxu1 %v13584_v58  ;;  %v13808_v58 = vld [vmem:[%s16197_s3 + $0x78] sm:$0xff]  }
 0x1a5   : > { %12856 = vmatpush3.bf16.msra.mxu1 %v13802_v17  ;;  %v13536_v17 = vld [vmem:[#allocation2 + $0x68] sm:$0xff]  }
 0x1a7   : > { %12324 = vmatmul.mubr.bf16.gmra.mrb[32].mxu0 %v4293_v9  ;;  %v13803_v9 = vld [vmem:[%s16197_s3 + $0x50] sm:$0xff]  }
 0x1a8   : > { %12343 = vmatprep.mubr.bf16.mxu0 %v4795_v52  ;;  %12849 = vmatprep.subr.bf16.mxu1 %v13803_v9  ;;  %v13530_v52 = vld [vmem:[#allocation2 + $0x48] sm:$0xff]  }
 0x1a9   : > { %12857 = vmatpush3.bf16.msra.mxu1 %v13803_v9  ;;  %v4808_v15 = vrot.slane %v13530_v52, 2  ;;  %v4816_v9 = vrot.slane %v13536_v17, 2  ;;  %v13600_v52 = vld [vmem:[#allocation2 + $0x48] sm:$0xff]  }
 0x1aa   : > { %12850 = vmatprep.subr.bf16.mxu1 %v13804_v10 }
 0x1ab   : > { %v4809_v59 = vsel %vm4792_vm11, %v4806_v11, %v4808_v15  ;;  %v4811_v26 = vsel %vm4792_vm11, %v4808_v15, %v4810_v12  ;;  %v13604_v15 = vld [vmem:[#allocation2 + $0x50] sm:$0xff]  }
 0x1ad   : > { %12858 = vmatpush3.bf16.msra.mxu1 %v13804_v10  ;;  %v13541_v10 = vld [vmem:[#allocation2 + $0x80] sm:$0xff]  }
 0x1ae   : > { %12851 = vmatprep.subr.bf16.mxu1 %v13805_v3 }
 0x1af   : > { %12344 = vmatmul.mubr.bf16.vlgmr.msra.gmra.mrb[0].mxu0 %v4797_v57  ;;  %v13589_v57 = vld [vmem:[#allocation2 + $0x20] sm:$0xff]  }
 0x1b0   : > { %12380 = vmatpush3.bf16.msra.mxu0 %v15112_v45  ;;  %12347 = vmatprep.mubr.bf16.mxu0 %v4799_v42  ;;  %v13527_v45 = vld [vmem:[#allocation2 + $0x38] sm:$0xff]   ;;  %v13540_v42 = vld [vmem:[%s16197_s3 + $0x1b0] sm:$0xff]  }
 0x1b1   : > { %12381 = vmatprep.subr.bf16.mxu0 %v13525_v7  ;;  %v4804_v2 = vrot.slane %v13527_v45, 2  ;;  %12091 = vmatprep.mubr.bf16.mxu1 %v13589_v57  ;;  %v4820_v57 = vrot.slane %v13539_v40, 2 }
 0x1b2   : > { %12859 = vmatpush3.bf16.msra.mxu1 %v13805_v3  ;;  %v13542_v3 = vld [vmem:[#allocation2 + $0x88] sm:$0xff]  }
 0x1b3   : > { %v4805_v5 = vsel %vm4792_vm11, %v4802_v6, %v4804_v2  ;;  %v4807_v4 = vsel %vm4792_vm11, %v4804_v2, %v4806_v11  ;;  %v13535_v6 = vld [vmem:[#allocation2 + $0x60] sm:$0xff]   ;;  %12852 = vmatprep.subr.bf16.mxu1 %v13806_v35  ;;  %v13538_v11 = vld [vmem:[#allocation2 + $0x70] sm:$0xff]  }
 0x1b4   : > { %12382 = vmatpush3.bf16.msra.mxu0 %v13525_v7  ;;  %v13590_v7 = vld [vmem:[#allocation2 + $0x28] sm:$0xff]   ;;  %v4814_v45 = vrot.slane %v13535_v6, 2  ;;  %v4824_v6 = vrot.slane %v13542_v3, 2  ;;  %v13553_v3 = vld [vmem:[#allocation2 + $0x38] sm:$0xff]  }
 0x1b5   : > { %12383 = vmatprep.subr.bf16.mxu0 %v13528_v54  ;;  %12092 = vmatmul.mubr.bf16.gmra.mrb[8].mxu1 %v13590_v7 }
 0x1b6   : > { %12095 = vmatprep.mubr.bf16.mxu1 %v13594_v25  ;;  %12860 = vmatpush3.bf16.msra.mxu1 %v13806_v35  ;;  %v13610_v25 = vld [vmem:[#allocation2 + $0x68] sm:$0xff]  }
 0x1b7   : > { %12348 = vmatmul.mubr.bf16.gmra.mrb[4].mxu0 %v4801_v8  ;;  %v4812_v8 = vrot.slane %v13533_v37, 2  ;;  %v13544_v37 = vld [vmem:[#allocation2 + $0x90] sm:$0xff]  }
 0x1b8   : > { %12351 = vmatprep.mubr.bf16.mxu0 %v4803_v38  ;;  %12384 = vmatpush3.bf16.msra.mxu0 %v13528_v54  ;;  %v13543_v54 = vld [vmem:[%s16197_s3 + $0x1b8] sm:$0xff]   ;;  %v15200_v38 = vld [vmem:[%s16197_s3 + $0x1c0] sm:$0xff]  }
 0x1b9   : > { %12385 = vmatprep.subr.bf16.mxu0 %v13531_v61  ;;  %v4813_v28 = vsel %vm4792_vm11, %v4810_v12, %v4812_v8  ;;  %v4815_v2 = vsel %vm4792_vm11, %v4812_v8, %v4814_v45  ;;  %v4822_v12 = vrot.slane %v13541_v10, 2  ;;  %v13545_v8 = vld [vmem:[#allocation2 + $0x98] ss:$0 sps:$4 sm:$0x33]   ;;  %v13619_v10 = vld [vmem:[#allocation2 + $0x88] sm:$0xff]  }
 0x1ba   : > { %v4828_v17 = vrot.slane %v13545_v8, 2 }
 0x1bb   : > { %v4825_v35 = vsel %vm4792_vm11, %v4822_v12, %v4824_v6 }
 0x1bc   : > { %12386 = vmatpush3.bf16.msra.mxu0 %v13531_v61  ;;  %v13807_v61 = vld [vmem:[%s16197_s3 + $0x70] sm:$0xff]  }
 0x1bd   : > { %12387 = vmatprep.subr.bf16.mxu0 %v13534_v60  ;;  %12853 = vmatprep.subr.bf16.mxu1 %v13807_v61 }
 0x1be   : > { %12096 = vmatmul.mubr.bf16.gmra.mrb[12].mxu1 %v13595_v20  ;;  %v13546_v20 = vld [vmem:[#allocation2 + $0x10] sm:$0xfc]  }
 0x1bf   : > { %12352 = vmatmul.mubr.bf16.gmra.mrb[8].mxu0 %v4805_v5  ;;  %12861 = vmatpush3.bf16.msra.mxu1 %v13807_v61  ;;  %v4818_v5 = vrot.slane %v13538_v11, 2  ;;  %v13547_v61 = vld [vmem:[#allocation2 + $0x18] sm:$0xff]  }
 0x1c0   : > { %12355 = vmatprep.mubr.bf16.mxu0 %v4807_v4  ;;  %12388 = vmatpush3.bf16.msra.mxu0 %v13534_v60  ;;  %v13599_v60 = vld [vmem:[#allocation2 + $0x40] sm:$0xff]   ;;  %v4817_v4 = vsel %vm4792_vm11, %v4814_v45, %v4816_v9  ;;  %v5329_v11 = vrot.slane %v13547_v61, 2  ;;  %v13555_v61 = vld [vmem:[%s16197_s3 + $0x1d0] sm:$0xff]  }
 0x1c1   : > { %12389 = vmatprep.subr.bf16.mxu0 %v13537_v51  ;;  %12854 = vmatprep.subr.bf16.mxu1 %v13808_v58  ;;  %v4821_v7 = vsel %vm4792_vm11, %v4818_v5, %v4820_v57 }
 0x1c2   : > { %12099 = vmatprep.mubr.bf16.mxu1 %v13599_v60  ;;  %v13615_v60 = vld [vmem:[#allocation2 + $0x78] sm:$0xff]  }
 0x1c3   : > { %12862 = vmatpush3.bf16.msra.mxu1 %v13808_v58 }
 0x1c4   : > { %12390 = vmatpush3.bf16.msra.mxu0 %v13537_v51  ;;  %v4819_v51 = vsel %vm4792_vm11, %v4816_v9, %v4818_v5  ;;  %v13549_v9 = vld [vmem:[#allocation2 + $0x20] sm:$0xff]  }
 0x1c5   : > { %12391 = vmatprep.subr.bf16.mxu0 %v13540_v42  ;;  %v5331_v40 = vrot.slane %v13549_v9, 2  ;;  %v13556_v9 = vld [vmem:[#allocation2 + $0x48] sm:$0xff]  }
 0x1c6   : > { %12100 = vmatmul.mubr.bf16.gmra.mrb[16].mxu1 %v13600_v52  ;;  %v13550_v52 = vld [vmem:[#allocation2 + $0x28] sm:$0xff]  }
 0x1c7   : > { %12356 = vmatmul.mubr.bf16.gmra.mrb[12].mxu0 %v4809_v59  ;;  %12103 = vmatprep.mubr.bf16.mxu1 %v13604_v15  ;;  %v4823_v59 = vsel %vm4792_vm11, %v4820_v57, %v4822_v12  ;;  %v13623_v15 = vld [vmem:[#allocation2 + $0x48] sm:$0xff]   ;;  %v5332_v57 = vsel %vm4792_vm11, %v5329_v11, %v5331_v40  ;;  %v13551_v12 = vld [vmem:[#allocation2 + $0x30] sm:$0xff]  }
 0x1c8   : > { %12359 = vmatprep.mubr.bf16.mxu0 %v4811_v26  ;;  %12392 = vmatpush3.bf16.msra.mxu0 %v13540_v42  ;;  %v13605_v42 = vld [vmem:[#allocation2 + $0x58] sm:$0xff]   ;;  %v13609_v26 = vld [vmem:[#allocation2 + $0x60] sm:$0xff]   ;;  %v5335_v8 = vrot.slane %v13551_v12, 2 }
 0x1c9   : > { %12393 = vmatprep.subr.bf16.mxu0 %v13543_v54 }
 0x1cc   : > { %12394 = vmatpush3.bf16.msra.mxu0 %v13543_v54  ;;  %v4826_v54 = vrot.slane %v13544_v37, 2  ;;  %v13624_v37 = vld [vmem:[#allocation2 + $0x50] sm:$0xff]  }
 0x1cd   : > { %12431 = vmatprep.subr.bf16.mxu0 %v15200_v38 }
 0x1ce   : > { %12104 = vmatmul.mubr.bf16.gmra.mrb[20].mxu1 %v13605_v42  ;;  %v4827_v45 = vsel %vm4792_vm11, %v4824_v6, %v4826_v54  ;;  %v4829_v58 = vsel %vm4792_vm11, %v4826_v54, %v4828_v17 }
 0x1cf   : > { %12360 = vmatmul.mubr.bf16.gmra.mrb[16].mxu0 %v4813_v28  ;;  %12107 = vmatprep.mubr.bf16.mxu1 %v13609_v26  ;;  %v13613_v28 = vld [vmem:[#allocation2 + $0x70] sm:$0xff]   ;;  %v13809_v26 = vld [vmem:[#allocation2 + $0x40] sm:$0xff]  }
 0x1d0   : > { %12363 = vmatprep.mubr.bf16.mxu0 %v4815_v2  ;;  %v5328_v2 = vrot.slane %v13546_v20, 2  ;;  %v2474_v6 = vshrl.u32 %v13809_v26, 16  ;;  %v5337_v20 = vrot.slane %v13553_v3, 2 }
 0x1d2   : > { %v5330_v5 = vsel %vm4792_vm11, %v5328_v2, %v5329_v11 }
 0x1d6   : > { %12108 = vmatmul.mubr.bf16.gmra.mrb[24].mxu1 %v13610_v25  ;;  %v2482_v25 = vshrl.u32 %v13623_v15, 16 }
 0x1d7   : > { %12364 = vmatmul.mubr.bf16.gmra.mrb[20].mxu0 %v4817_v4  ;;  %12111 = vmatprep.mubr.bf16.mxu1 %v13613_v28  ;;  %v13618_v4 = vld [vmem:[#allocation2 + $0x80] sm:$0xff]  }
 0x1d8   : > { %12367 = vmatprep.mubr.bf16.mxu0 %v4819_v51  ;;  %v5333_v51 = vrot.slane %v13550_v52, 2 }
 0x1da   : > { %v5334_v42 = vsel %vm4792_vm11, %v5331_v40, %v5333_v51  ;;  %v2490_v40 = vshrl.u32 %v13624_v37, 16 }
 0x1de   : > { %12112 = vmatmul.mubr.bf16.gmra.mrb[28].mxu1 %v13615_v60  ;;  %v13628_v60 = vld [vmem:[#allocation2 + $0x58] sm:$0xff]  }
 0x1df   : > { %12368 = vmatmul.mubr.bf16.gmra.mrb[24].mxu0 %v4821_v7  ;;  %12115 = vmatprep.mubr.bf16.mxu1 %v13618_v4  ;;  %v13552_v7 = vld [vmem:[%s16197_s3 + $0x1c8] sm:$0xff]   ;;  %v2494_v52 = vshll.u32 %v13628_v60, 16  ;;  %v13629_v4 = vld [vmem:[#allocation2 + $0x60] sm:$0xff]  }
 0x1e0   : > { %12371 = vmatprep.mubr.bf16.mxu0 %v4823_v59  ;;  %v2478_v59 = vshll.u32 %v13623_v15, 16  ;;  %v2498_v15 = vshrl.u32 %v13628_v60, 16 }
 0x1e2   : > { %v2480_v54 = vrot.slane %v2478_v59, 1 }
 0x1e4   : > { %v2484_v28 = vor.u32 %v2482_v25, %v2480_v54  ;;  %v13557_v25 = vld [vmem:[#allocation2 + $0x50] sm:$0xff]  }
 0x1e6   : > { %12116 = vmatmul.mubr.bf16.gmra.mrb[32].mxu1 %v13619_v10  ;;  %v2496_v10 = vrot.slane %v2494_v52, 1 }
 0x1e7   : > { %12372 = vmatmul.mubr.bf16.gmra.mrb[28].mxu0 %v4825_v35  ;;  %v2486_v35 = vshll.u32 %v13624_v37, 16 }
 0x1e8   : > { %12375 = vmatprep.mubr.bf16.mxu0 %v4827_v45  ;;  %v2476_v45 = vor.u32 %v2474_v6, %v14559_v29  ;;  %v5338_v29 = vsel %vm4792_vm11, %v5335_v8, %v5337_v20  ;;  %v2500_v3 = vor.u32 %v2498_v15, %v2496_v10  ;;  %v13633_v6 = vld [vmem:[#allocation2 + $0x68] sm:$0xff]   ;;  %v13561_v15 = vld [vmem:[#allocation2 + $0x60] sm:$0xff]  }
 0x1e9   : > { %v2488_v17 = vrot.slane %v2486_v35, 1 }
 0x1ea   : > { %v2481_v2 = vsel %vm16415_vm5, %v2476_v45, %v2480_v54  ;;  %vm16418_vm5 = vmmov %vm16417_vm0  ;;  %v13568_v45 = vld [vmem:[%s16197_s3 + $0x1e8] sm:$0xff]  }
 0x1eb   : > { %12151 = vmatprep.mubr.bf16.mxu1 %v2481_v2  ;;  %v2489_v11 = vsel %vm16416_vm3, %v2484_v28, %v2488_v17  ;;  %v2492_v12 = vor.u32 %v2490_v40, %v2488_v17  ;;  %v13634_v28 = vld [vmem:[#allocation2 + $0x70] sm:$0xff]   ;;  %v2506_v17 = vshrl.u32 %v13629_v4, 16  ;;  %vm16419_vm3 = vmmov %vm16417_vm0  ;;  %v13637_v40 = vld [vmem:[#allocation2 + $0x78] sm:$0xff]  }
 0x1ec   : > { %v2518_v60 = vshll.u32 %v13634_v28, 16 }
 0x1ed   : > { %v2497_v26 = vsel %vm16417_vm0, %v2492_v12, %v2496_v10  ;;  %v13580_v12 = vld [vmem:[%s16197_s3 + $0x1f8] sm:$0xff]  }
 0x1ee   : > { %12152 = vmatmul.mubr.bf16.vlgmr.msra.gmra.mrb[16].mxu1 %v2489_v11  ;;  %v2514_v11 = vshrl.u32 %v13633_v6, 16 }
 0x1ef   : > { %12376 = vmatmul.mubr.bf16.gmra.mrb[32].mxu0 %v4829_v58  ;;  %v13554_v58 = vld [vmem:[#allocation2 + $0x40] sm:$0xff]   ;;  %12155 = vmatprep.mubr.bf16.mxu1 %v2497_v26 }
 0x1f0   : > { %12395 = vmatprep.mubr.bf16.mxu0 %v5330_v5  ;;  %v13558_v5 = vld [vmem:[%s16197_s3 + $0x1d8] sm:$0xff]  }
 0x1f7   : > { %12396 = vmatmul.mubr.bf16.vlgmr.msra.gmra.mrb[0].mxu0 %v5332_v57  ;;  %v2502_v57 = vshll.u32 %v13629_v4, 16 }
 0x1f8   : > { %12432 = vmatpush3.bf16.msra.mxu0 %v15200_v38  ;;  %12399 = vmatprep.mubr.bf16.mxu0 %v5334_v42  ;;  %v5336_v38 = vsel %vm4792_vm11, %v5333_v51, %v5335_v8  ;;  %v5339_v51 = vrot.slane %v13554_v58, 2  ;;  %v5341_v42 = vrot.slane %v13556_v9, 2  ;;  %v13560_v8 = vld [vmem:[#allocation2 + $0x58] sm:$0xff]  }
 0x1f9   : > { %12433 = vmatprep.subr.bf16.mxu0 %v13552_v7  ;;  %v2504_v59 = vrot.slane %v2502_v57, 1  ;;  %v5345_v58 = vrot.slane %v13560_v8, 2 }
 0x1fa   : > { %v5340_v54 = vsel %vm4792_vm11, %v5337_v20, %v5339_v51  ;;  %v5342_v35 = vsel %vm4792_vm11, %v5339_v51, %v5341_v42  ;;  %v5343_v20 = vrot.slane %v13557_v25, 2  ;;  %v13565_v51 = vld [vmem:[#allocation2 + $0x68] sm:$0xff]  }
 0x1fb   : > { %v2505_v37 = vsel %vm16418_vm5, %v2500_v3, %v2504_v59  ;;  %v13638_v3 = vld [vmem:[#allocation2 + $0x80] sm:$0xff]   ;;  %v5349_v25 = vrot.slane %v13565_v51, 2  ;;  %vm16420_vm5 = vmmov %vm16417_vm0 }
 0x1fc   : > { %12434 = vmatpush3.bf16.msra.mxu0 %v13552_v7  ;;  %v13563_v7 = vld [vmem:[%s16197_s3 + $0x1e0] sm:$0xff]   ;;  %12156 = vmatmul.mubr.bf16.gmra.mrb[20].mxu1 %v2505_v37  ;;  %v5344_v10 = vsel %vm4792_vm11, %v5341_v42, %v5343_v20  ;;  %v5346_v57 = vsel %vm4792_vm11, %v5343_v20, %v5345_v58  ;;  %v2530_v37 = vshrl.u32 %v13637_v40, 16  ;;  %v5347_v42 = vrot.slane %v13561_v15, 2  ;;  %v13570_v20 = vld [vmem:[#allocation2 + $0x78] sm:$0xff]  }
 0x1fd   : > { %12435 = vmatprep.subr.bf16.mxu0 %v13555_v61  ;;  %v5353_v15 = vrot.slane %v13570_v20, 2 }
 0x1ff   : > { %12400 = vmatmul.mubr.bf16.gmra.mrb[4].mxu0 %v5336_v38  ;;  %v2508_v38 = vor.u32 %v2506_v17, %v2504_v59  ;;  %v2522_v59 = vshrl.u32 %v13634_v28, 16  ;;  %v13641_v17 = vld [vmem:[#allocation2 + $0x88] sm:$0xff]  }
 0x200   : > { %12403 = vmatprep.mubr.bf16.mxu0 %v5338_v29  ;;  %12436 = vmatpush3.bf16.msra.mxu0 %v13555_v61  ;;  %v2510_v61 = vshll.u32 %v13633_v6, 16  ;;  %v13574_v29 = vld [vmem:[%s16197_s3 + $0x1f0] sm:$0xff]   ;;  %v2534_v6 = vshll.u32 %v13638_v3, 16 }
 0x201   : > { %12437 = vmatprep.subr.bf16.mxu0 %v13558_v5 }
 0x202   : > { %v2512_v2 = vrot.slane %v2510_v61, 1 }
 0x204   : > { %12438 = vmatpush3.bf16.msra.mxu0 %v13558_v5  ;;  %v2516_v9 = vor.u32 %v2514_v11, %v2512_v2  ;;  %v2520_v5 = vrot.slane %v2518_v60, 1  ;;  %v2513_v52 = vsel %vm16419_vm3, %v2508_v38, %v2512_v2  ;;  %vm16421_vm3 = vmmov %vm16417_vm0  ;;  %v5348_v2 = vsel %vm4792_vm11, %v5345_v58, %v5347_v42  ;;  %v13566_v11 = vld [vmem:[#allocation2 + $0x70] sm:$0xff]  }
 0x205   : > { %12439 = vmatprep.subr.bf16.mxu0 %v13563_v7  ;;  %12159 = vmatprep.mubr.bf16.mxu1 %v2513_v52  ;;  %v5350_v60 = vsel %vm4792_vm11, %v5347_v42, %v5349_v25  ;;  %v2542_v38 = vshll.u32 %v13641_v17, 16  ;;  %v2546_v52 = vshrl.u32 %v13641_v17, 16 }
 0x206   : > { %v2521_v4 = vsel %vm16417_vm0, %v2516_v9, %v2520_v5  ;;  %v2538_v9 = vshrl.u32 %v13638_v3, 16 }
 0x207   : > { %12404 = vmatmul.mubr.bf16.gmra.mrb[8].mxu0 %v5340_v54  ;;  %12160 = vmatmul.mubr.bf16.gmra.mrb[24].mxu1 %v2521_v4  ;;  %v2524_v54 = vor.u32 %v2522_v59, %v2520_v5  ;;  %v2544_v5 = vrot.slane %v2542_v38, 1  ;;  %v13571_v59 = vld [vmem:[#allocation2 + $0x80] sm:$0xff]  }
 0x208   : > { %12407 = vmatprep.mubr.bf16.mxu0 %v5342_v35  ;;  %12440 = vmatpush3.bf16.msra.mxu0 %v13563_v7  ;;  %v2526_v7 = vshll.u32 %v13637_v40, 16  ;;  %v15259_v35 = vld [vmem:[%s16197_s3 + $0x200] sm:$0xff]   ;;  %v5351_v40 = vrot.slane %v13566_v11, 2 }
 0x209   : > { %12441 = vmatprep.subr.bf16.mxu0 %v13568_v45  ;;  %v2548_v58 = vor.u32 %v2546_v52, %v2544_v5 }
 0x20a   : > { %v2528_v26 = vrot.slane %v2526_v7, 1  ;;  %v5352_v7 = vsel %vm4792_vm11, %v5349_v25, %v5351_v40  ;;  %v5354_v3 = vsel %vm4792_vm11, %v5351_v40, %v5353_v15 }
 0x20c   : > { %12442 = vmatpush3.bf16.msra.mxu0 %v13568_v45  ;;  %v2532_v8 = vor.u32 %v2530_v37, %v2528_v26  ;;  %v2536_v45 = vrot.slane %v2534_v6, 1  ;;  %v2529_v61 = vsel %vm16420_vm5, %v2524_v54, %v2528_v26  ;;  %vm16422_vm5 = vmmov %vm16417_vm0  ;;  %v13575_v26 = vld [vmem:[#allocation2 + $0x88] sm:$0xff]   ;;  %v5355_v37 = vrot.slane %v13571_v59, 2  ;;  %v13576_v54 = vld [vmem:[#allocation2 + $0x90] sm:$0xff]  }
 0x20d   : > { %12443 = vmatprep.subr.bf16.mxu0 %v13574_v29  ;;  %12163 = vmatprep.mubr.bf16.mxu1 %v2529_v61  ;;  %v5357_v6 = vrot.slane %v13575_v26, 2  ;;  %v13585_v61 = vld [vmem:[#allocation2 + $0x10] sm:$0xfc]   ;;  %v5359_v25 = vrot.slane %v13576_v54, 2 }
 0x20e   : > { %v2537_v28 = vsel %vm16421_vm3, %v2532_v8, %v2536_v45  ;;  %v5356_v42 = vsel %vm4792_vm11, %v5353_v15, %v5355_v37  ;;  %v13581_v8 = vld [vmem:[#allocation2 + $0x98] sm:$0xff]   ;;  %v5868_v11 = vshll.u32 %v13585_v61, 16  ;;  %v13591_v15 = vld [vmem:[#allocation2 + $0x28] sm:$0xff]   ;;  %vm5863_vm3 = vsmask.f32 5376 }
 0x20f   : > { %12408 = vmatmul.mubr.bf16.gmra.mrb[12].mxu0 %v5344_v10  ;;  %12164 = vmatmul.mubr.bf16.gmra.mrb[28].mxu1 %v2537_v28  ;;  %v2540_v10 = vor.u32 %v2538_v9, %v2536_v45  ;;  %v5358_v45 = vsel %vm4792_vm11, %v5355_v37, %v5357_v6  ;;  %v13586_v28 = vld [vmem:[#allocation2 + $0x18] sm:$0xff]   ;;  %v5361_v17 = vrot.slane %v13581_v8, 2  ;;  %v5360_v38 = vsel %vm4792_vm11, %v5357_v6, %v5359_v25  ;;  %v13582_v9 = vld [vmem:[#allocation2 + $0xa0] ss:$0 sps:$4 sm:$0x33]  }
 0x210   : > { %12411 = vmatprep.mubr.bf16.mxu0 %v5346_v57  ;;  %12444 = vmatpush3.bf16.msra.mxu0 %v13574_v29  ;;  %v13642_v29 = vld [vmem:[#allocation2 + $0x90] ss:$0 sps:$4 sm:$0x11]   ;;  %v5876_v20 = vshll.u32 %v13586_v28, 16  ;;  %v5891_v59 = vshrl.u32 %v13591_v15, 16 }
 0x211   : > { %12445 = vmatprep.subr.bf16.mxu0 %v13580_v12  ;;  %v2550_v4 = vshll.u32 %v13642_v29, 16  ;;  %v2545_v51 = vsel %vm16417_vm0, %v2540_v10, %v2544_v5  ;;  %v5362_v29 = vsel %vm4792_vm11, %v5359_v25, %v5361_v17  ;;  %v13588_v5 = vld [vmem:[#allocation2 + $0x20] sm:$0xff]   ;;  %vm6532_vm0 = vcmask 1044480  }
 0x212   : > { %12167 = vmatprep.mubr.bf16.mxu1 %v2545_v51  ;;  %v5878_v10 = vrot.slane %v5876_v20, 3  ;;  %v5885_v51 = vshll.u32 %v13588_v5, 16  ;;  %v5893_v8 = vrot.slane %v5891_v59, 2 }
 0x213   : > { %v2552_v57 = vrot.slane %v2550_v4, 1  ;;  %v5870_v4 = vrot.slane %v5868_v11, 3 }
 0x214   : > { %12446 = vmatpush3.bf16.msra.mxu0 %v13580_v12  ;;  %v5887_v6 = vrot.slane %v5885_v51, 3 }
 0x215   : > { %12483 = vmatprep.subr.bf16.mxu0 %v15259_v35  ;;  %v2553_v12 = vsel %vm16422_vm5, %v2548_v58, %v2552_v57  ;;  %v5363_v58 = vrot.slane %v13582_v9, 2  ;;  %v5882_v57 = vshrl.u32 %v13588_v5, 16  ;;  %v13597_v9 = vld [vmem:[#allocation2 + $0x40] sm:$0xff]   ;;  %vm16443_vm5 = vnez %v16288_v56 }
 0x217   : > { %12412 = vmatmul.mubr.bf16.gmra.mrb[16].mxu0 %v5348_v2  ;;  %12168 = vmatmul.mubr.bf16.gmra.mrb[32].mxu1 %v2553_v12  ;;  %v5865_v2 = vshrl.u32 %v13585_v61, 16  ;;  %v5364_v26 = vsel %vm4792_vm11, %v5361_v17, %v5363_v58  ;;  %v5884_v37 = vrot.slane %v5882_v57, 2  ;;  %v13596_v61 = vld [vmem:[#allocation2 + $0x38] sm:$0xff]   ;;  %v5918_v58 = vshrl.u32 %v13597_v9, 16 }
 0x218   : > { %12415 = vmatprep.mubr.bf16.mxu0 %v5350_v60  ;;  %v5873_v60 = vshrl.u32 %v13586_v28, 16  ;;  %v5912_v20 = vshll.u32 %v13596_v61, 16  ;;  %v5921_v57 = vshll.u32 %v13597_v9, 16  ;;  %v13810_v9 = vld [vmem:[%s13940_s24] sm:$0xff] }
 0x219   : > { %v5867_v52 = vrot.slane %v5865_v2, 2  ;;  %v5888_v28 = vor.u32 %v5887_v6, %v5884_v37  ;;  %v5920_v37 = vrot.slane %v5918_v58, 2  ;;  %v13657_v58 = vld [vmem:[%s16203_s9 + $0x10] sm:$0xff]  }
 0x21a   : > { %v5875_v40 = vrot.slane %v5873_v60, 2  ;;  %v5909_v60 = vshrl.u32 %v13596_v61, 16  ;;  %v5923_v6 = vrot.slane %v5921_v57, 3 }
 0x21b   : > { %v5871_v12 = vor.u32 %v5870_v4, %v5867_v52  ;;  %v13593_v52 = vld [vmem:[%s16197_s3 + $0x208] sm:$0xff]  }
 0x21c   : > { %v5911_v4 = vrot.slane %v5909_v60, 2 }
 0x21f   : > { %12416 = vmatmul.mubr.bf16.gmra.mrb[20].mxu0 %v5352_v7  ;;  %v5879_v7 = vor.u32 %v5878_v10, %v5875_v40  ;;  %v5914_v40 = vrot.slane %v5912_v20, 3  ;;  %v13601_v10 = vld [vmem:[#allocation2 + $0x48] sm:$0xff]  }
 0x220   : > { %12419 = vmatprep.mubr.bf16.mxu0 %v5354_v3  ;;  %v5894_v3 = vshll.u32 %v13591_v15, 16  ;;  %v5930_v59 = vshll.u32 %v13601_v10, 16 }
 0x221   : > { %v5880_v54 = vsel %vm5863_vm3, %v5871_v12, %v5879_v7  ;;  %v5915_v51 = vor.u32 %v5914_v40, %v5911_v4  ;;  %v13598_v12 = vld [vmem:[%s16197_s3 + $0x210] sm:$0xff]   ;;  %v15311_v40 = vld [vmem:[%s16202_s8] ss:$0 sm:$0xff] }
 0x227   : > { %12420 = vmatmul.mubr.bf16.gmra.mrb[24].mxu0 %v5356_v42  ;;  %v13592_v42 = vld [vmem:[#allocation2 + $0x30] sm:$0xff]  }
 0x228   : > { %12423 = vmatprep.mubr.bf16.mxu0 %v5358_v45  ;;  %v5896_v45 = vrot.slane %v5894_v3, 3  ;;  %v5900_v25 = vshrl.u32 %v13592_v42, 16  ;;  %v5903_v2 = vshll.u32 %v13592_v42, 16  ;;  %v13602_v3 = vld [vmem:[#allocation2 + $0x50] sm:$0xff]  }
 0x229   : > { %v5936_v61 = vshrl.u32 %v13602_v3, 16 }
 0x22a   : > { %v5897_v11 = vor.u32 %v5896_v45, %v5893_v8  ;;  %v5905_v17 = vrot.slane %v5903_v2, 3  ;;  %v13603_v8 = vld [vmem:[%s16197_s3 + $0x218] sm:$0xff]   ;;  %v13656_v2 = vld [vmem:[%s16203_s9 + $0x8] sm:$0xff]  }
 0x22b   : > { %v13606_v45 = vld [vmem:[#allocation2 + $0x58] sm:$0xff]  }
 0x22c   : > { %v5898_v5 = vsel %vm5863_vm3, %v5888_v28, %v5897_v11  ;;  %v5945_v20 = vshrl.u32 %v13606_v45, 16 }
 0x22f   : > { %12424 = vmatmul.mubr.bf16.gmra.mrb[28].mxu0 %v5360_v38  ;;  %v5889_v38 = vsel %vm5863_vm3, %v5879_v7, %v5888_v28  ;;  %v5927_v7 = vshrl.u32 %v13601_v10, 16  ;;  %v5939_v28 = vshll.u32 %v13602_v3, 16  ;;  %v5938_v10 = vrot.slane %v5936_v61, 2 }
 0x230   : > { %12427 = vmatprep.mubr.bf16.mxu0 %v5362_v29  ;;  %v5902_v29 = vrot.slane %v5900_v25, 2  ;;  %v13655_v25 = vld [vmem:[%s16203_s9] sm:$0xff]  }
 0x231   : > { %v5929_v42 = vrot.slane %v5927_v7, 2  ;;  %12535 = vmatprep.subr.bf16.mxu1 %v13655_v25  ;;  %v13611_v7 = vld [vmem:[#allocation2 + $0x68] sm:$0xff]  }
 0x232   : > { %v5906_v15 = vor.u32 %v5905_v17, %v5902_v29  ;;  %v13608_v29 = vld [vmem:[%s16197_s3 + $0x220] sm:$0xff]   ;;  %12536 = vmatpush3.bf16.msra.mxu1 %v13655_v25  ;;  %v5963_v61 = vshrl.u32 %v13611_v7, 16 }
 0x233   : > { %v15302_v17 = vld [vmem:[%s16201_s7] ss:$0 sm:$0xff]  ;;  %12537 = vmatprep.subr.bf16.mxu1 %v13656_v2 }
 0x236   : > { %12538 = vmatpush3.bf16.msra.mxu1 %v13656_v2  ;;  %v13620_v2 = vld [vmem:[%s16197_s3 + $0x230] sm:$0xff]  }
 0x237   : > { %12428 = vmatmul.mubr.bf16.gmra.mrb[32].mxu0 %v5364_v26  ;;  %v5907_v26 = vsel %vm5863_vm3, %v5897_v11, %v5906_v15  ;;  %v5924_v11 = vor.u32 %v5923_v6, %v5920_v37  ;;  %v5947_v37 = vrot.slane %v5945_v20, 2  ;;  %12539 = vmatprep.subr.bf16.mxu1 %v13657_v58  ;;  %v13659_v20 = vld [vmem:[%s16203_s9 + $0x20] sm:$0xff]  }
 0x238   : > { %12447 = vmatprep.mubr.bf16.mxu0 %v5880_v54  ;;  %v5932_v54 = vrot.slane %v5930_v59, 3 }
 0x239   : > { %v5925_v57 = vsel %vm5863_vm3, %v5915_v51, %v5924_v11 }
 0x23a   : > { %v5933_v60 = vor.u32 %v5932_v54, %v5929_v42  ;;  %v13658_v54 = vld [vmem:[%s16203_s9 + $0x18] sm:$0xff]   ;;  %12540 = vmatpush3.bf16.msra.mxu1 %v13657_v58 }
 0x23b   : > { %12541 = vmatprep.subr.bf16.mxu1 %v13658_v54 }
 0x23e   : > { %12542 = vmatpush3.bf16.msra.mxu1 %v13658_v54  ;;  %v13621_v54 = vld [vmem:[#allocation2 + $0x88] sm:$0xff]  }
 0x23f   : > { %12448 = vmatmul.mubr.bf16.vlgmr.msra.gmra.mrb[0].mxu0 %v5889_v38  ;;  %v5948_v38 = vshll.u32 %v13606_v45, 16  ;;  %12543 = vmatprep.subr.bf16.mxu1 %v13659_v20 }
 0x240   : > { %12484 = vmatpush3.bf16.msra.mxu0 %v15259_v35  ;;  %12451 = vmatprep.mubr.bf16.mxu0 %v5898_v5  ;;  %v5916_v35 = vsel %vm5863_vm3, %v5906_v15, %v5915_v51  ;;  %v7675_v5 = vmul.f32 %v13810_v9, %v15302_v17  ;;  %v5941_v15 = vrot.slane %v5939_v28, 3  ;;  %v5966_v28 = vshll.u32 %v13611_v7, 16 }
 0x241   : > { %12485 = vmatprep.subr.bf16.mxu0 %v13593_v52  ;;  %v5950_v6 = vrot.slane %v5948_v38, 3 }
 0x242   : > { %v7718_v59 = vadd.f32 %v15311_v40, %v7675_v5  ;;  %v5942_v51 = vor.u32 %v5941_v15, %v5938_v10  ;;  %v5968_v5 = vrot.slane %v5966_v28, 3  ;;  %v13616_v10 = vld [vmem:[#allocation2 + $0x78] sm:$0xff]   ;;  %12544 = vmatpush3.bf16.msra.mxu1 %v13659_v20  ;;  %v13814_v20 = vld [vmem:[%s13940_s24 + $0x20] sm:$0xff] }
 0x243   : > { %v5951_v25 = vor.u32 %v5950_v6, %v5947_v37  ;;  %v13625_v15 = vld [vmem:[%s16197_s3 + $0x238] sm:$0xff]   ;;  %v13661_v37 = vld [vmem:[%s16203_s9 + $0x30] sm:$0xff]  }
 0x244   : > { %12486 = vmatpush3.bf16.msra.mxu0 %v13593_v52  ;;  %v13811_v52 = vld [vmem:[%s13940_s24 + $0x8] sm:$0xff] }
 0x245   : > { %12487 = vmatprep.subr.bf16.mxu0 %v13598_v12  ;;  %v7676_v4 = vmul.f32 %v13811_v52, %v15302_v17  ;;  %v13612_v52 = vld [vmem:[#allocation2 + $0x70] sm:$0xff]  }
 0x246   : > { %v5975_v7 = vshll.u32 %v13612_v52, 16 }
 0x247   : > { %12452 = vmatmul.mubr.bf16.gmra.mrb[4].mxu0 %v5907_v26  ;;  %v7719_v3 = vadd.f32 %v15311_v40, %v7676_v4  ;;  %v5934_v26 = vsel %vm5863_vm3, %v5924_v11, %v5933_v60  ;;  %v5943_v11 = vsel %vm5863_vm3, %v5933_v60, %v5942_v51  ;;  %v5952_v4 = vsel %vm5863_vm3, %v5942_v51, %v5951_v25  ;;  %v13660_v60 = vld [vmem:[%s16203_s9 + $0x28] sm:$0xff]  }
 0x248   : > { %12455 = vmatprep.mubr.bf16.mxu0 %v5916_v35  ;;  %12488 = vmatpush3.bf16.msra.mxu0 %v13598_v12  ;;  %v13607_v12 = vld [vmem:[#allocation2 + $0x60] sm:$0xff]   ;;  %v13614_v35 = vld [vmem:[%s16197_s3 + $0x228] sm:$0xff]   ;;  %v5977_v51 = vrot.slane %v5975_v7, 3 }
 0x249   : > { %12489 = vmatprep.subr.bf16.mxu0 %v13603_v8  ;;  %v7754_v42 = vpack.c.bf16 %v7719_v3, %v7718_v59  ;;  %v5957_v45 = vshll.u32 %v13607_v12, 16  ;;  %v5981_v59 = vshrl.u32 %v13616_v10, 16  ;;  %v5984_v3 = vshll.u32 %v13616_v10, 16  ;;  %12545 = vmatprep.subr.bf16.mxu1 %v13660_v60 }
 0x24a   : > { %12546 = vmatpush3.bf16.msra.mxu1 %v13660_v60  ;;  %v5999_v10 = vshrl.u32 %v13621_v54, 16 }
 0x24b   : > { %12551 = vmatprep.mubr.bf16.mxu1 %v7754_v42  ;;  %v5959_v9 = vrot.slane %v5957_v45, 3  ;;  %v5986_v45 = vrot.slane %v5984_v3, 3  ;;  %12547 = vmatprep.subr.bf16.mxu1 %v13661_v37 }
 0x24c   : > { %12490 = vmatpush3.bf16.msra.mxu0 %v13603_v8  ;;  %v5954_v8 = vshrl.u32 %v13607_v12, 16  ;;  %v5972_v12 = vshrl.u32 %v13612_v52, 16  ;;  %v13662_v52 = vld [vmem:[%s16203_s9 + $0x38] sm:$0xff]  }
 0x24d   : > { %12491 = vmatprep.subr.bf16.mxu0 %v13608_v29 }
 0x24e   : > { %v5956_v38 = vrot.slane %v5954_v8, 2  ;;  %v5974_v42 = vrot.slane %v5972_v12, 2  ;;  %v5983_v8 = vrot.slane %v5981_v59, 2  ;;  %12548 = vmatpush3.bf16.msra.mxu1 %v13661_v37  ;;  %v13626_v37 = vld [vmem:[#allocation2 + $0x98] sm:$0xff]  }
 0x24f   : > { %12456 = vmatmul.mubr.bf16.gmra.mrb[8].mxu0 %v5925_v57  ;;  %12549 = vmatprep.subr.bf16.mxu1 %v13662_v52 }
 0x250   : > { %12459 = vmatprep.mubr.bf16.mxu0 %v5934_v26  ;;  %12492 = vmatpush3.bf16.msra.mxu0 %v13608_v29  ;;  %v5965_v29 = vrot.slane %v5963_v61, 2  ;;  %v5960_v58 = vor.u32 %v5959_v9, %v5956_v38  ;;  %v13617_v26 = vld [vmem:[#allocation2 + $0x80] sm:$0xff]   ;;  %v13812_v61 = vld [vmem:[%s13940_s24 + $0x10] sm:$0xff]  ;;  %v7679_v38 = vmul.f32 %v13814_v20, %v15302_v17  ;;  %v13815_v9 = vld [vmem:[%s13940_s24 + $0x28] sm:$0xff] }
 0x251   : > { %12493 = vmatprep.subr.bf16.mxu0 %v13614_v35  ;;  %v7677_v28 = vmul.f32 %v13812_v61, %v15302_v17  ;;  %v13816_v61 = vld [vmem:[%s13940_s24 + $0x30] sm:$0xff] }
 0x252   : > { %v5969_v57 = vor.u32 %v5968_v5, %v5965_v29  ;;  %v5961_v6 = vsel %vm5863_vm3, %v5951_v25, %v5960_v58  ;;  %v7680_v25 = vmul.f32 %v13815_v9, %v15302_v17  ;;  %v5990_v29 = vshrl.u32 %v13617_v26, 16  ;;  %12550 = vmatpush3.bf16.msra.mxu1 %v13662_v52 }
 0x253   : > { %v5993_v5 = vshll.u32 %v13617_v26, 16  ;;  %v7720_v60 = vadd.f32 %v15311_v40, %v7677_v28  ;;  %v7722_v7 = vadd.f32 %v15311_v40, %v7679_v38  ;;  %v7681_v28 = vmul.f32 %v13816_v61, %v15302_v17  ;;  %v13818_v38 = vld [vmem:[%s13940_s24 + $0x40] sm:$0xff]  ;;  %v13820_v61 = vld [vmem:[%s13940_s24 + $0x50] sm:$0xff] }
 0x254   : > { %12494 = vmatpush3.bf16.msra.mxu0 %v13614_v35  ;;  %v5970_v35 = vsel %vm5863_vm3, %v5960_v58, %v5969_v57  ;;  %v5987_v58 = vor.u32 %v5986_v45, %v5983_v8  ;;  %v7723_v59 = vadd.f32 %v15311_v40, %v7680_v25  ;;  %v5992_v3 = vrot.slane %v5990_v29, 2  ;;  %v13819_v25 = vld [vmem:[%s13940_s24 + $0x48] sm:$0xff] }
 0x255   : > { %12495 = vmatprep.subr.bf16.mxu0 %v13620_v2  ;;  %v5995_v26 = vrot.slane %v5993_v5, 3  ;;  %v7683_v9 = vmul.f32 %v13818_v38, %v15302_v17  ;;  %v13664_v5 = vld [vmem:[%s16200_s6 + $0x8] sm:$0xff]   ;;  %v6020_v52 = vshll.u32 %v13626_v37, 16 }
 0x256   : > { %v7756_v20 = vpack.c.bf16 %v7723_v59, %v7722_v7 }
 0x257   : > { %12460 = vmatmul.mubr.bf16.gmra.mrb[12].mxu0 %v5943_v11  ;;  %v5996_v29 = vor.u32 %v5995_v26, %v5992_v3  ;;  %v7726_v59 = vadd.f32 %v15311_v40, %v7683_v9  ;;  %v13823_v9 = vld [vmem:[%s13940_s24 + $0x68] sm:$0xff] }
 0x258   : > { %12463 = vmatprep.mubr.bf16.mxu0 %v5952_v4  ;;  %12496 = vmatpush3.bf16.msra.mxu0 %v13620_v2  ;;  %v13813_v2 = vld [vmem:[%s13940_s24 + $0x18] sm:$0xff]  ;;  %v5978_v4 = vor.u32 %v5977_v51, %v5974_v42  ;;  %v6001_v42 = vrot.slane %v5999_v10, 2 }
 0x259   : > { %12497 = vmatprep.subr.bf16.mxu0 %v13625_v15  ;;  %v7678_v11 = vmul.f32 %v13813_v2, %v15302_v17  ;;  %v13817_v2 = vld [vmem:[%s13940_s24 + $0x38] sm:$0xff]  ;;  %v5997_v26 = vsel %vm5863_vm3, %v5987_v58, %v5996_v29 }
 0x25a   : > { %v5988_v8 = vsel %vm5863_vm3, %v5978_v4, %v5987_v58 }
 0x25b   : > { %v7721_v12 = vadd.f32 %v15311_v40, %v7678_v11  ;;  %v7682_v11 = vmul.f32 %v13817_v2, %v15302_v17  ;;  %v13821_v2 = vld [vmem:[%s13940_s24 + $0x58] sm:$0xff] }
 0x25c   : > { %12498 = vmatpush3.bf16.msra.mxu0 %v13625_v15  ;;  %v6002_v15 = vshll.u32 %v13621_v54, 16  ;;  %v13622_v54 = vld [vmem:[#allocation2 + $0x90] sm:$0xff]   ;;  %v7686_v58 = vmul.f32 %v13821_v2, %v15302_v17  ;;  %v13826_v2 = vld [vmem:[%s13940_s24 + $0x80] sm:$0xff] }
 0x25d   : > { %v7755_v45 = vpack.c.bf16 %v7721_v12, %v7720_v60  ;;  %v6008_v10 = vshrl.u32 %v13622_v54, 16  ;;  %v6017_v60 = vshrl.u32 %v13626_v37, 16  ;;  %v7724_v12 = vadd.f32 %v15311_v40, %v7681_v28  ;;  %v13627_v37 = vld [vmem:[#allocation2 + $0xa0] ss:$0 sps:$4 sm:$0x77]  }
 0x25e   : > { %v6004_v51 = vrot.slane %v6002_v15, 3  ;;  %v6011_v15 = vshll.u32 %v13622_v54, 16  ;;  %v7725_v7 = vadd.f32 %v15311_v40, %v7682_v11  ;;  %v7685_v28 = vmul.f32 %v13820_v61, %v15302_v17 }
 0x25f   : > { %12464 = vmatmul.mubr.bf16.gmra.mrb[16].mxu0 %v5961_v6  ;;  %v13663_v6 = vld [vmem:[%s16200_s6] sm:$0xff]   ;;  %12552 = vmatmul.mubr.bf16.vlgmr.msra.gmra.mrb[36].mxu1 %v7755_v45 }
 0x260   : > { %12467 = vmatprep.mubr.bf16.mxu0 %v5970_v35  ;;  %v5979_v35 = vsel %vm5863_vm3, %v5969_v57, %v5978_v4  ;;  %v7684_v57 = vmul.f32 %v13819_v25, %v15302_v17  ;;  %12587 = vmatprep.subr.bf16.mxu1 %v13663_v6  ;;  %v6005_v4 = vor.u32 %v6004_v51, %v6001_v42  ;;  %v6010_v51 = vrot.slane %v6008_v10, 2 }
 0x261   : > { %12588 = vmatpush3.bf16.msra.mxu1 %v13663_v6  ;;  %12555 = vmatprep.mubr.bf16.mxu1 %v7756_v20  ;;  %v6013_v54 = vrot.slane %v6011_v15, 3  ;;  %v6019_v6 = vrot.slane %v6017_v60, 2  ;;  %v7757_v45 = vpack.c.bf16 %v7725_v7, %v7724_v12  ;;  %v13822_v20 = vld [vmem:[%s13940_s24 + $0x60] sm:$0xff]  ;;  %v7688_v25 = vmul.f32 %v13823_v9, %v15302_v17 }
 0x262   : > { %v7727_v3 = vadd.f32 %v15311_v40, %v7684_v57  ;;  %12589 = vmatprep.subr.bf16.mxu1 %v13664_v5  ;;  %v6006_v42 = vsel %vm5863_vm3, %v5996_v29, %v6005_v4  ;;  %v7687_v38 = vmul.f32 %v13822_v20, %v15302_v17  ;;  %v13666_v57 = vld [vmem:[%s16200_s6 + $0x18] sm:$0xff]   ;;  %v6026_v10 = vshrl.u32 %v13627_v37, 16 }
 0x263   : > { %v6014_v29 = vor.u32 %v6013_v54, %v6010_v51  ;;  %v6029_v15 = vshll.u32 %v13627_v37, 16  ;;  %v7731_v7 = vadd.f32 %v15311_v40, %v7688_v25  ;;  %v13630_v54 = vld [vmem:[#allocation2 + $0x10] sm:$0xf8]  }
 0x264   : > { %v7758_v11 = vpack.c.bf16 %v7727_v3, %v7726_v59  ;;  %v7730_v12 = vadd.f32 %v15311_v40, %v7687_v38  ;;  %v13667_v59 = vld [vmem:[%s16200_s6 + $0x20] sm:$0xff]   ;;  %v13824_v37 = vld [vmem:[%s13940_s24 + $0x70] sm:$0xff]  ;;  %v6533_v38 = vrot.slane %v13630_v54, 3 }
 0x265   : > { %12590 = vmatpush3.bf16.msra.mxu1 %v13664_v5  ;;  %v7728_v5 = vadd.f32 %v15311_v40, %v7685_v28  ;;  %v6015_v3 = vsel %vm5863_vm3, %v6005_v4, %v6014_v29 }
 0x266   : > { %v7760_v28 = vpack.c.bf16 %v7731_v7, %v7730_v12  ;;  %v13635_v12 = vld [vmem:[#allocation2 + $0x28] sm:$0xff]  }
 0x267   : > { %12468 = vmatmul.mubr.bf16.gmra.mrb[20].mxu0 %v5979_v35  ;;  %v13665_v35 = vld [vmem:[%s16200_s6 + $0x10] sm:$0xff]   ;;  %12556 = vmatmul.mubr.bf16.gmra.mrb[40].mxu1 %v7757_v45  ;;  %v13825_v45 = vld [vmem:[%s13940_s24 + $0x78] sm:$0xff] }
 0x268   : > { %12471 = vmatprep.mubr.bf16.mxu0 %v5988_v8  ;;  %v6022_v8 = vrot.slane %v6020_v52, 3  ;;  %12591 = vmatprep.subr.bf16.mxu1 %v13665_v35  ;;  %v7729_v52 = vadd.f32 %v15311_v40, %v7686_v58  ;;  %v7690_v61 = vmul.f32 %v13825_v45, %v15302_v17  ;;  %v7691_v58 = vmul.f32 %v13826_v2, %v15302_v17 }
 0x269   : > { %12559 = vmatprep.mubr.bf16.mxu1 %v7758_v11  ;;  %12592 = vmatpush3.bf16.msra.mxu1 %v13665_v35  ;;  %v13827_v11 = vld [vmem:[%s13940_s24 + $0x88] sm:$0xff] }
 0x26a   : > { %v6023_v60 = vor.u32 %v6022_v8, %v6019_v6  ;;  %12593 = vmatprep.subr.bf16.mxu1 %v13666_v57  ;;  %v13631_v6 = vld [vmem:[#allocation2 + $0x18] sm:$0xff]   ;;  %v7759_v35 = vpack.c.bf16 %v7729_v52, %v7728_v5  ;;  %v7689_v8 = vmul.f32 %v13824_v37, %v15302_v17  ;;  %v7692_v4 = vmul.f32 %v13827_v11, %v15302_v17  ;;  %v13632_v5 = vld [vmem:[#allocation2 + $0x20] sm:$0xff]   ;;  %v13831_v37 = vld [vmem:[%s13940_s24 + $0xa8] sm:$0xff] }
 0x26b   : > { %v6534_v9 = vrot.slane %v13631_v6, 3  ;;  %v13830_v6 = vld [vmem:[%s13940_s24 + $0xa0] sm:$0xff]  ;;  %v13636_v11 = vld [vmem:[#allocation2 + $0x30] sm:$0xff]  }
 0x26c   : > { %v6024_v51 = vsel %vm5863_vm3, %v6014_v29, %v6023_v60  ;;  %v7732_v25 = vadd.f32 %v15311_v40, %v7689_v8  ;;  %v7733_v29 = vadd.f32 %v15311_v40, %v7690_v61  ;;  %v6538_v8 = vrot.slane %v13635_v12, 3  ;;  %v13640_v12 = vld [vmem:[#allocation2 + $0x40] sm:$0xff]  }
 0x26d   : > { %12594 = vmatpush3.bf16.msra.mxu1 %v13666_v57  ;;  %v7734_v57 = vadd.f32 %v15311_v40, %v7691_v58  ;;  %v6535_v52 = vsel %vm6532_vm0, %v6533_v38, %v6534_v9 }
 0x26e   : > { %12595 = vmatprep.subr.bf16.mxu1 %v13667_v59  ;;  %v7761_v7 = vpack.c.bf16 %v7733_v29, %v7732_v25  ;;  %v6540_v29 = vrot.slane %v13636_v11, 3 }
 0x26f   : > { %12472 = vmatmul.mubr.bf16.gmra.mrb[24].mxu0 %v5997_v26  ;;  %v6028_v26 = vrot.slane %v6026_v10, 2  ;;  %12560 = vmatmul.mubr.bf16.gmra.mrb[44].mxu1 %v7759_v35  ;;  %v7735_v10 = vadd.f32 %v15311_v40, %v7692_v4  ;;  %v7695_v35 = vmul.f32 %v13830_v6, %v15302_v17 }
 0x270   : > { %12475 = vmatprep.mubr.bf16.mxu0 %v6006_v42  ;;  %v6031_v42 = vrot.slane %v6029_v15, 3  ;;  %12563 = vmatprep.mubr.bf16.mxu1 %v7760_v28 }
 0x271   : > { %12596 = vmatpush3.bf16.msra.mxu1 %v13667_v59  ;;  %v7762_v54 = vpack.c.bf16 %v7735_v10, %v7734_v57  ;;  %v7696_v59 = vmul.f32 %v13831_v37, %v15302_v17  ;;  %v7738_v28 = vadd.f32 %v15311_v40, %v7695_v35  ;;  %v15433_v57 = vpop.f32.mrb[0].mxu1 }
 0x272   : > { %v6032_v20 = vor.u32 %v6031_v42, %v6028_v26  ;;  %v13829_v42 = vld [vmem:[%s13940_s24 + $0x98] sm:$0xff] }
 0x273   : > { %v7739_v2 = vadd.f32 %v15311_v40, %v7696_v59  ;;  %v13644_v59 = vld [vmem:[#allocation2 + $0x50] sm:$0xff]  }
 0x274   : > { %v6033_v15 = vsel %vm5863_vm3, %v6023_v60, %v6032_v20  ;;  %v6536_v60 = vrot.slane %v13632_v5, 3  ;;  %v13639_v20 = vld [vmem:[#allocation2 + $0x38] sm:$0xff]   ;;  %vm16444_vm3 = vnez %v16309_v53 }
 0x275   : > { %v7764_v25 = vpack.c.bf16 %v7739_v2, %v7738_v28  ;;  %v6542_v10 = vrot.slane %v13639_v20, 3  ;;  %v13646_v20 = vld [vmem:[#allocation2 + $0x60] sm:$0xff]  }
 0x276   : > { %v6537_v58 = vsel %vm6532_vm0, %v6534_v9, %v6536_v60  ;;  %v6539_v4 = vsel %vm6532_vm0, %v6536_v60, %v6538_v8  ;;  %v6541_v9 = vsel %vm6532_vm0, %v6538_v8, %v6540_v29  ;;  %v13645_v8 = vld [vmem:[#allocation2 + $0x58] sm:$0xff]  }
 0x277   : > { %12476 = vmatmul.mubr.bf16.gmra.mrb[28].mxu0 %v6015_v3  ;;  %v13828_v3 = vld [vmem:[%s13940_s24 + $0x90] sm:$0xff]  ;;  %12564 = vmatmul.mubr.bf16.gmra.mrb[48].mxu1 %v7761_v7  ;;  %v6543_v7 = vsel %vm6532_vm0, %v6540_v29, %v6542_v10  ;;  %v6550_v28 = vrot.slane %v13645_v8, 3  ;;  %v6552_v29 = vrot.slane %v13646_v20, 3 }
 0x278   : > { %12479 = vmatprep.mubr.bf16.mxu0 %v6024_v51  ;;  %v7693_v26 = vmul.f32 %v13828_v3, %v15302_v17  ;;  %v7694_v51 = vmul.f32 %v13829_v42, %v15302_v17  ;;  %12567 = vmatprep.mubr.bf16.mxu1 %v7762_v54  ;;  %v13643_v3 = vld [vmem:[#allocation2 + $0x48] sm:$0xff]  }
 0x27a   : > { %v7736_v45 = vadd.f32 %v15311_v40, %v7693_v26  ;;  %v7737_v61 = vadd.f32 %v15311_v40, %v7694_v51  ;;  %v6544_v26 = vrot.slane %v13640_v12, 3  ;;  %v6546_v51 = vrot.slane %v13643_v3, 3 }
 0x27c   : > { %v7763_v38 = vpack.c.bf16 %v7737_v61, %v7736_v45  ;;  %v6545_v37 = vsel %vm6532_vm0, %v6542_v10, %v6544_v26  ;;  %v6547_v60 = vsel %vm6532_vm0, %v6544_v26, %v6546_v51  ;;  %v6548_v45 = vrot.slane %v13644_v59, 3  ;;  %v13649_v59 = vld [vmem:[#allocation2 + $0x78] sm:$0xff]  }
 0x27d   : > { %v6553_v26 = vsel %vm6532_vm0, %v6550_v28, %v6552_v29  ;;  %v6558_v8 = vrot.slane %v13649_v59, 3 }
 0x27f   : > { %12480 = vmatmul.mubr.bf16.gmra.mrb[32].mxu0 %v6033_v15  ;;  %v15435_v15 = vpop.f32.mrb[1].mxu1  ;;  %12568 = vmatmul.mubr.bf16.gmra.mrb[52].mxu1 %v7763_v38  ;;  %v6551_v38 = vsel %vm6532_vm0, %v6548_v45, %v6550_v28 }
 0x280   : > { %12499 = vmatprep.mubr.bf16.mxu0 %v6535_v52  ;;  %v15437_v5 = vpop.f32.mrb[2].mxu1  ;;  %12571 = vmatprep.mubr.bf16.mxu1 %v7764_v25  ;;  %v13647_v25 = vld [vmem:[#allocation2 + $0x68] sm:$0xff]  }
 0x281   : > { %v15439_v52 = vpop.f32.mrb[3].mxu1 }
 0x282   : > { %v15443_v42 = vpop.f32.mrb[4].mxu1 }
 0x283   : > { %v15445_v54 = vpop.f32.mrb[5].mxu1 }
 0x284   : > { %v15447_v6 = vpop.f32.mrb[6].mxu1 }
 0x285   : > { %v15449_v35 = vpop.f32.mrb[7].mxu1 }
 0x287   : > { %12500 = vmatmul.mubr.bf16.vlgmr.msra.gmra.mrb[0].mxu0 %v6537_v58 }
 0x288   : > { %12503 = vmatprep.mubr.bf16.mxu0 %v6539_v4  ;;  %v15453_v61 = vpop.f32.mrb[8].mxu1  ;;  %v6549_v4 = vsel %vm6532_vm0, %v6546_v51, %v6548_v45 }
 0x289   : > { %v15455_v2 = vpop.f32.mrb[9].mxu1 }
 0x28a   : > { %v15457_v58 = vpop.f32.mrb[10].mxu1 }
 0x28b   : > { %v15459_v11 = vpop.f32.mrb[11].mxu1 }
 0x28f   : > { %12504 = vmatmul.mubr.bf16.gmra.mrb[4].mxu0 %v6541_v9  ;;  %v6554_v9 = vrot.slane %v13647_v25, 3 }
 0x290   : > { %12507 = vmatprep.mubr.bf16.mxu0 %v6543_v7 }
 0x291   : > { %v15463_v10 = vpop.f32.mrb[12].mxu1  ;;  %v6555_v51 = vsel %vm6532_vm0, %v6552_v29, %v6554_v9 }
 0x292   : > { %v15465_v12 = vpop.f32.mrb[13].mxu1 }
 0x293   : > { %v15467_v7 = vpop.f32.mrb[14].mxu1 }
 0x294   : > { %v15469_v3 = vpop.f32.mrb[15].mxu1 }
 0x297   : > { %12508 = vmatmul.mubr.bf16.gmra.mrb[8].mxu0 %v6545_v37  ;;  %v13648_v37 = vld [vmem:[#allocation2 + $0x70] sm:$0xff]  }
 0x298   : > { %12511 = vmatprep.mubr.bf16.mxu0 %v6547_v60  ;;  %v6556_v60 = vrot.slane %v13648_v37, 3 }
 0x29a   : > { %v6557_v45 = vsel %vm6532_vm0, %v6554_v9, %v6556_v60  ;;  %v6559_v20 = vsel %vm6532_vm0, %v6556_v60, %v6558_v8  ;;  %v6566_v9 = vrot.slane %v13653_v62, 3 }
 0x29f   : > { %12512 = vmatmul.mubr.bf16.gmra.mrb[12].mxu0 %v6549_v4  ;;  %v13650_v4 = vld [vmem:[#allocation2 + $0x80] sm:$0xff]  }
 0x2a0   : > { %12515 = vmatprep.mubr.bf16.mxu0 %v6551_v38  ;;  %v13651_v38 = vld [vmem:[#allocation2 + $0x88] sm:$0xff]   ;;  %v6560_v25 = vrot.slane %v13650_v4, 3 }
 0x2a1   : > { %v6562_v30 = vrot.slane %v13651_v38, 3  ;;  %v13833_v38 = vld [vmem:[%s13940_s24 + $0xb8] sm:$0xff] }
 0x2a2   : > { %v6561_v28 = vsel %vm6532_vm0, %v6558_v8, %v6560_v25 }
 0x2a3   : > { %v6563_v29 = vsel %vm6532_vm0, %v6560_v25, %v6562_v30  ;;  %v7698_v25 = vmul.f32 %v13833_v38, %v15302_v17 }
 0x2a7   : > { %12516 = vmatmul.mubr.bf16.gmra.mrb[16].mxu0 %v6553_v26  ;;  %v6564_v26 = vrot.slane %v13652_v50, 3 }
 0x2a8   : > { %12519 = vmatprep.mubr.bf16.mxu0 %v6555_v51  ;;  %v13654_v51 = vld [vmem:[#allocation2 + $0xa0] ss:$0 sps:$4 sm:$0x77]  }
 0x2a9   : > { %v6565_v37 = vsel %vm6532_vm0, %v6562_v30, %v6564_v26  ;;  %v6567_v59 = vsel %vm6532_vm0, %v6564_v26, %v6566_v9  ;;  %v6568_v60 = vrot.slane %v13654_v51, 3  ;;  %v13832_v30 = vld [vmem:[%s13940_s24 + $0xb0] sm:$0xff] }
 0x2ab   : > { %v6569_v8 = vsel %vm6532_vm0, %v6566_v9, %v6568_v60 }
 0x2af   : > { %12520 = vmatmul.mubr.bf16.gmra.mrb[20].mxu0 %v6557_v45 }
 0x2b0   : > { %12523 = vmatprep.mubr.bf16.mxu0 %v6559_v20  ;;  %v7697_v20 = vmul.f32 %v13832_v30, %v15302_v17 }
 0x2b7   : > { %12524 = vmatmul.mubr.bf16.gmra.mrb[24].mxu0 %v6561_v28  ;;  %v7740_v28 = vadd.f32 %v15311_v40, %v7697_v20 }
 0x2b8   : > { %12527 = vmatprep.mubr.bf16.mxu0 %v6563_v29  ;;  %v7741_v29 = vadd.f32 %v15311_v40, %v7698_v25 }
 0x2ba   : > { %v7765_v26 = vpack.c.bf16 %v7741_v29, %v7740_v28  ;;  %v13836_v28 = vld [vmem:[%s13940_s24 + $0xd0] sm:$0xff] }
 0x2bb   : > { %v7701_v29 = vmul.f32 %v13836_v28, %v15302_v17  ;;  %v7081_v28 = vld [vmem:[#allocation3 + $0x8] sm:$0x3] }
 0x2bc   : > { %12572 = vmatmul.mubr.bf16.gmra.mrb[56].mxu1 %v7765_v26  ;;  %v7702_v26 = vmul.f32 %v13837_v63, %v15302_v17  ;;  %v7082_v63 = vsel %vm13967_vm2, 0, %v7081_v28 }
 0x2bd   : > { %7083 = vst [vmem:[#allocation3 + $0x8] sm:$0x3] %v7082_v63 }
 0x2be   : > { %v7745_v49 = vadd.f32 %v15311_v40, %v7702_v26  ;;  %v13840_v26 = vld [vmem:[%s13940_s24 + $0xf0] sm:$0xff] }
 0x2bf   : > { %12528 = vmatmul.mubr.bf16.gmra.mrb[28].mxu0 %v6565_v37 }
 0x2c0   : > { %12531 = vmatprep.mubr.bf16.mxu0 %v6567_v59  ;;  %v13834_v59 = vld [vmem:[%s13940_s24 + $0xc0] sm:$0xff] }
 0x2c1   : > { %v15480_v45 = vpop.f32.mrb[16].mxu1  ;;  %v7699_v60 = vmul.f32 %v13834_v59, %v15302_v17  ;;  %v7744_v59 = vadd.f32 %v15311_v40, %v7701_v29 }
 0x2c2   : > { %v15482_v4 = vpop.f32.mrb[17].mxu1 }
 0x2c3   : > { %v15484_v50 = vpop.f32.mrb[18].mxu1  ;;  %v7742_v20 = vadd.f32 %v15311_v40, %v7699_v60  ;;  %v7767_v60 = vpack.c.bf16 %v7745_v49, %v7744_v59  ;;  %v7705_v59 = vmul.f32 %v13840_v26, %v15302_v17 }
 0x2c4   : > { %v15486_v62 = vpop.f32.mrb[19].mxu1 }
 0x2c7   : > { %12532 = vmatmul.mubr.bf16.gmra.mrb[32].mxu0 %v6569_v8  ;;  %v13835_v8 = vld [vmem:[%s13940_s24 + $0xc8] sm:$0xff] }
 0x2c8   : > { %v7700_v30 = vmul.f32 %v13835_v8, %v15302_v17 }
 0x2ca   : > { %v7743_v25 = vadd.f32 %v15311_v40, %v7700_v30 }
 0x2cc   : > { %v7766_v19 = vpack.c.bf16 %v7743_v25, %v7742_v20  ;;  %v13668_v20 = vld [vmem:[%s16200_s6 + $0x28] sm:$0xff]   ;;  %v13838_v25 = vld [vmem:[%s13940_s24 + $0xe0] sm:$0xff] }
 0x2cd   : > { %v7703_v49 = vmul.f32 %v13838_v25, %v15302_v17  ;;  %12597 = vmatprep.subr.bf16.mxu1 %v13668_v20  ;;  %v7748_v25 = vadd.f32 %v15311_v40, %v7705_v59 }
 0x2ce   : > { %12575 = vmatprep.mubr.bf16.mxu1 %v7766_v19  ;;  %v13839_v19 = vld [vmem:[%s13940_s24 + $0xe8] sm:$0xff]  ;;  %12598 = vmatpush3.bf16.msra.mxu1 %v13668_v20 }
 0x2cf   : > { %v15494_v9 = vpop.f32.mrb[20].mxu1  ;;  %12576 = vmatmul.mubr.bf16.gmra.mrb[60].mxu1 %v7767_v60  ;;  %v7704_v29 = vmul.f32 %v13839_v19, %v15302_v17  ;;  %v13841_v60 = vld [vmem:[%s13940_s24 + $0xf8] sm:$0xff]  ;;  %v7746_v28 = vadd.f32 %v15311_v40, %v7703_v49  ;;  %v13842_v49 = vld [vmem:[%s13940_s24 + $0x100] sm:$0xff] }
 0x2d0   : > { %v15496_v37 = vpop.f32.mrb[21].mxu1  ;;  %v7706_v18 = vmul.f32 %v13841_v60, %v15302_v17 }
 0x2d1   : > { %v15498_v51 = vpop.f32.mrb[22].mxu1  ;;  %v7747_v63 = vadd.f32 %v15311_v40, %v7704_v29  ;;  %v7707_v29 = vmul.f32 %v13842_v49, %v15302_v17 }
 0x2d2   : > { %16423 = vst [vmem:[#allocation23_spill] sm:$0xff] %v15498_v51  ;;  %v15504_v38 = vpop.f32.mrb[23].mxu1  ;;  %v7749_v19 = vadd.f32 %v15311_v40, %v7706_v18  ;;  %v7709_v18 = vmul.f32 %v13844_v46, %v15302_v17 }
 0x2d3   : > { %16424 = vst [vmem:[#allocation24_spill] sm:$0xff] %v15504_v38  ;;  %v7627_v38 = vld [vmem:[#allocation3 + $0x8] sm:$0xe] }
 0x2d4   : > { %v7769_v26 = vpack.c.bf16 %v7749_v19, %v7748_v25  ;;  %v7750_v25 = vadd.f32 %v15311_v40, %v7707_v29  ;;  %v13669_v19 = vld [vmem:[%s16200_s6 + $0x30] sm:$0xff]  }
 0x2d5   : > { %12599 = vmatprep.subr.bf16.mxu1 %v13669_v19 }
 0x2d6   : > { %12600 = vmatpush3.bf16.msra.mxu1 %v13669_v19 }
 0x2da   : > { %v15514_v8 = vpop.f32.mrb[24].mxu1 }
 0x2db   : > { %16425 = vst [vmem:[#allocation25_spill] sm:$0xff] %v15514_v8  ;;  %v15516_v30 = vpop.f32.mrb[25].mxu1  ;;  %v13843_v8 = vld [vmem:[%s13940_s24 + $0x108] sm:$0xff] }
 0x2dc   : > { %16426 = vst [vmem:[#allocation26_spill] sm:$0xff] %v15516_v30  ;;  %v15518_v16 = vpop.f32.mrb[26].mxu1  ;;  %v7708_v59 = vmul.f32 %v13843_v8, %v15302_v17 }
 0x2dd   : > { %16427 = vst [vmem:[#allocation27_spill] sm:$0xff] %v15518_v16  ;;  %v15520_v23 = vpop.f32.mrb[27].mxu1 }
 0x2de   : > { %16428 = vst [vmem:[#allocation28_spill] sm:$0xff] %v15520_v23  ;;  %v7768_v23 = vpack.c.bf16 %v7747_v63, %v7746_v28  ;;  %v13845_v28 = vld [vmem:[%s13940_s24 + $0x118] sm:$0xff] }
 0x2df   : > { %v7710_v63 = vmul.f32 %v13845_v28, %v15302_v17  ;;  %v15582_v28 = vld [vmem:[%s16198_s4] ss:$0 sm:$0xff] }
 0x2e0   : > { %12579 = vmatprep.mubr.bf16.mxu1 %v7768_v23  ;;  %v7751_v23 = vadd.f32 %v15311_v40, %v7708_v59  ;;  %v13670_v59 = vld [vmem:[%s16200_s6 + $0x38] sm:$0xff]  }
 0x2e1   : > { %12580 = vmatmul.mubr.bf16.gmra.mrb[64].mxu1 %v7769_v26  ;;  %v7752_v26 = vadd.f32 %v15311_v40, %v7709_v18  ;;  %v7753_v49 = vadd.f32 %v15311_v40, %v7710_v63  ;;  %12601 = vmatprep.subr.bf16.mxu1 %v13670_v59  ;;  %v13671_v40 = vld [vmem:[#allocation3] sm:$0xff]  }
 0x2e2   : > { %v15539_v16 = vpop.f32.mrb[28].mxu1  ;;  %12602 = vmatpush3.bf16.msra.mxu1 %v13670_v59  ;;  %v15576_v18 = vld [vmem:[%s16200_s6 + $0x40] sm:$0xff]  }
 0x2e3   : > { %16429 = vst [vmem:[#allocation29_spill] sm:$0xff] %v15539_v16  ;;  %v15541_v30 = vpop.f32.mrb[29].mxu1  ;;  %v7771_v46 = vpack.c.bf16 %v7753_v49, %v7752_v26  ;;  %12639 = vmatprep.subr.bf16.mxu1 %v15576_v18 }
 0x2e4   : > { %16430 = vst [vmem:[#allocation30_spill] sm:$0xff] %v15541_v30  ;;  %v15543_v60 = vpop.f32.mrb[30].mxu1 }
 0x2e5   : > { %16431 = vst [vmem:[#allocation31_spill] sm:$0xff] %v15543_v60  ;;  %v15545_v20 = vpop.f32.mrb[31].mxu1 }
 0x2e6   : > { %16432 = vst [vmem:[#allocation32_spill] sm:$0xff] %v15545_v20  ;;  %v7770_v20 = vpack.c.bf16 %v7751_v23, %v7750_v25  ;;  %v15588_v23 = vld [vmem:[%s16199_s5] ss:$0 sm:$0xff] }
 0x2e8   : > { %12583 = vmatprep.mubr.bf16.mxu1 %v7770_v20 }
 0x2e9   : > { %12584 = vmatmul.mubr.bf16.gmra.mrb[68].mxu1 %v7771_v46 }
 0x2ea   : > { %v15562_v8 = vpop.f32.mrb[32].mxu1  ;;  %12603 = vmatprep.mubr.bf16.mxu1 %v13671_v40 }
 0x2eb   : > { %16433 = vst [vmem:[#allocation33_spill] sm:$0xff] %v15562_v8  ;;  %v15564_v60 = vpop.f32.mrb[33].mxu1 }
 0x2ec   : > { %16434 = vst [vmem:[#allocation34_spill] sm:$0xff] %v15564_v60  ;;  %v15566_v17 = vpop.f32.mrb[34].mxu1 }
 0x2ed   : > { %16435 = vst [vmem:[#allocation35_spill] sm:$0xff] %v15566_v17  ;;  %v15568_v29 = vpop.f32.mrb[35].mxu1 }
 0x2ee   : > { %16436 = vst [vmem:[#allocation36_spill] sm:$0xff] %v15568_v29 }
 0x35a   : > { %v12501_v20 = vpop.f32.mrb[0].mxu0 }
 0x35b   : > { %v12863_v63 = vadd.f32 %v12501_v20, %v15433_v57  ;;  %v6670_v25 = vpop.f32.mrb[1].mxu0 }
 0x35c   : > { %v12864_v19 = vadd.f32 %v6670_v25, %v15435_v15  ;;  %v12502_v26 = vpop.f32.mrb[2].mxu0 }
 0x35d   : > { %v6966_v49 = vmul.f32 %v12863_v63, %v15582_v28  ;;  %v12865_v46 = vadd.f32 %v12502_v26, %v15437_v5  ;;  %v6673_v59 = vpop.f32.mrb[3].mxu0 }
 0x35e   : > { %v6964_v40 = vmul.f32 %v12864_v19, %v15582_v28  ;;  %v12866_v29 = vadd.f32 %v6673_v59, %v15439_v52 }
 0x35f   : > { %v7009_v57 = vadd.f32 %v15588_v23, %v6966_v49  ;;  %v6967_v20 = vmul.f32 %v12865_v46, %v15582_v28 }
 0x360   : > { %v7007_v17 = vadd.f32 %v15588_v23, %v6964_v40  ;;  %v6965_v60 = vmul.f32 %v12866_v29, %v15582_v28 }
 0x361   : > { %v7045_v8 = vmax.f32 %v7009_v57, 0.0  ;;  %v7010_v15 = vadd.f32 %v15588_v23, %v6967_v20 }
 0x362   : > { %v7043_v25 = vmax.f32 %v7007_v17, 0.0  ;;  %v7008_v63 = vadd.f32 %v15588_v23, %v6965_v60  ;;  %v12505_v5 = vpop.f32.mrb[4].mxu0 }
 0x363   : > { %v7089_v19 = vsel %vm14060_vm9, %v7045_v8, 0.0  ;;  %v7046_v26 = vmax.f32 %v7010_v15, 0.0  ;;  %v12867_v52 = vadd.f32 %v12505_v5, %v15443_v42  ;;  %v6686_v49 = vpop.f32.mrb[5].mxu0  ;;  %vm16440_vm9 = vnez %v16294_v22  ;;  %v13679_v22 = vld [vmem:[%s16200_s6 + $0x50] sm:$0xff]  }
 0x364   : > { %v11643_v59 = vpack.c.bf16 %v7089_v19, %v7089_v19  ;;  %v7087_v46 = vsel %vm14023_vm12, %v7043_v25, 0.0  ;;  %v7044_v40 = vmax.f32 %v7008_v63, 0.0  ;;  %v12868_v29 = vadd.f32 %v6686_v49, %v15445_v54  ;;  %v12506_v57 = vpop.f32.mrb[6].mxu0 }
 0x365   : > { %v11641_v20 = vpack.c.bf16 %v7087_v46, %v7087_v46  ;;  %v7090_v60 = vsel %vm14068_vm10, %v7046_v26, 0.0  ;;  %v6970_v17 = vmul.f32 %v12867_v52, %v15582_v28  ;;  %v12869_v34 = vadd.f32 %v12506_v57, %v15447_v6  ;;  %v6689_v8 = vpop.f32.mrb[7].mxu0 }
 0x366   : > { %v7251_v15 = vshrl.u32 %v11643_v59, 16  ;;  %v7254_v42 = vshll.u32 %v11643_v59, 16  ;;  %v11644_v5 = vpack.c.bf16 %v7090_v60, %v7090_v60  ;;  %v7088_v0 = vsel %vm14027_vm13, %v7044_v40, 0.0 }
 0x367   : > { %v7232_v25 = vshrl.u32 %v11641_v20, 16  ;;  %v7235_v63 = vshll.u32 %v11641_v20, 16  ;;  %v11642_v19 = vpack.c.bf16 %v7088_v0, %v7088_v0  ;;  %v7013_v54 = vadd.f32 %v15588_v23, %v6970_v17 }
 0x368   : > { %v7253_v49 = vrot.slane %v7251_v15, 6  ;;  %v7256_v46 = vrot.slane %v7254_v42, 7  ;;  %v7261_v39 = vshrl.u32 %v11644_v5, 16  ;;  %v7264_v26 = vshll.u32 %v11644_v5, 16 }
 0x369   : > { %v7234_v30 = vrot.slane %v7232_v25, 6  ;;  %v7237_v52 = vrot.slane %v7235_v63, 7  ;;  %v7241_v16 = vshrl.u32 %v11642_v19, 16  ;;  %v7244_v6 = vshll.u32 %v11642_v19, 16 }
 0x36a   : > { %v7257_v57 = vor.u32 %v7256_v46, %v7253_v49  ;;  %v7263_v59 = vrot.slane %v7261_v39, 6  ;;  %v7266_v60 = vrot.slane %v7264_v26, 7  ;;  %v7049_v55 = vmax.f32 %v7013_v54, 0.0  ;;  %v12509_v1 = vpop.f32.mrb[8].mxu0 }
 0x36b   : > { %v7238_v40 = vor.u32 %v7237_v52, %v7234_v30  ;;  %v7243_v51 = vrot.slane %v7241_v16, 6  ;;  %v7246_v20 = vrot.slane %v7244_v6, 7  ;;  %v6968_v0 = vmul.f32 %v12868_v29, %v15582_v28  ;;  %v6702_v17 = vpop.f32.mrb[9].mxu0 }
 0x36c   : > { %v7259_v15 = vrot.slane %v7257_v57, 4  ;;  %v15615_v42 = vor.u32 %v7266_v60, %v7263_v59  ;;  %v7093_v5 = vsel %vm14175_vm8, %v7049_v55, 0.0  ;;  %v6971_v25 = vmul.f32 %v12869_v34, %v15582_v28  ;;  %v12510_v63 = vpop.f32.mrb[10].mxu0 }
 0x36d   : > { %v7239_v19 = vrot.slane %v7238_v40, 4  ;;  %v7628_v54 = vsel %vm14056_vm6, %v7238_v40, %v7627_v38  ;;  %v7247_v49 = vor.u32 %v7246_v20, %v7243_v51  ;;  %v11647_v30 = vpack.c.bf16 %v7093_v5, %v7093_v5  ;;  %v6705_v16 = vpop.f32.mrb[11].mxu0 }
 0x36e   : > { %7629 = vst [vmem:[#allocation3 + $0x8] sm:$0xe] %v7628_v54  ;;  %v7268_v29 = vsel %vm14076_vm7, %v7259_v15, %v15615_v42  ;;  %v7269_v46 = vrot.slane %v15615_v42, 4  ;;  %v7011_v33 = vadd.f32 %v15588_v23, %v6968_v0  ;;  %v7014_v55 = vadd.f32 %v15588_v23, %v6971_v25 }
 0x36f   : > { %7632 = vst [vmem:[#allocation3 + $0x14] sm:$0xf] %v7268_v29  ;;  %v7248_v34 = vsel %vm14076_vm7, %v7239_v19, %v7247_v49  ;;  %v7249_v31 = vrot.slane %v7247_v49, 4  ;;  %v7291_v38 = vshrl.u32 %v11647_v30, 16  ;;  %v7294_v51 = vshll.u32 %v11647_v30, 16 }
 0x370   : > { %7630 = vst [vmem:[#allocation3 + $0xc] sm:$0xf] %v7248_v34  ;;  %v7047_v39 = vmax.f32 %v7011_v33, 0.0  ;;  %v7050_v26 = vmax.f32 %v7014_v55, 0.0  ;;  %v12870_v52 = vadd.f32 %v6689_v8, %v15449_v35  ;;  %v12871_v6 = vadd.f32 %v12509_v1, %v15453_v61 }
 0x371   : > { %v7258_v59 = vsel %vm14076_vm7, %v7249_v31, %v7257_v57  ;;  %v7293_v60 = vrot.slane %v7291_v38, 6  ;;  %v7296_v40 = vrot.slane %v7294_v51, 7  ;;  %v12872_v20 = vadd.f32 %v6702_v17, %v15455_v2 }
 0x372   : > { %7631 = vst [vmem:[#allocation3 + $0x10] sm:$0xf] %v7258_v59  ;;  %vm16437_vm12 = vnez %v16273_v36  ;;  %vm16438_vm13 = vnez %v16281_v44  ;;  %v6969_v5 = vmul.f32 %v12870_v52, %v15582_v28  ;;  %v6974_v35 = vmul.f32 %v12871_v6, %v15582_v28  ;;  %v12513_v8 = vpop.f32.mrb[12].mxu0 }
 0x373   : > { %v7091_v0 = vsel %vm16437_vm12, %v7047_v39, 0.0  ;;  %v7094_v15 = vsel %vm16438_vm13, %v7050_v26, 0.0  ;;  %v15641_v61 = vor.u32 %v7296_v40, %v7293_v60  ;;  %v6972_v25 = vmul.f32 %v12872_v20, %v15582_v28  ;;  %v15644_v19 = vpop.f32.mrb[13].mxu0 }
 0x374   : > { %v11645_v1 = vpack.c.bf16 %v7091_v0, %v7091_v0  ;;  %v11648_v57 = vpack.c.bf16 %v7094_v15, %v7094_v15  ;;  %v7012_v2 = vadd.f32 %v15588_v23, %v6969_v5  ;;  %v7017_v36 = vadd.f32 %v15588_v23, %v6974_v35  ;;  %v15650_v54 = vpop.f32.mrb[14].mxu0 }
 0x375   : > { %v12873_v44 = vadd.f32 %v12510_v63, %v15457_v58  ;;  %v12874_v17 = vadd.f32 %v6705_v16, %v15459_v11  ;;  %v7299_v49 = vrot.slane %v15641_v61, 4  ;;  %v15653_v55 = vpop.f32.mrb[15].mxu0  ;;  %v7015_v51 = vadd.f32 %v15588_v23, %v6972_v25  ;;  %v13676_v58 = vld [vmem:[%s16200_s6 + $0x48] sm:$0xff]  }
 0x376   : > { %v7271_v30 = vshrl.u32 %v11645_v1, 16  ;;  %v7274_v29 = vshll.u32 %v11645_v1, 16  ;;  %v7301_v33 = vshrl.u32 %v11648_v57, 16  ;;  %v7304_v34 = vshll.u32 %v11648_v57, 16 }
 0x377   : > { %v7048_v31 = vmax.f32 %v7012_v2, 0.0  ;;  %v7053_v38 = vmax.f32 %v7017_v36, 0.0  ;;  %v6975_v39 = vmul.f32 %v12873_v44, %v15582_v28  ;;  %v13673_v26 = vld [vmem:[#allocation3 + $0x8] sm:$0xff]   ;;  %vm16439_vm6 = vnez %v16275_v43 }
 0x378   : > { %v7273_v63 = vrot.slane %v7271_v30, 6  ;;  %v7276_v11 = vrot.slane %v7274_v29, 7  ;;  %v7303_v16 = vrot.slane %v7301_v33, 6  ;;  %v7306_v52 = vrot.slane %v7304_v34, 7  ;;  %12604 = vmatmul.mubr.bf16.vlgmr.msra.gmra.mrb[36].mxu1 %v13673_v26 }
 0x379   : > { %v7092_v6 = vsel %vm16439_vm6, %v7048_v31, 0.0  ;;  %v7097_v59 = vsel %vm16440_vm9, %v7053_v38, 0.0  ;;  %v7051_v60 = vmax.f32 %v7015_v51, 0.0  ;;  %v7018_v15 = vadd.f32 %v15588_v23, %v6975_v39  ;;  %v13674_v5 = vld [vmem:[#allocation3 + $0x10] sm:$0xff]   ;;  %12640 = vmatpush3.bf16.msra.mxu1 %v15576_v18 }
 0x37a   : > { %v7277_v40 = vor.u32 %v7276_v11, %v7273_v63  ;;  %v11646_v20 = vpack.c.bf16 %v7092_v6, %v7092_v6  ;;  %v11651_v0 = vpack.c.bf16 %v7097_v59, %v7097_v59  ;;  %v15665_v35 = vor.u32 %v7306_v52, %v7303_v16  ;;  %v15671_v25 = vpop.f32.mrb[16].mxu0  ;;  %12607 = vmatprep.mubr.bf16.mxu1 %v13674_v5  ;;  %v13683_v52 = vld [vmem:[%s16200_s6 + $0x58] sm:$0xff]  }
 0x37b   : > { %vm16441_vm10 = vnez %v16286_v24  ;;  %v6973_v57 = vmul.f32 %v12874_v17, %v15582_v28  ;;  %v12875_v43 = vadd.f32 %v12513_v8, %v15463_v10  ;;  %v15681_v30 = vpop.f32.mrb[17].mxu0  ;;  %12641 = vmatprep.subr.bf16.mxu1 %v13676_v58  ;;  %v7054_v34 = vmax.f32 %v7018_v15, 0.0 }
 0x37c   : > { %v7095_v1 = vsel %vm16441_vm10, %v7051_v60, 0.0  ;;  %v7278_v2 = vsel %vm14076_vm7, %v7269_v46, %v7277_v40  ;;  %v7279_v36 = vrot.slane %v7277_v40, 4  ;;  %v7281_v24 = vshrl.u32 %v11646_v20, 16  ;;  %v15687_v42 = vpop.f32.mrb[18].mxu0 }
 0x37d   : > { %v7284_v44 = vshll.u32 %v11646_v20, 16  ;;  %7633 = vst [vmem:[#allocation3 + $0x18] sm:$0xf] %v7278_v2  ;;  %v7308_v10 = vsel %vm14076_vm7, %v7299_v49, %v15665_v35  ;;  %v7309_v18 = vrot.slane %v15665_v35, 4  ;;  %v7331_v8 = vshrl.u32 %v11651_v0, 16  ;;  %v15689_v31 = vpop.f32.mrb[19].mxu0  ;;  %12642 = vmatpush3.bf16.msra.mxu1 %v13676_v58 }
 0x37e   : > { %v7334_v17 = vshll.u32 %v11651_v0, 16  ;;  %7636 = vst [vmem:[#allocation3 + $0x24] sm:$0xf] %v7308_v10  ;;  %v7283_v46 = vrot.slane %v7281_v24, 6  ;;  %v11649_v33 = vpack.c.bf16 %v7095_v1, %v7095_v1  ;;  %v7016_v63 = vadd.f32 %v15588_v23, %v6973_v57  ;;  %12643 = vmatprep.subr.bf16.mxu1 %v13679_v22 }
 0x37f   : > { %v7286_v29 = vrot.slane %v7284_v44, 7  ;;  %v7333_v38 = vrot.slane %v7331_v8, 6  ;;  %v6978_v11 = vmul.f32 %v12875_v43, %v15582_v28  ;;  %vm16442_vm8 = vnez %v16297_v32  ;;  %v13686_v43 = vld [vmem:[%s16200_s6 + $0x60] sm:$0xff]  }
 0x380   : > { %v7336_v51 = vrot.slane %v7334_v17, 7  ;;  %v7311_v16 = vshrl.u32 %v11649_v33, 16  ;;  %v7314_v39 = vshll.u32 %v11649_v33, 16  ;;  %v7098_v26 = vsel %vm16442_vm8, %v7054_v34, 0.0 }
 0x381   : > { %v7287_v49 = vor.u32 %v7286_v29, %v7283_v46  ;;  %v11652_v59 = vpack.c.bf16 %v7098_v26, %v7098_v26  ;;  %v7052_v60 = vmax.f32 %v7016_v63, 0.0  ;;  %v7021_v40 = vadd.f32 %v15588_v23, %v6978_v11  ;;  %12644 = vmatpush3.bf16.msra.mxu1 %v13679_v22 }
 0x382   : > { %v15698_v6 = vor.u32 %v7336_v51, %v7333_v38  ;;  %v7313_v0 = vrot.slane %v7311_v16, 6  ;;  %v7316_v15 = vrot.slane %v7314_v39, 7  ;;  %v15706_v57 = vpop.f32.mrb[20].mxu0  ;;  %12645 = vmatprep.subr.bf16.mxu1 %v13683_v52  ;;  %v12876_v22 = vadd.f32 %v15644_v19, %v15465_v12  ;;  %v13689_v19 = vld [vmem:[%s16200_s6 + $0x68] sm:$0xff]  }
 0x383   : > { %v7288_v58 = vsel %vm14076_vm7, %v7279_v36, %v7287_v49  ;;  %v7289_v20 = vrot.slane %v7287_v49, 4  ;;  %v7341_v5 = vshrl.u32 %v11652_v59, 16  ;;  %v7344_v35 = vshll.u32 %v11652_v59, 16  ;;  %v15714_v10 = vpop.f32.mrb[21].mxu0 }
 0x384   : > { %7634 = vst [vmem:[#allocation3 + $0x1c] sm:$0xf] %v7288_v58  ;;  %v7339_v32 = vrot.slane %v15698_v6, 4  ;;  %v7096_v1 = vsel %vm16443_vm5, %v7052_v60, 0.0  ;;  %v7317_v36 = vor.u32 %v7316_v15, %v7313_v0  ;;  %v7057_v44 = vmax.f32 %v7021_v40, 0.0  ;;  %v15720_v46 = vpop.f32.mrb[22].mxu0 }
 0x385   : > { %v7298_v2 = vsel %vm14076_vm7, %v7289_v20, %v15641_v61  ;;  %v11650_v24 = vpack.c.bf16 %v7096_v1, %v7096_v1  ;;  %v7343_v56 = vrot.slane %v7341_v5, 6  ;;  %v7346_v8 = vrot.slane %v7344_v35, 7  ;;  %v15724_v38 = vpop.f32.mrb[23].mxu0  ;;  %12646 = vmatpush3.bf16.msra.mxu1 %v13683_v52 }
 0x386   : > { %7635 = vst [vmem:[#allocation3 + $0x20] sm:$0xf] %v7298_v2  ;;  %v12877_v17 = vadd.f32 %v15650_v54, %v15467_v7  ;;  %v7318_v61 = vsel %vm14076_vm7, %v7309_v18, %v7317_v36  ;;  %v7319_v29 = vrot.slane %v7317_v36, 4  ;;  %v7101_v63 = vsel %vm16444_vm3, %v7057_v44, 0.0  ;;  %12647 = vmatprep.subr.bf16.mxu1 %v13686_v43 }
 0x387   : > { %v7321_v33 = vshrl.u32 %v11650_v24, 16  ;;  %v7324_v34 = vshll.u32 %v11650_v24, 16  ;;  %7637 = vst [vmem:[#allocation3 + $0x28] sm:$0xf] %v7318_v61  ;;  %v15726_v51 = vor.u32 %v7346_v8, %v7343_v56  ;;  %v6976_v12 = vmul.f32 %v12876_v22, %v15582_v28 }
 0x388   : > { %v6979_v7 = vmul.f32 %v12877_v17, %v15582_v28  ;;  %v11655_v11 = vpack.c.bf16 %v7101_v63, %v7101_v63  ;;  %v12878_v49 = vadd.f32 %v15653_v55, %v15469_v3  ;;  %v12879_v55 = vadd.f32 %v15671_v25, %v15480_v45 }
 0x389   : > { %v7323_v54 = vrot.slane %v7321_v33, 6  ;;  %v7326_v18 = vrot.slane %v7324_v34, 7  ;;  %v7348_v53 = vsel %vm14076_vm7, %v7339_v32, %v15726_v51  ;;  %v7349_v16 = vrot.slane %v15726_v51, 4  ;;  %12648 = vmatpush3.bf16.msra.mxu1 %v13686_v43  ;;  %v13692_v32 = vld [vmem:[%s16200_s6 + $0x70] sm:$0xff]  }
 0x38a   : > { %v7019_v39 = vadd.f32 %v15588_v23, %v6976_v12  ;;  %v7022_v26 = vadd.f32 %v15588_v23, %v6979_v7  ;;  %7640 = vst [vmem:[#allocation3 + $0x34] sm:$0xf] %v7348_v53  ;;  %v7371_v59 = vshrl.u32 %v11655_v11, 16  ;;  %v7374_v60 = vshll.u32 %v11655_v11, 16  ;;  %v15748_v15 = vpop.f32.mrb[24].mxu0  ;;  %12649 = vmatprep.subr.bf16.mxu1 %v13689_v19  ;;  %v13695_v12 = vld [vmem:[%s16200_s6 + $0x78] sm:$0xff]  }
 0x38b   : > { %v7327_v52 = vor.u32 %v7326_v18, %v7323_v54  ;;  %v6977_v40 = vmul.f32 %v12878_v49, %v15582_v28  ;;  %v13675_v58 = vld [vmem:[#allocation3 + $0x18] sm:$0xff]   ;;  %v12880_v0 = vadd.f32 %v15681_v30, %v15482_v4  ;;  %vm16445_vm12 = vnez %v16300_v27  ;;  %v15761_v43 = vpop.f32.mrb[25].mxu0 }
 0x38c   : > { %v7055_v20 = vmax.f32 %v7019_v39, 0.0  ;;  %v7058_v3 = vmax.f32 %v7022_v26, 0.0  ;;  %v7373_v1 = vrot.slane %v7371_v59, 6  ;;  %v7376_v2 = vrot.slane %v7374_v60, 7  ;;  %12608 = vmatmul.mubr.bf16.gmra.mrb[40].mxu1 %v13675_v58  ;;  %v15768_v27 = vpop.f32.mrb[26].mxu0  ;;  %v15786_v53 = vld [vmem:[%s16200_s6 + $0x80] sm:$0xff]  }
 0x38d   : > { %v7328_v5 = vsel %vm14076_vm7, %v7319_v29, %v7327_v52  ;;  %v7329_v35 = vrot.slane %v7327_v52, 4  ;;  %v13677_v36 = vld [vmem:[#allocation3 + $0x20] sm:$0xff]   ;;  %vm16446_vm13 = vnez %v16311_v21  ;;  %v7020_v25 = vadd.f32 %v15588_v23, %v6977_v40  ;;  %v15774_v29 = vpop.f32.mrb[27].mxu0  ;;  %12650 = vmatpush3.bf16.msra.mxu1 %v13689_v19 }
 0x38e   : > { %7638 = vst [vmem:[#allocation3 + $0x2c] sm:$0xf] %v7328_v5  ;;  %v7099_v45 = vsel %vm16445_vm12, %v7055_v20, 0.0  ;;  %v7102_v4 = vsel %vm16446_vm13, %v7058_v3, 0.0  ;;  %v6982_v30 = vmul.f32 %v12879_v55, %v15582_v28  ;;  %v15766_v44 = vor.u32 %v7376_v2, %v7373_v1  ;;  %12611 = vmatprep.mubr.bf16.mxu1 %v13677_v36  ;;  %12651 = vmatprep.subr.bf16.mxu1 %v13692_v32 }
 0x38f   : > { %v7338_v24 = vsel %vm14076_vm7, %v7329_v35, %v15698_v6  ;;  %v11653_v56 = vpack.c.bf16 %v7099_v45, %v7099_v45  ;;  %v11656_v8 = vpack.c.bf16 %v7102_v4, %v7102_v4  ;;  %v7056_v21 = vmax.f32 %v7020_v25, 0.0 }
 0x390   : > { %7639 = vst [vmem:[#allocation3 + $0x30] sm:$0xf] %v7338_v24  ;;  %v7025_v22 = vadd.f32 %v15588_v23, %v6982_v30  ;;  %v6980_v17 = vmul.f32 %v12880_v0, %v15582_v28  ;;  %v12881_v61 = vadd.f32 %v15687_v42, %v15484_v50  ;;  %v7379_v6 = vrot.slane %v15766_v44, 4 }
 0x391   : > { %v7351_v33 = vshrl.u32 %v11653_v56, 16  ;;  %v7354_v34 = vshll.u32 %v11653_v56, 16  ;;  %v7381_v63 = vshrl.u32 %v11656_v8, 16  ;;  %v7384_v7 = vshll.u32 %v11656_v8, 16  ;;  %12652 = vmatpush3.bf16.msra.mxu1 %v13692_v32 }
 0x392   : > { %vm16447_vm6 = vnez %v16302_v13  ;;  %v7061_v18 = vmax.f32 %v7025_v22, 0.0  ;;  %v7023_v50 = vadd.f32 %v15588_v23, %v6980_v17  ;;  %v6983_v13 = vmul.f32 %v12881_v61, %v15582_v28  ;;  %v15791_v59 = vpop.f32.mrb[28].mxu0  ;;  %12653 = vmatprep.subr.bf16.mxu1 %v13695_v12 }
 0x393   : > { %v7100_v54 = vsel %vm16447_vm6, %v7056_v21, 0.0  ;;  %v7353_v42 = vrot.slane %v7351_v33, 6  ;;  %v7356_v11 = vrot.slane %v7354_v34, 7  ;;  %v7383_v19 = vrot.slane %v7381_v63, 6  ;;  %v15793_v55 = vpop.f32.mrb[29].mxu0 }
 0x394   : > { %v11654_v49 = vpack.c.bf16 %v7100_v54, %v7100_v54  ;;  %v7386_v39 = vrot.slane %v7384_v7, 7  ;;  %v7105_v26 = vsel %vm14585_vm4, %v7061_v18, 0.0  ;;  %v7059_v52 = vmax.f32 %v7023_v50, 0.0  ;;  %v15800_v1 = vpop.f32.mrb[30].mxu0 }
 0x395   : > { %v7357_v60 = vor.u32 %v7356_v11, %v7353_v42  ;;  %v11659_v20 = vpack.c.bf16 %v7105_v26, %v7105_v26  ;;  %v13678_v3 = vld [vmem:[#allocation3 + $0x28] sm:$0xff]   ;;  %vm16448_vm9 = vnez %v16321_v48  ;;  %v7026_v14 = vadd.f32 %v15588_v23, %v6983_v13  ;;  %12654 = vmatpush3.bf16.msra.mxu1 %v13695_v12  ;;  %v16450_v13 = vld [vmem:[#allocation23_spill] sm:$0xff] }
 0x396   : > { %v7361_v40 = vshrl.u32 %v11654_v49, 16  ;;  %v7364_v58 = vshll.u32 %v11654_v49, 16  ;;  %v7387_v0 = vor.u32 %v7386_v39, %v7383_v19  ;;  %v7103_v5 = vsel %vm16448_vm9, %v7059_v52, 0.0  ;;  %12612 = vmatmul.mubr.bf16.gmra.mrb[44].mxu1 %v13678_v3  ;;  %12691 = vmatprep.subr.bf16.mxu1 %v15786_v53 }
 0x397   : > { %v12882_v35 = vadd.f32 %v15689_v31, %v15486_v62  ;;  %v7358_v32 = vsel %vm14076_vm7, %v7349_v16, %v7357_v60  ;;  %v7359_v2 = vrot.slane %v7357_v60, 4  ;;  %v13680_v4 = vld [vmem:[#allocation3 + $0x30] sm:$0xff]   ;;  %v7411_v30 = vshrl.u32 %v11659_v20, 16  ;;  %v15808_v62 = vpop.f32.mrb[31].mxu0 }
 0x398   : > { %v7363_v36 = vrot.slane %v7361_v40, 6  ;;  %v7366_v45 = vrot.slane %v7364_v58, 7  ;;  %7641 = vst [vmem:[#allocation3 + $0x38] sm:$0xf] %v7358_v32  ;;  %v7388_v48 = vsel %vm14076_vm7, %v7379_v6, %v7387_v0  ;;  %v7389_v25 = vrot.slane %v7387_v0, 4  ;;  %12615 = vmatprep.mubr.bf16.mxu1 %v13680_v4  ;;  %v16451_v40 = vld [vmem:[#allocation6_spill] sm:$0xff] }
 0x399   : > { %v7414_v24 = vshll.u32 %v11659_v20, 16  ;;  %7644 = vst [vmem:[#allocation3 + $0x44] sm:$0xf] %v7388_v48  ;;  %v11657_v51 = vpack.c.bf16 %v7103_v5, %v7103_v5  ;;  %v7062_v56 = vmax.f32 %v7026_v14, 0.0  ;;  %v6981_v16 = vmul.f32 %v12882_v35, %v15582_v28  ;;  %v16453_v0 = vld [vmem:[#allocation24_spill] sm:$0xff] }
 0x39a   : > { %v7367_v31 = vor.u32 %v7366_v45, %v7363_v36  ;;  %v7413_v8 = vrot.slane %v7411_v30, 6  ;;  %v12883_v22 = vadd.f32 %v15706_v57, %v15494_v9  ;;  %v12884_v17 = vadd.f32 %v15714_v10, %v15496_v37  ;;  %v15824_v9 = vpop.f32.mrb[32].mxu0 }
 0x39b   : > { %v7416_v21 = vrot.slane %v7414_v24, 7  ;;  %v7391_v33 = vshrl.u32 %v11657_v51, 16  ;;  %v7394_v34 = vshll.u32 %v11657_v51, 16  ;;  %vm16449_vm4 = vnez %v16332_v47  ;;  %v15829_v50 = vpop.f32.mrb[33].mxu0  ;;  %v16456_v51 = vld [vmem:[#allocation25_spill] sm:$0xff] }
 0x39c   : > { %v7368_v61 = vsel %vm14076_vm7, %v7359_v2, %v7367_v31  ;;  %v7369_v6 = vrot.slane %v7367_v31, 4  ;;  %v7106_v12 = vsel %vm16449_vm4, %v7062_v56, 0.0  ;;  %v7024_v7 = vadd.f32 %v15588_v23, %v6981_v16  ;;  %v15834_v49 = vpop.f32.mrb[34].mxu0 }
 0x39d   : > { %7642 = vst [vmem:[#allocation3 + $0x3c] sm:$0xf] %v7368_v61  ;;  %v15818_v63 = vor.u32 %v7416_v21, %v7413_v8  ;;  %v6986_v54 = vmul.f32 %v12883_v22, %v15582_v28  ;;  %v7393_v57 = vrot.slane %v7391_v33, 6  ;;  %v7396_v10 = vrot.slane %v7394_v34, 7  ;;  %v15838_v60 = vpop.f32.mrb[35].mxu0  ;;  %v16457_v8 = vld [vmem:[#allocation7_spill] sm:$0xff] }
 0x39e   : > { %v7378_v37 = vsel %vm14076_vm7, %v7369_v6, %v15766_v44  ;;  %v11660_v18 = vpack.c.bf16 %v7106_v12, %v7106_v12  ;;  %v7060_v47 = vmax.f32 %v7024_v7, 0.0  ;;  %v6984_v19 = vmul.f32 %v12884_v17, %v15582_v28 }
 0x39f   : > { %7643 = vst [vmem:[#allocation3 + $0x40] sm:$0xf] %v7378_v37  ;;  %v7419_v42 = vrot.slane %v15818_v63, 4  ;;  %v7029_v11 = vadd.f32 %v15588_v23, %v6986_v54  ;;  %v7397_v39 = vor.u32 %v7396_v10, %v7393_v57  ;;  %v12885_v44 = vadd.f32 %v15720_v46, %v16450_v13  ;;  %v16454_v46 = vld [vmem:[#allocation9_spill] sm:$0xff] }
 0x3a0   : > { %v7421_v26 = vshrl.u32 %v11660_v18, 16  ;;  %v7424_v52 = vshll.u32 %v11660_v18, 16  ;;  %vm16452_vm10 = vnez %v16451_v40  ;;  %v7027_v3 = vadd.f32 %v15588_v23, %v6984_v19  ;;  %v16459_v19 = vld [vmem:[#allocation10_spill] sm:$0xff] }
 0x3a1   : > { %v7104_v58 = vsel %vm16452_vm10, %v7060_v47, 0.0  ;;  %v7065_v20 = vmax.f32 %v7029_v11, 0.0  ;;  %v12886_v5 = vadd.f32 %v15724_v38, %v16453_v0  ;;  %v7398_v14 = vsel %vm14076_vm7, %v7389_v25, %v7397_v39 }
 0x3a2   : > { %v7399_v35 = vrot.slane %v7397_v39, 4  ;;  %v7423_v32 = vrot.slane %v7421_v26, 6  ;;  %v7426_v2 = vrot.slane %v7424_v52, 7  ;;  %7645 = vst [vmem:[#allocation3 + $0x48] sm:$0xf] %v7398_v14  ;;  %v11658_v36 = vpack.c.bf16 %v7104_v58, %v7104_v58 }
 0x3a3   : > { %vm16455_vm8 = vnez %v16454_v46  ;;  %v7063_v4 = vmax.f32 %v7027_v3, 0.0  ;;  %v6987_v48 = vmul.f32 %v12885_v44, %v15582_v28  ;;  %v6985_v31 = vmul.f32 %v12886_v5, %v15582_v28 }
 0x3a4   : > { %v7109_v45 = vsel %vm16455_vm8, %v7065_v20, 0.0  ;;  %v7427_v30 = vor.u32 %v7426_v2, %v7423_v32  ;;  %v12887_v38 = vadd.f32 %v15748_v15, %v16456_v51  ;;  %v13681_v56 = vld [vmem:[#allocation3 + $0x38] sm:$0xff]   ;;  %v7401_v25 = vshrl.u32 %v11658_v36, 16 }
 0x3a5   : > { %v11663_v24 = vpack.c.bf16 %v7109_v45, %v7109_v45  ;;  %v7404_v16 = vshll.u32 %v11658_v36, 16  ;;  %vm16458_vm5 = vnez %v16457_v8  ;;  %v7030_v22 = vadd.f32 %v15588_v23, %v6987_v48  ;;  %12616 = vmatmul.mubr.bf16.gmra.mrb[48].mxu1 %v13681_v56  ;;  %v16461_v32 = vld [vmem:[#allocation8_spill] sm:$0xff]  ;;  %v16465_v8 = vld [vmem:[#allocation13_spill] sm:$0xff] }
 0x3a6   : > { %v7107_v21 = vsel %vm16458_vm5, %v7063_v4, 0.0  ;;  %v7428_v17 = vsel %vm14076_vm7, %v7419_v42, %v7427_v30  ;;  %v7429_v61 = vrot.slane %v7427_v30, 4  ;;  %v13682_v34 = vld [vmem:[#allocation3 + $0x40] sm:$0xff]   ;;  %v7403_v12 = vrot.slane %v7401_v25, 6  ;;  %v16463_v30 = vld [vmem:[#allocation26_spill] sm:$0xff] }
 0x3a7   : > { %v7451_v6 = vshrl.u32 %v11663_v24, 16  ;;  %v7454_v33 = vshll.u32 %v11663_v24, 16  ;;  %7648 = vst [vmem:[#allocation3 + $0x54] sm:$0xf] %v7428_v17  ;;  %v7406_v7 = vrot.slane %v7404_v16, 7  ;;  %v11661_v15 = vpack.c.bf16 %v7107_v21, %v7107_v21  ;;  %12619 = vmatprep.mubr.bf16.mxu1 %v13682_v34 }
 0x3a8   : > { %v7066_v54 = vmax.f32 %v7030_v22, 0.0  ;;  %v7028_v10 = vadd.f32 %v15588_v23, %v6985_v31  ;;  %v6990_v18 = vmul.f32 %v12887_v38, %v15582_v28  ;;  %vm16460_vm3 = vnez %v16459_v19  ;;  %v16464_v31 = vld [vmem:[#allocation27_spill] sm:$0xff]  ;;  %v16469_v19 = vld [vmem:[#allocation30_spill] sm:$0xff] }
 0x3a9   : > { %v7453_v37 = vrot.slane %v7451_v6, 6  ;;  %v7456_v57 = vrot.slane %v7454_v33, 7  ;;  %v7407_v47 = vor.u32 %v7406_v7, %v7403_v12  ;;  %v7431_v11 = vshrl.u32 %v11661_v15, 16 }
 0x3aa   : > { %v7434_v42 = vshll.u32 %v11661_v15, 16  ;;  %v7110_v39 = vsel %vm16460_vm3, %v7066_v54, 0.0  ;;  %v7064_v13 = vmax.f32 %v7028_v10, 0.0  ;;  %v7033_v44 = vadd.f32 %v15588_v23, %v6990_v18 }
 0x3ab   : > { %v15862_v26 = vor.u32 %v7456_v57, %v7453_v37  ;;  %v11664_v52 = vpack.c.bf16 %v7110_v39, %v7110_v39  ;;  %v7408_v40 = vsel %vm14076_vm7, %v7399_v35, %v7407_v47  ;;  %v7409_v58 = vrot.slane %v7407_v47, 4 }
 0x3ac   : > { %v7433_v20 = vrot.slane %v7431_v11, 6  ;;  %v7436_v3 = vrot.slane %v7434_v42, 7  ;;  %7646 = vst [vmem:[#allocation3 + $0x4c] sm:$0xf] %v7408_v40  ;;  %vm16462_vm12 = vnez %v16461_v32  ;;  %v7069_v4 = vmax.f32 %v7033_v44, 0.0 }
 0x3ad   : > { %v7459_v0 = vrot.slane %v15862_v26, 4  ;;  %v7461_v5 = vshrl.u32 %v11664_v52, 16  ;;  %v7464_v14 = vshll.u32 %v11664_v52, 16  ;;  %v7108_v2 = vsel %vm16462_vm12, %v7064_v13, 0.0 }
 0x3ae   : > { %v7418_v36 = vsel %vm14076_vm7, %v7409_v58, %v15818_v63  ;;  %v7437_v46 = vor.u32 %v7436_v3, %v7433_v20  ;;  %v11662_v45 = vpack.c.bf16 %v7108_v2, %v7108_v2  ;;  %v12888_v24 = vadd.f32 %v15761_v43, %v16463_v30  ;;  %v16470_v58 = vld [vmem:[#allocation11_spill] sm:$0xff]  ;;  %v16472_v20 = vld [vmem:[#allocation14_spill] sm:$0xff] }
 0x3af   : > { %7647 = vst [vmem:[#allocation3 + $0x50] sm:$0xf] %v7418_v36  ;;  %v7463_v35 = vrot.slane %v7461_v5, 6  ;;  %v7466_v48 = vrot.slane %v7464_v14, 7  ;;  %v12889_v51 = vadd.f32 %v15768_v27, %v16464_v31  ;;  %vm16466_vm13 = vnez %v16465_v8  ;;  %v16467_v27 = vld [vmem:[#allocation28_spill] sm:$0xff] }
 0x3b0   : > { %v7438_v38 = vsel %vm14076_vm7, %v7429_v61, %v7437_v46  ;;  %v7439_v56 = vrot.slane %v7437_v46, 4  ;;  %v7441_v25 = vshrl.u32 %v11662_v45, 16  ;;  %v7444_v16 = vshll.u32 %v11662_v45, 16 }
 0x3b1   : > { %7649 = vst [vmem:[#allocation3 + $0x58] sm:$0xf] %v7438_v38  ;;  %v15879_v63 = vor.u32 %v7466_v48, %v7463_v35  ;;  %v7113_v21 = vsel %vm16466_vm13, %v7069_v4, 0.0  ;;  %v6988_v22 = vmul.f32 %v12888_v24, %v15582_v28  ;;  %v6991_v17 = vmul.f32 %v12889_v51, %v15582_v28  ;;  %v16474_v35 = vld [vmem:[#allocation31_spill] sm:$0xff]  ;;  %v16475_v38 = vld [vmem:[#allocation12_spill] sm:$0xff] }
 0x3b2   : > { %v7443_v43 = vrot.slane %v7441_v25, 6  ;;  %v7446_v6 = vrot.slane %v7444_v16, 7  ;;  %v11667_v33 = vpack.c.bf16 %v7113_v21, %v7113_v21  ;;  %v12890_v34 = vadd.f32 %v15774_v29, %v16467_v27  ;;  %v16468_v29 = vld [vmem:[#allocation29_spill] sm:$0xff] }
 0x3b3   : > { %v7468_v61 = vsel %vm14076_vm7, %v7459_v0, %v15879_v63  ;;  %v7469_v12 = vrot.slane %v15879_v63, 4  ;;  %v7031_v7 = vadd.f32 %v15588_v23, %v6988_v22  ;;  %v7034_v15 = vadd.f32 %v15588_v23, %v6991_v17  ;;  %v13684_v18 = vld [vmem:[#allocation3 + $0x48] sm:$0xff]   ;;  %v15913_v0 = vld [vmem:[%s16198_s4] ss:$0 sm:$0xff] }
 0x3b4   : > { %7652 = vst [vmem:[#allocation3 + $0x64] sm:$0xf] %v7468_v61  ;;  %v7447_v54 = vor.u32 %v7446_v6, %v7443_v43  ;;  %v7491_v37 = vshrl.u32 %v11667_v33, 16  ;;  %v7494_v57 = vshll.u32 %v11667_v33, 16  ;;  %v6989_v10 = vmul.f32 %v12890_v34, %v15582_v28  ;;  %12620 = vmatmul.mubr.bf16.gmra.mrb[52].mxu1 %v13684_v18  ;;  %v16480_v18 = vld [vmem:[#allocation32_spill] sm:$0xff] }
 0x3b5   : > { %v7067_v47 = vmax.f32 %v7031_v7, 0.0  ;;  %v7070_v11 = vmax.f32 %v7034_v15, 0.0  ;;  %v12891_v42 = vadd.f32 %v15791_v59, %v16468_v29  ;;  %v12892_v39 = vadd.f32 %v15793_v55, %v16469_v19  ;;  %v15907_v59 = vld [vmem:[%s16199_s5] ss:$0 sm:$0xff] }
 0x3b6   : > { %v7448_v52 = vsel %vm14076_vm7, %v7439_v56, %v7447_v54  ;;  %v7449_v13 = vrot.slane %v7447_v54, 4  ;;  %v7493_v23 = vrot.slane %v7491_v37, 6  ;;  %v7496_v44 = vrot.slane %v7494_v57, 7  ;;  %v13685_v40 = vld [vmem:[#allocation3 + $0x50] sm:$0xff]  }
 0x3b7   : > { %7650 = vst [vmem:[#allocation3 + $0x5c] sm:$0xf] %v7448_v52  ;;  %vm16471_vm6 = vnez %v16470_v58  ;;  %vm16473_vm9 = vnez %v16472_v20  ;;  %v7032_v55 = vadd.f32 %v15907_v59, %v6989_v10  ;;  %v6994_v5 = vmul.f32 %v15913_v0, %v12891_v42  ;;  %12623 = vmatprep.mubr.bf16.mxu1 %v13685_v40  ;;  %v16478_v37 = vld [vmem:[#allocation15_spill] sm:$0xff]  ;;  %v16481_v20 = vld [vmem:[#allocation33_spill] sm:$0xff] }
 0x3b8   : > { %v7111_v28 = vsel %vm16471_vm6, %v7067_v47, 0.0  ;;  %v7114_v3 = vsel %vm16473_vm9, %v7070_v11, 0.0  ;;  %v7458_v14 = vsel %vm14076_vm7, %v7449_v13, %v15862_v26  ;;  %v15919_v32 = vor.u32 %v7496_v44, %v7493_v23 }
 0x3b9   : > { %v11665_v2 = vpack.c.bf16 %v7111_v28, %v7111_v28  ;;  %v11668_v36 = vpack.c.bf16 %v7114_v3, %v7114_v3  ;;  %7651 = vst [vmem:[#allocation3 + $0x60] sm:$0xf] %v7458_v14  ;;  %v7068_v46 = vmax.f32 %v7032_v55, 0.0  ;;  %v7037_v45 = vadd.f32 %v15907_v59, %v6994_v5  ;;  %v16482_v55 = vld [vmem:[#allocation34_spill] sm:$0xff] }
 0x3ba   : > { %v6992_v4 = vmul.f32 %v15913_v0, %v12892_v39  ;;  %v12893_v48 = vadd.f32 %v15800_v1, %v16474_v35  ;;  %v7499_v30 = vrot.slane %v15919_v32, 4  ;;  %vm16476_vm4 = vnez %v16475_v38 }
 0x3bb   : > { %v7471_v24 = vshrl.u32 %v11665_v2, 16  ;;  %v7474_v31 = vshll.u32 %v11665_v2, 16  ;;  %v7501_v51 = vshrl.u32 %v11668_v36, 16  ;;  %v7504_v26 = vshll.u32 %v11668_v36, 16 }
 0x3bc   : > { %v7112_v56 = vsel %vm16476_vm4, %v7068_v46, 0.0  ;;  %v7073_v25 = vmax.f32 %v7037_v45, 0.0  ;;  %v7035_v16 = vadd.f32 %v15907_v59, %v6992_v4  ;;  %v6995_v33 = vmul.f32 %v15913_v0, %v12893_v48  ;;  %v16483_v4 = vld [vmem:[#allocation18_spill] sm:$0xff] }
 0x3bd   : > { %v7473_v63 = vrot.slane %v7471_v24, 6  ;;  %v7476_v8 = vrot.slane %v7474_v31, 7  ;;  %v7503_v21 = vrot.slane %v7501_v51, 6  ;;  %v11666_v22 = vpack.c.bf16 %v7112_v56, %v7112_v56 }
 0x3be   : > { %v7506_v17 = vrot.slane %v7504_v26, 7  ;;  %v7117_v1 = vsel %vm14942_vm15, %v7073_v25, 0.0  ;;  %v7071_v6 = vmax.f32 %v7035_v16, 0.0  ;;  %v13687_v15 = vld [vmem:[#allocation3 + $0x58] sm:$0xff]   ;;  %vm16479_vm10 = vnez %v16478_v37 }
 0x3bf   : > { %v7477_v27 = vor.u32 %v7476_v8, %v7473_v63  ;;  %v7481_v34 = vshrl.u32 %v11666_v22, 16  ;;  %v7484_v61 = vshll.u32 %v11666_v22, 16  ;;  %v11671_v7 = vpack.c.bf16 %v7117_v1, %v7117_v1  ;;  %12624 = vmatmul.mubr.bf16.gmra.mrb[56].mxu1 %v13687_v15  ;;  %v16485_v8 = vld [vmem:[#allocation35_spill] sm:$0xff]  ;;  %v16486_v22 = vld [vmem:[#allocation16_spill] sm:$0xff]  ;;  %v16489_v15 = vld [vmem:[#allocation21_spill] sm:$0xff] }
 0x3c0   : > { %v7507_v54 = vor.u32 %v7506_v17, %v7503_v21  ;;  %v7115_v57 = vsel %vm16479_vm10, %v7071_v6, 0.0  ;;  %v7038_v10 = vadd.f32 %v15907_v59, %v6995_v33  ;;  %v12894_v47 = vadd.f32 %v15808_v62, %v16480_v18  ;;  %v13688_v39 = vld [vmem:[#allocation3 + $0x60] sm:$0xff]  }
 0x3c1   : > { %v7478_v11 = vsel %vm14076_vm7, %v7469_v12, %v7477_v27  ;;  %v7479_v29 = vrot.slane %v7477_v27, 4  ;;  %v7483_v42 = vrot.slane %v7481_v34, 6  ;;  %v7486_v19 = vrot.slane %v7484_v61, 7  ;;  %12627 = vmatprep.mubr.bf16.mxu1 %v13688_v39  ;;  %v16488_v1 = vld [vmem:[#allocation36_spill] sm:$0xff] }
 0x3c2   : > { %7653 = vst [vmem:[#allocation3 + $0x68] sm:$0xf] %v7478_v11  ;;  %v7508_v52 = vsel %vm14076_vm7, %v7499_v30, %v7507_v54  ;;  %v7531_v13 = vshrl.u32 %v11671_v7, 16  ;;  %v7534_v23 = vshll.u32 %v11671_v7, 16  ;;  %v11669_v40 = vpack.c.bf16 %v7115_v57, %v7115_v57 }
 0x3c3   : > { %7656 = vst [vmem:[#allocation3 + $0x74] sm:$0xf] %v7508_v52  ;;  %v7487_v44 = vor.u32 %v7486_v19, %v7483_v42  ;;  %v7074_v58 = vmax.f32 %v7038_v10, 0.0  ;;  %v6993_v62 = vmul.f32 %v15913_v0, %v12894_v47  ;;  %v12895_v3 = vadd.f32 %v15824_v9, %v16481_v20 }
 0x3c4   : > { %v7533_v28 = vrot.slane %v7531_v13, 6  ;;  %v7536_v12 = vrot.slane %v7534_v23, 7  ;;  %v12896_v5 = vadd.f32 %v15829_v50, %v16482_v55  ;;  %v7511_v36 = vshrl.u32 %v11669_v40, 16 }
 0x3c5   : > { %v7488_v14 = vsel %vm14076_vm7, %v7479_v29, %v7487_v44  ;;  %v7489_v2 = vrot.slane %v7487_v44, 4  ;;  %v7514_v46 = vshll.u32 %v11669_v40, 16  ;;  %vm16484_vm15 = vnez %v16483_v4  ;;  %v16491_v29 = vld [vmem:[#allocation19_spill] sm:$0xff] }
 0x3c6   : > { %7654 = vst [vmem:[#allocation3 + $0x6c] sm:$0xf] %v7488_v14  ;;  %v15948_v45 = vor.u32 %v7536_v12, %v7533_v28  ;;  %v7118_v35 = vsel %vm16484_vm15, %v7074_v58, 0.0  ;;  %v7036_v48 = vadd.f32 %v15907_v59, %v6993_v62  ;;  %v6998_v30 = vmul.f32 %v15913_v0, %v12895_v3  ;;  %v13716_v14 = vld [vmem:[%s16200_s6 + $0xa8] sm:$0xff]  }
 0x3c7   : > { %v7498_v9 = vsel %vm14076_vm7, %v7489_v2, %v15919_v32  ;;  %v7513_v50 = vrot.slane %v7511_v36, 6  ;;  %v7516_v24 = vrot.slane %v7514_v46, 7  ;;  %v11672_v31 = vpack.c.bf16 %v7118_v35, %v7118_v35 }
 0x3c8   : > { %v7509_v51 = vrot.slane %v7507_v54, 4  ;;  %7655 = vst [vmem:[#allocation3 + $0x70] sm:$0xf] %v7498_v9  ;;  %v7072_v26 = vmax.f32 %v7036_v48, 0.0  ;;  %v7041_v38 = vadd.f32 %v15907_v59, %v6998_v30  ;;  %v6996_v56 = vmul.f32 %v15913_v0, %v12896_v5 }
 0x3c9   : > { %v7517_v25 = vor.u32 %v7516_v24, %v7513_v50  ;;  %v7541_v16 = vshrl.u32 %v11672_v31, 16  ;;  %v7544_v63 = vshll.u32 %v11672_v31, 16  ;;  %v12897_v21 = vadd.f32 %v15834_v49, %v16485_v8 }
 0x3ca   : > { %vm16487_vm8 = vnez %v16486_v22  ;;  %v7077_v32 = vmax.f32 %v7041_v38, 0.0  ;;  %v7039_v43 = vadd.f32 %v15907_v59, %v6996_v56  ;;  %v12898_v6 = vadd.f32 %v15838_v60, %v16488_v1 }
 0x3cb   : > { %v7116_v17 = vsel %vm16487_vm8, %v7072_v26, 0.0  ;;  %v7539_v33 = vrot.slane %v15948_v45, 4  ;;  %v7518_v27 = vsel %vm14076_vm7, %v7509_v51, %v7517_v25  ;;  %v7543_v34 = vrot.slane %v7541_v16, 6 }
 0x3cc   : > { %v7546_v61 = vrot.slane %v7544_v63, 7  ;;  %7657 = vst [vmem:[#allocation3 + $0x78] sm:$0xf] %v7518_v27  ;;  %v11670_v7 = vpack.c.bf16 %v7116_v17, %v7116_v17  ;;  %vm16490_vm5 = vnez %v16489_v15  ;;  %v7075_v54 = vmax.f32 %v7039_v43, 0.0 }
 0x3cd   : > { %v7121_v49 = vsel %vm16490_vm5, %v7077_v32, 0.0  ;;  %v6999_v37 = vmul.f32 %v15913_v0, %v12897_v21  ;;  %v6997_v18 = vmul.f32 %v15913_v0, %v12898_v6  ;;  %v13690_v60 = vld [vmem:[#allocation3 + $0x68] sm:$0xff]   ;;  %vm16492_vm3 = vnez %v16491_v29  ;;  %v7665_v32 = vld [vmem:[#allocation3 + $0x98] sm:$0x3] }
 0x3ce   : > { %v7547_v57 = vor.u32 %v7546_v61, %v7543_v34  ;;  %v11675_v10 = vpack.c.bf16 %v7121_v49, %v7121_v49  ;;  %v7521_v47 = vshrl.u32 %v11670_v7, 16  ;;  %v7524_v11 = vshll.u32 %v11670_v7, 16  ;;  %12628 = vmatmul.mubr.bf16.gmra.mrb[60].mxu1 %v13690_v60  ;;  %v13725_v61 = vld [vmem:[#allocation3 + $0x10] sm:$0xff]  }
 0x3cf   : > { %v7119_v42 = vsel %vm16492_vm3, %v7075_v54, 0.0  ;;  %v7042_v19 = vadd.f32 %v15907_v59, %v6999_v37  ;;  %v7519_v39 = vrot.slane %v7517_v25, 4  ;;  %v13691_v44 = vld [vmem:[#allocation3 + $0x70] sm:$0xff]   ;;  %v7040_v20 = vadd.f32 %v15907_v59, %v6997_v18  ;;  %v16494_v59 = vld [vmem:[#allocation20_spill] sm:$0xff] }
 0x3d0   : > { %v7548_v52 = vsel %vm14076_vm7, %v7539_v33, %v7547_v57  ;;  %v7571_v13 = vshrl.u32 %v11675_v10, 16  ;;  %v7574_v23 = vshll.u32 %v11675_v10, 16  ;;  %v7523_v40 = vrot.slane %v7521_v47, 6  ;;  %12631 = vmatprep.mubr.bf16.mxu1 %v13691_v44  ;;  %v13697_v37 = vld [vmem:[#allocation3] sm:$0xfe]   ;;  %v13698_v10 = vld [vmem:[#allocation3 + $0x8] sm:$0xff]  }
 0x3d1   : > { %7660 = vst [vmem:[#allocation3 + $0x84] sm:$0xf] %v7548_v52  ;;  %v7526_v58 = vrot.slane %v7524_v11, 7  ;;  %v11673_v0 = vpack.c.bf16 %v7119_v42, %v7119_v42  ;;  %v7078_v62 = vmax.f32 %v7042_v19, 0.0  ;;  %v7076_v4 = vmax.f32 %v7040_v20, 0.0  ;;  %v13700_v11 = vld [vmem:[#allocation3 + $0x10] sm:$0xff]  }
 0x3d2   : > { %v7573_v28 = vrot.slane %v7571_v13, 6  ;;  %v7576_v12 = vrot.slane %v7574_v23, 7  ;;  %vm16495_vm12 = vnez %v16494_v59  ;;  %v7549_v51 = vrot.slane %v7547_v57, 4  ;;  %v13701_v42 = vld [vmem:[#allocation3 + $0x18] sm:$0xff]   ;;  %v13703_v52 = vld [vmem:[%s16200_s6 + $0x88] sm:$0xff]  }
 0x3d3   : > { %v7527_v3 = vor.u32 %v7526_v58, %v7523_v40  ;;  %v7551_v55 = vshrl.u32 %v11673_v0, 16  ;;  %v7554_v5 = vshll.u32 %v11673_v0, 16  ;;  %v7122_v2 = vsel %vm15021_vm1, %v7078_v62, 0.0  ;;  %v13702_v13 = vld [vmem:[#allocation3 + $0x20] sm:$0xff]   ;;  %v13704_v44 = vld [vmem:[#allocation3 + $0x28] sm:$0xff]   ;;  %v13710_v62 = vld [vmem:[%s16200_s6 + $0x98] sm:$0xff]  }
 0x3d4   : > { %v7577_v36 = vor.u32 %v7576_v12, %v7573_v28  ;;  %v11676_v46 = vpack.c.bf16 %v7122_v2, %v7122_v2  ;;  %v7120_v31 = vsel %vm16495_vm12, %v7076_v4, 0.0  ;;  %v8725_v18 = vrot.slane %v13697_v37, 1  ;;  %v13707_v40 = vld [vmem:[%s16200_s6 + $0x90] sm:$0xff]   ;;  %v13706_v20 = vld [vmem:[#allocation3 + $0x38] sm:$0xff]  }
 0x3d5   : > { %v7528_v35 = vsel %vm14076_vm7, %v7519_v39, %v7527_v3  ;;  %v7529_v48 = vrot.slane %v7527_v3, 4  ;;  %v7553_v30 = vrot.slane %v7551_v55, 6  ;;  %v7556_v9 = vrot.slane %v7554_v5, 7  ;;  %v13705_v12 = vld [vmem:[#allocation3 + $0x30] sm:$0xff]   ;;  %v13713_v3 = vld [vmem:[%s16200_s6 + $0xa0] sm:$0xff]   ;;  %v13709_v4 = vld [vmem:[#allocation3 + $0x48] sm:$0xff]  }
 0x3d6   : > { %7658 = vst [vmem:[#allocation3 + $0x7c] sm:$0xf] %v7528_v35  ;;  %v7581_v50 = vshrl.u32 %v11676_v46, 16  ;;  %v7584_v24 = vshll.u32 %v11676_v46, 16  ;;  %v11674_v56 = vpack.c.bf16 %v7120_v31, %v7120_v31  ;;  %v7579_v25 = vrot.slane %v7577_v36, 4  ;;  %v13719_v35 = vld [vmem:[%s16200_s6 + $0xb0] sm:$0xff]  }
 0x3d7   : > { %v7538_v26 = vsel %vm14076_vm7, %v7529_v48, %v15948_v45  ;;  %v7557_v38 = vor.u32 %v7556_v9, %v7553_v30  ;;  %v8726_v60 = vrot.slane %v13698_v10, 1  ;;  %v8728_v19 = vrot.slane %v13700_v11, 1  ;;  %v13722_v9 = vld [vmem:[%s16200_s6 + $0xb8] sm:$0xff]  }
 0x3d8   : > { %7659 = vst [vmem:[#allocation3 + $0x80] sm:$0xf] %v7538_v26  ;;  %v7583_v16 = vrot.slane %v7581_v50, 6  ;;  %v7586_v63 = vrot.slane %v7584_v24, 7  ;;  %v7561_v21 = vshrl.u32 %v11674_v56, 16  ;;  %v7564_v22 = vshll.u32 %v11674_v56, 16 }
 0x3d9   : > { %v7558_v8 = vsel %vm14076_vm7, %v7549_v51, %v7557_v38  ;;  %v7559_v43 = vrot.slane %v7557_v38, 4  ;;  %v8730_v39 = vrot.slane %v13701_v42, 1  ;;  %v8732_v58 = vrot.slane %v13702_v13, 1  ;;  %v13711_v24 = vld [vmem:[#allocation3 + $0x50] sm:$0xff]   ;;  %v13712_v31 = vld [vmem:[#allocation3 + $0x58] sm:$0xff]  }
 0x3da   : > { %7661 = vst [vmem:[#allocation3 + $0x88] sm:$0xf] %v7558_v8  ;;  %v7587_v17 = vor.u32 %v7586_v63, %v7583_v16  ;;  %v7563_v1 = vrot.slane %v7561_v21, 6  ;;  %v7566_v6 = vrot.slane %v7564_v22, 7  ;;  %v8734_v0 = vrot.slane %v13704_v44, 1  ;;  %v16032_v51 = vld [vmem:[%s16200_s6 + $0xc0] sm:$0xff]  }
 0x3db   : > { %v8736_v55 = vrot.slane %v13705_v12, 1  ;;  %v8738_v5 = vrot.slane %v13706_v20, 1  ;;  %v8742_v30 = vrot.slane %v13709_v4, 1  ;;  %v8744_v26 = vrot.slane %v13711_v24, 1  ;;  %v13715_v63 = vld [vmem:[#allocation3 + $0x68] sm:$0xff]   ;;  %v13732_v24 = vld [vmem:[#allocation3 + $0x38] sm:$0xff]  }
 0x3dc   : > { %v7588_v45 = vsel %vm14076_vm7, %v7579_v25, %v7587_v17  ;;  %v7589_v33 = vrot.slane %v7587_v17, 4  ;;  %v7567_v27 = vor.u32 %v7566_v6, %v7563_v1  ;;  %v8746_v38 = vrot.slane %v13712_v31, 1  ;;  %v13714_v25 = vld [vmem:[#allocation3 + $0x60] sm:$0xff]   ;;  %v13717_v17 = vld [vmem:[#allocation3 + $0x70] sm:$0xff]  }
 0x3dd   : > { %7664 = vst [vmem:[#allocation3 + $0x94] sm:$0xf] %v7588_v45  ;;  %v13693_v34 = vld [vmem:[#allocation3 + $0x78] sm:$0xff]   ;;  %v8748_v8 = vrot.slane %v13714_v25, 1  ;;  %v8750_v21 = vrot.slane %v13715_v63, 1  ;;  %v8752_v1 = vrot.slane %v13717_v17, 1 }
 0x3de   : > { %v7666_v7 = vsel %vm13967_vm2, %v7589_v33, %v7665_v32  ;;  %v7568_v15 = vsel %vm14076_vm7, %v7559_v43, %v7567_v27  ;;  %v7569_v49 = vrot.slane %v7567_v27, 4  ;;  %12632 = vmatmul.mubr.bf16.gmra.mrb[64].mxu1 %v13693_v34  ;;  %vm16497_vm2 = vcmask 1046528   ;;  %v13718_v43 = vld [vmem:[#allocation3 + $0x78] sm:$0xff]  }
 0x3df   : > { %7667 = vst [vmem:[#allocation3 + $0x98] sm:$0x3] %v7666_v7  ;;  %v13694_v54 = vld [vmem:[#allocation3 + $0x80] sm:$0xff]   ;;  %7662 = vst [vmem:[#allocation3 + $0x8c] sm:$0xf] %v7568_v15  ;;  %v8727_v29 = vsel %vm16497_vm2, %v8725_v18, %v8726_v60  ;;  %v8754_v6 = vrot.slane %v13718_v43, 1 }
 0x3e0   : > { %v7578_v57 = vsel %vm14076_vm7, %v7569_v49, %v7577_v36  ;;  %12635 = vmatprep.mubr.bf16.mxu1 %v13694_v54  ;;  %vm16498_vm1 = vmmov %vm16497_vm2  ;;  %v13708_v36 = vld [vmem:[#allocation3 + $0x40] sm:$0xff]   ;;  %v13724_v7 = vld [vmem:[#allocation3 + $0x8] sm:$0xfe]   ;;  %v9269_v54 = vshrl.u32 %v13725_v61, 16  ;;  %v9272_v37 = vshll.u32 %v13725_v61, 16  ;;  %v9317_v63 = vshll.u32 %v13732_v24, 16 }
 0x3e1   : > { %7663 = vst [vmem:[#allocation3 + $0x90] sm:$0xf] %v7578_v57  ;;  %v8729_v41 = vsel %vm16498_vm1, %v8726_v60, %v8728_v19  ;;  %vm16499_vm7 = vmmov %vm16498_vm1  ;;  %v8740_v48 = vrot.slane %v13708_v36, 1  ;;  %v13720_v33 = vld [vmem:[#allocation3 + $0x80] sm:$0xff]   ;;  %v8755_v27 = vsel %vm16498_vm1, %v8752_v1, %v8754_v6  ;;  %v9261_v57 = vshrl.u32 %v13724_v7, 16  ;;  %v13737_v17 = vld [vmem:[%s16200_s6 + $0xd8] sm:$0xff]  }
 0x3e2   : > { %v8731_v23 = vsel %vm16499_vm7, %v8728_v19, %v8730_v39  ;;  %vm16500_vm13 = vmmov %vm16498_vm1  ;;  %v8756_v15 = vrot.slane %v13720_v33, 1  ;;  %v9264_v10 = vshll.u32 %v13724_v7, 16  ;;  %v9274_v42 = vrot.slane %v9272_v37, 2  ;;  %v13728_v19 = vld [vmem:[#allocation3 + $0x20] sm:$0xff]  }
 0x3e3   : > { %v8733_v28 = vsel %vm16500_vm13, %v8730_v39, %v8732_v58  ;;  %vm16501_vm6 = vmmov %vm16498_vm1  ;;  %v9263_v39 = vrot.slane %v9261_v57, 1  ;;  %v9319_v43 = vrot.slane %v9317_v63, 2  ;;  %v13743_v57 = vld [vmem:[%s16200_s6 + $0xe8] sm:$0xff]  }
 0x3e4   : > { %vm16502_vm9 = vmmov %vm16498_vm1 }
 0x3e5   : > { %v8737_v2 = vsel %vm16502_vm9, %v8734_v0, %v8736_v55  ;;  %vm16503_vm4 = vmmov %vm16498_vm1 }
 0x3e6   : > { %v13696_v47 = vld [vmem:[#allocation3 + $0x88] sm:$0xff]   ;;  %v8739_v46 = vsel %vm16503_vm4, %v8736_v55, %v8738_v5  ;;  %vm16504_vm10 = vmmov %vm16498_vm1 }
 0x3e7   : > { %12636 = vmatmul.mubr.bf16.gmra.mrb[68].mxu1 %v13696_v47  ;;  %v8741_v50 = vsel %vm16504_vm10, %v8738_v5, %v8740_v48  ;;  %vm16505_vm15 = vmmov %vm16498_vm1  ;;  %v13721_v34 = vld [vmem:[#allocation3 + $0x88] sm:$0xff]   ;;  %v13727_v47 = vld [vmem:[#allocation3 + $0x18] sm:$0xff]  }
 0x3e8   : > { %12655 = vmatprep.mubr.bf16.mxu1 %v8727_v29  ;;  %v8743_v59 = vsel %vm16505_vm15, %v8740_v48, %v8742_v30  ;;  %vm16506_vm8 = vmmov %vm16498_vm1  ;;  %v8758_v49 = vrot.slane %v13721_v34, 1  ;;  %v13723_v60 = vld [vmem:[#allocation3 + $0x90] ss:$0 sps:$4 sm:$0x11]   ;;  %v9271_v29 = vrot.slane %v9269_v54, 1  ;;  %v9278_v13 = vshrl.u32 %v13727_v47, 16 }
 0x3e9   : > { %v8745_v56 = vsel %vm16506_vm8, %v8742_v30, %v8744_v26  ;;  %vm16507_vm5 = vmmov %vm16498_vm1  ;;  %v13731_v5 = vld [vmem:[#allocation3 + $0x30] sm:$0xff]   ;;  %v13730_v48 = vld [vmem:[%s16200_s6 + $0xc8] sm:$0xff]  }
 0x3ea   : > { %v8747_v16 = vsel %vm16507_vm5, %v8744_v26, %v8746_v38  ;;  %vm16508_vm3 = vmmov %vm16498_vm1  ;;  %v9275_v44 = vor.u32 %v9274_v42, %v9271_v29  ;;  %v9305_v4 = vshrl.u32 %v13731_v5, 16  ;;  %v13740_v34 = vld [vmem:[%s16200_s6 + $0xe0] sm:$0xff]  }
 0x3eb   : > { %v8749_v22 = vsel %vm16508_vm3, %v8746_v38, %v8748_v8  ;;  %vm16509_vm12 = vmmov %vm16498_vm1  ;;  %v13733_v38 = vld [vmem:[#allocation3 + $0x40] sm:$0xff]  }
 0x3ec   : > { %v8751_v32 = vsel %vm16509_vm12, %v8748_v8, %v8750_v21  ;;  %vm16510_vm2 = vmmov %vm16498_vm1  ;;  %v9307_v31 = vrot.slane %v9305_v4, 1 }
 0x3ed   : > { %v8753_v45 = vsel %vm16510_vm2, %v8750_v21, %v8752_v1  ;;  %vm16511_vm7 = vmmov %vm16498_vm1  ;;  %v9323_v21 = vshrl.u32 %v13733_v38, 16  ;;  %v13735_v1 = vld [vmem:[#allocation3 + $0x48] sm:$0xff]  }
 0x3ee   : > { %v8757_v18 = vsel %vm16511_vm7, %v8754_v6, %v8756_v15  ;;  %vm16512_vm13 = vmmov %vm16498_vm1  ;;  %v9332_v7 = vshrl.u32 %v13735_v1, 16 }
 0x3ef   : > { %12656 = vmatmul.mubr.bf16.vlgmr.msra.gmra.mrb[36].mxu1 %v8729_v41  ;;  %v8759_v11 = vsel %vm16512_vm13, %v8756_v15, %v8758_v49  ;;  %v8760_v41 = vrot.slane %v13723_v60, 1  ;;  %v9335_v15 = vshll.u32 %v13735_v1, 16 }
 0x3f0   : > { %12692 = vmatpush3.bf16.msra.mxu1 %v15786_v53  ;;  %12659 = vmatprep.mubr.bf16.mxu1 %v8731_v23  ;;  %v8735_v53 = vsel %vm16501_vm6, %v8732_v58, %v8734_v0  ;;  %v9281_v23 = vshll.u32 %v13727_v47, 16  ;;  %v9290_v58 = vshll.u32 %v13728_v19, 16  ;;  %vm16513_vm6 = vmmov %vm16498_vm1  ;;  %v13738_v47 = vld [vmem:[#allocation3 + $0x58] sm:$0xff]  }
 0x3f1   : > { %12693 = vmatprep.subr.bf16.mxu1 %v13703_v52  ;;  %v9337_v60 = vrot.slane %v9335_v15, 2 }
 0x3f2   : > { %v9283_v12 = vrot.slane %v9281_v23, 2  ;;  %v9292_v55 = vrot.slane %v9290_v58, 2  ;;  %v13749_v58 = vld [vmem:[%s16200_s6 + $0xf8] sm:$0xff]  }
 0x3f4   : > { %12694 = vmatpush3.bf16.msra.mxu1 %v13703_v52  ;;  %v9266_v52 = vrot.slane %v9264_v10, 2 }
 0x3f5   : > { %12695 = vmatprep.subr.bf16.mxu1 %v13707_v40 }
 0x3f6   : > { %v9267_v0 = vor.u32 %v9266_v52, %v9263_v39  ;;  %v13746_v39 = vld [vmem:[%s16200_s6 + $0xf0] sm:$0xff]  }
 0x3f7   : > { %12660 = vmatmul.mubr.bf16.gmra.mrb[40].mxu1 %v8733_v28  ;;  %v9280_v28 = vrot.slane %v9278_v13, 1  ;;  %v9353_v13 = vshll.u32 %v13738_v47, 16 }
 0x3f8   : > { %12663 = vmatprep.mubr.bf16.mxu1 %v8735_v53  ;;  %12696 = vmatpush3.bf16.msra.mxu1 %v13707_v40  ;;  %v9287_v40 = vshrl.u32 %v13728_v19, 16  ;;  %v13729_v53 = vld [vmem:[#allocation3 + $0x28] sm:$0xff]   ;;  %v9276_v20 = vsel %vm4123_vm14, %v9267_v0, %v9275_v44  ;;  %v13739_v19 = vld [vmem:[#allocation3 + $0x60] sm:$0xff]  }
 0x3f9   : > { %12697 = vmatprep.subr.bf16.mxu1 %v13710_v62  ;;  %v9299_v36 = vshll.u32 %v13729_v53, 16 }
 0x3fc   : > { %12698 = vmatpush3.bf16.msra.mxu1 %v13710_v62  ;;  %v8761_v62 = vsel %vm16513_vm6, %v8758_v49, %v8760_v41  ;;  %v9350_v41 = vshrl.u32 %v13738_v47, 16 }
 0x3fd   : > { %12699 = vmatprep.subr.bf16.mxu1 %v13713_v3 }
 0x3ff   : > { %12664 = vmatmul.mubr.bf16.gmra.mrb[44].mxu1 %v8737_v2  ;;  %v9296_v2 = vshrl.u32 %v13729_v53, 16 }
 0x400   : > { %12667 = vmatprep.mubr.bf16.mxu1 %v8739_v46  ;;  %12700 = vmatpush3.bf16.msra.mxu1 %v13713_v3  ;;  %v9289_v3 = vrot.slane %v9287_v40, 1  ;;  %v9362_v40 = vshll.u32 %v13739_v19, 16 }
 0x401   : > { %12701 = vmatprep.subr.bf16.mxu1 %v13716_v14 }
 0x402   : > { %v9293_v46 = vor.u32 %v9292_v55, %v9289_v3  ;;  %v9364_v3 = vrot.slane %v9362_v40, 2  ;;  %v13742_v55 = vld [vmem:[#allocation3 + $0x70] sm:$0xff]  }
 0x403   : > { %v9377_v4 = vshrl.u32 %v13742_v55, 16 }
 0x404   : > { %12702 = vmatpush3.bf16.msra.mxu1 %v13716_v14  ;;  %v9284_v14 = vor.u32 %v9283_v12, %v9280_v28  ;;  %v9355_v28 = vrot.slane %v9353_v13, 2  ;;  %v13741_v12 = vld [vmem:[#allocation3 + $0x68] sm:$0xff]   ;;  %v13751_v13 = vld [vmem:[#allocation3 + $0x10] sm:$0xfc]  }
 0x405   : > { %12703 = vmatprep.subr.bf16.mxu1 %v13719_v35  ;;  %v9928_v40 = vrot.slane %v13751_v13, 2 }
 0x406   : > { %v9285_v30 = vsel %vm4123_vm14, %v9275_v44, %v9284_v14  ;;  %v9359_v44 = vshrl.u32 %v13739_v19, 16 }
 0x407   : > { %12668 = vmatmul.mubr.bf16.gmra.mrb[48].mxu1 %v8741_v50  ;;  %v9301_v50 = vrot.slane %v9299_v36, 2  ;;  %v9371_v36 = vshll.u32 %v13741_v12, 16 }
 0x408   : > { %12671 = vmatprep.mubr.bf16.mxu1 %v8743_v59  ;;  %12704 = vmatpush3.bf16.msra.mxu1 %v13719_v35  ;;  %v9308_v35 = vshll.u32 %v13731_v5, 16  ;;  %v9294_v59 = vsel %vm4123_vm14, %v9284_v14, %v9293_v46  ;;  %v16078_v5 = vld [vmem:[%s16200_s6 + $0x100] sm:$0xff]  }
 0x409   : > { %12705 = vmatprep.subr.bf16.mxu1 %v13722_v9 }
 0x40a   : > { %v9310_v26 = vrot.slane %v9308_v35, 2  ;;  %v9380_v35 = vshll.u32 %v13742_v55, 16  ;;  %v13756_v55 = vld [vmem:[#allocation3 + $0x30] sm:$0xff]  }
 0x40c   : > { %12706 = vmatpush3.bf16.msra.mxu1 %v13722_v9  ;;  %v9298_v9 = vrot.slane %v9296_v2, 1  ;;  %v9311_v8 = vor.u32 %v9310_v26, %v9307_v31  ;;  %v9368_v2 = vshrl.u32 %v13741_v12, 16  ;;  %v9382_v31 = vrot.slane %v9380_v35, 2  ;;  %v13745_v26 = vld [vmem:[#allocation3 + $0x80] sm:$0xff]   ;;  %v13764_v35 = vld [vmem:[%s16200_s6 + $0x118] sm:$0xff]  }
 0x40d   : > { %12743 = vmatprep.subr.bf16.mxu1 %v16032_v51  ;;  %v9395_v63 = vshrl.u32 %v13745_v26, 16 }
 0x40e   : > { %v9302_v25 = vor.u32 %v9301_v50, %v9298_v9  ;;  %v9373_v9 = vrot.slane %v9371_v36, 2  ;;  %v13744_v50 = vld [vmem:[#allocation3 + $0x78] sm:$0xff]   ;;  %v13761_v36 = vld [vmem:[%s16200_s6 + $0x110] sm:$0xff]  }
 0x40f   : > { %12672 = vmatmul.mubr.bf16.gmra.mrb[52].mxu1 %v8745_v56  ;;  %v13734_v56 = vld [vmem:[%s16200_s6 + $0xd0] sm:$0xff]  }
 0x410   : > { %12675 = vmatprep.mubr.bf16.mxu1 %v8747_v16  ;;  %v9314_v16 = vshrl.u32 %v13732_v24, 16  ;;  %v9312_v6 = vsel %vm4123_vm14, %v9302_v25, %v9311_v8 }
 0x417   : > { %12676 = vmatmul.mubr.bf16.gmra.mrb[56].mxu1 %v8749_v22  ;;  %v9326_v22 = vshll.u32 %v13733_v38, 16 }
 0x418   : > { %12679 = vmatprep.mubr.bf16.mxu1 %v8751_v32  ;;  %v9316_v32 = vrot.slane %v9314_v16, 1 }
 0x419   : > { %v9328_v33 = vrot.slane %v9326_v22, 2 }
 0x41a   : > { %v9320_v61 = vor.u32 %v9319_v43, %v9316_v32  ;;  %v9397_v43 = vrot.slane %v9395_v63, 1 }
 0x41c   : > { %v9321_v10 = vsel %vm4123_vm14, %v9311_v8, %v9320_v61  ;;  %v9398_v8 = vshll.u32 %v13745_v26, 16 }
 0x41e   : > { %v9400_v1 = vrot.slane %v9398_v8, 2 }
 0x41f   : > { %12680 = vmatmul.mubr.bf16.gmra.mrb[60].mxu1 %v8753_v45  ;;  %v9325_v45 = vrot.slane %v9323_v21, 1 }
 0x420   : > { %12683 = vmatprep.mubr.bf16.mxu1 %v8755_v27  ;;  %v13736_v27 = vld [vmem:[#allocation3 + $0x50] sm:$0xff]  }
 0x421   : > { %v9329_v49 = vor.u32 %v9328_v33, %v9325_v45  ;;  %v9341_v54 = vshrl.u32 %v13736_v27, 16  ;;  %v9344_v37 = vshll.u32 %v13736_v27, 16 }
 0x423   : > { %v9343_v29 = vrot.slane %v9341_v54, 1  ;;  %v9346_v42 = vrot.slane %v9344_v37, 2  ;;  %v13750_v37 = vld [vmem:[#allocation3 + $0x98] ss:$0 sps:$4 sm:$0x33]  }
 0x424   : > { %v9422_v47 = vshrl.u32 %v13750_v37, 16 }
 0x425   : > { %v9347_v23 = vor.u32 %v9346_v42, %v9343_v29 }
 0x426   : > { %v9424_v19 = vrot.slane %v9422_v47, 1  ;;  %v13775_v47 = vld [vmem:[#allocation3 + $0x98] sm:$0xff]  }
 0x427   : > { %12684 = vmatmul.mubr.bf16.gmra.mrb[64].mxu1 %v8757_v18  ;;  %v9334_v18 = vrot.slane %v9332_v7, 1 }
 0x428   : > { %12687 = vmatprep.mubr.bf16.mxu1 %v8759_v11  ;;  %v9330_v11 = vsel %vm4123_vm14, %v9320_v61, %v9329_v49 }
 0x429   : > { %v9338_v52 = vor.u32 %v9337_v60, %v9334_v18 }
 0x42b   : > { %v9339_v0 = vsel %vm4123_vm14, %v9329_v49, %v9338_v52  ;;  %v9348_v53 = vsel %vm4123_vm14, %v9338_v52, %v9347_v23 }
 0x42f   : > { %12688 = vmatmul.mubr.bf16.gmra.mrb[68].mxu1 %v8761_v62  ;;  %v9352_v62 = vrot.slane %v9350_v41, 1  ;;  %v13752_v41 = vld [vmem:[#allocation3 + $0x18] sm:$0xff]  }
 0x430   : > { %12707 = vmatprep.mubr.bf16.mxu1 %v9276_v20  ;;  %v9361_v20 = vrot.slane %v9359_v44, 1  ;;  %v9929_v44 = vrot.slane %v13752_v41, 2  ;;  %v13778_v41 = vld [vmem:[#allocation3 + $0x10] sm:$0xf8]  }
 0x431   : > { %v9356_v14 = vor.u32 %v9355_v28, %v9352_v62  ;;  %v13755_v28 = vld [vmem:[#allocation3 + $0x28] sm:$0xff]  }
 0x432   : > { %v9930_v62 = vsel %vm4792_vm11, %v9928_v40, %v9929_v44 }
 0x437   : > { %12708 = vmatmul.mubr.bf16.vlgmr.msra.gmra.mrb[36].mxu1 %v9285_v30  ;;  %v9370_v30 = vrot.slane %v9368_v2, 1  ;;  %v13758_v2 = vld [vmem:[#allocation3 + $0x38] sm:$0xff]  }
 0x438   : > { %12744 = vmatpush3.bf16.msra.mxu1 %v16032_v51  ;;  %12711 = vmatprep.mubr.bf16.mxu1 %v9294_v59  ;;  %v9303_v51 = vsel %vm4123_vm14, %v9293_v46, %v9302_v25  ;;  %v9365_v46 = vor.u32 %v9364_v3, %v9361_v20  ;;  %v9379_v59 = vrot.slane %v9377_v4, 1  ;;  %v9389_v25 = vshll.u32 %v13744_v50, 16  ;;  %v13757_v20 = vld [vmem:[%s16200_s6 + $0x108] sm:$0xff]  }
 0x439   : > { %12745 = vmatprep.subr.bf16.mxu1 %v13730_v48  ;;  %v9374_v38 = vor.u32 %v9373_v9, %v9370_v30  ;;  %v9937_v4 = vrot.slane %v13758_v2, 2  ;;  %v13759_v30 = vld [vmem:[#allocation3 + $0x40] sm:$0xff]   ;;  %v13760_v9 = vld [vmem:[#allocation3 + $0x48] sm:$0xff]  }
 0x43a   : > { %v9366_v24 = vsel %vm4123_vm14, %v9356_v14, %v9365_v46  ;;  %v9383_v16 = vor.u32 %v9382_v31, %v9379_v59  ;;  %v9941_v59 = vrot.slane %v13760_v9, 2  ;;  %v13770_v31 = vld [vmem:[%s16200_s6 + $0x128] sm:$0xff]   ;;  %v13786_v9 = vld [vmem:[#allocation3 + $0x50] sm:$0xff]  }
 0x43b   : > { %v9375_v21 = vsel %vm4123_vm14, %v9365_v46, %v9374_v38  ;;  %v9935_v46 = vrot.slane %v13756_v55, 2  ;;  %v13783_v55 = vld [vmem:[#allocation3 + $0x38] sm:$0xff]  }
 0x43c   : > { %12746 = vmatpush3.bf16.msra.mxu1 %v13730_v48  ;;  %v9357_v48 = vsel %vm4123_vm14, %v9347_v23, %v9356_v14  ;;  %v9384_v32 = vsel %vm4123_vm14, %v9374_v38, %v9383_v16  ;;  %v13762_v38 = vld [vmem:[#allocation3 + $0x50] sm:$0xff]   ;;  %v10472_v2 = vrot.slane %v13783_v55, 3 }
 0x43d   : > { %12747 = vmatprep.subr.bf16.mxu1 %v13734_v56  ;;  %v9943_v63 = vrot.slane %v13762_v38, 2  ;;  %v13788_v38 = vld [vmem:[#allocation3 + $0x60] sm:$0xff]  }
 0x43f   : > { %12712 = vmatmul.mubr.bf16.gmra.mrb[40].mxu1 %v9303_v51  ;;  %v13747_v51 = vld [vmem:[#allocation3 + $0x88] sm:$0xff]  }
 0x440   : > { %12715 = vmatprep.mubr.bf16.mxu1 %v9312_v6  ;;  %12748 = vmatpush3.bf16.msra.mxu1 %v13734_v56  ;;  %v9386_v56 = vshrl.u32 %v13744_v50, 16  ;;  %v13748_v6 = vld [vmem:[#allocation3 + $0x90] sm:$0xff]   ;;  %v9404_v33 = vshrl.u32 %v13747_v51, 16  ;;  %v9407_v27 = vshll.u32 %v13747_v51, 16  ;;  %v13767_v50 = vld [vmem:[%s16200_s6 + $0x120] sm:$0xff]  }
 0x441   : > { %12749 = vmatprep.subr.bf16.mxu1 %v13737_v17  ;;  %v9413_v61 = vshrl.u32 %v13748_v6, 16  ;;  %v9416_v7 = vshll.u32 %v13748_v6, 16 }
 0x442   : > { %v9388_v22 = vrot.slane %v9386_v56, 1  ;;  %v9406_v49 = vrot.slane %v9404_v33, 1  ;;  %v9409_v54 = vrot.slane %v9407_v27, 2  ;;  %v13769_v27 = vld [vmem:[#allocation3 + $0x78] sm:$0xff]  }
 0x443   : > { %v9418_v18 = vrot.slane %v9416_v7, 2 }
 0x444   : > { %12750 = vmatpush3.bf16.msra.mxu1 %v13737_v17  ;;  %v9391_v17 = vrot.slane %v9389_v25, 2  ;;  %v9410_v60 = vor.u32 %v9409_v54, %v9406_v49  ;;  %v13763_v25 = vld [vmem:[#allocation3 + $0x58] sm:$0xff]   ;;  %v13772_v54 = vld [vmem:[#allocation3 + $0x88] sm:$0xff]  }
 0x445   : > { %12751 = vmatprep.subr.bf16.mxu1 %v13740_v34  ;;  %v9945_v8 = vrot.slane %v13763_v25, 2  ;;  %v13789_v25 = vld [vmem:[#allocation3 + $0x68] sm:$0xff]  }
 0x446   : > { %v9392_v45 = vor.u32 %v9391_v17, %v9388_v22  ;;  %v9944_v22 = vsel %vm4792_vm11, %v9941_v59, %v9943_v63  ;;  %v13765_v17 = vld [vmem:[#allocation3 + $0x60] sm:$0xff]  }
 0x447   : > { %12716 = vmatmul.mubr.bf16.gmra.mrb[44].mxu1 %v9321_v10  ;;  %v9415_v10 = vrot.slane %v9413_v61, 1  ;;  %v9946_v51 = vsel %vm4792_vm11, %v9943_v63, %v9945_v8  ;;  %v9953_v61 = vrot.slane %v13769_v27, 2  ;;  %v10484_v63 = vrot.slane %v13789_v25, 3 }
 0x448   : > { %12719 = vmatprep.mubr.bf16.mxu1 %v9330_v11  ;;  %12752 = vmatpush3.bf16.msra.mxu1 %v13740_v34  ;;  %v9401_v34 = vor.u32 %v9400_v1, %v9397_v43  ;;  %v9393_v15 = vsel %vm4123_vm14, %v9383_v16, %v9392_v45  ;;  %v9425_v11 = vshll.u32 %v13750_v37, 16  ;;  %v13773_v16 = vld [vmem:[%s16200_s6 + $0x130] sm:$0xff]   ;;  %v9947_v43 = vrot.slane %v13765_v17, 2  ;;  %v13791_v17 = vld [vmem:[#allocation3 + $0x78] sm:$0xff]  }
 0x449   : > { %12753 = vmatprep.subr.bf16.mxu1 %v13743_v57  ;;  %v9419_v29 = vor.u32 %v9418_v18, %v9415_v10  ;;  %v13774_v18 = vld [vmem:[#allocation3 + $0x90] sm:$0xff]  }
 0x44a   : > { %v9411_v42 = vsel %vm4123_vm14, %v9401_v34, %v9410_v60  ;;  %v9948_v6 = vsel %vm4792_vm11, %v9945_v8, %v9947_v43 }
 0x44b   : > { %v9420_v52 = vsel %vm4123_vm14, %v9410_v60, %v9419_v29 }
 0x44c   : > { %12754 = vmatpush3.bf16.msra.mxu1 %v13743_v57  ;;  %v9402_v57 = vsel %vm4123_vm14, %v9392_v45, %v9401_v34  ;;  %v13768_v45 = vld [vmem:[#allocation3 + $0x70] sm:$0xff]  }
 0x44d   : > { %12755 = vmatprep.subr.bf16.mxu1 %v13746_v39  ;;  %v9951_v34 = vrot.slane %v13768_v45, 2  ;;  %v13793_v45 = vld [vmem:[#allocation3 + $0x88] sm:$0xff]  }
 0x44e   : > { %v10492_v27 = vrot.slane %v13793_v45, 3 }
 0x44f   : > { %12720 = vmatmul.mubr.bf16.gmra.mrb[48].mxu1 %v9339_v0  ;;  %v13754_v0 = vld [vmem:[#allocation3 + $0x20] sm:$0xff]   ;;  %v9954_v49 = vsel %vm4792_vm11, %v9951_v34, %v9953_v61 }
 0x450   : > { %12723 = vmatprep.mubr.bf16.mxu1 %v9348_v53  ;;  %12756 = vmatpush3.bf16.msra.mxu1 %v13746_v39  ;;  %v9427_v39 = vrot.slane %v9425_v11, 2  ;;  %v9931_v12 = vrot.slane %v13754_v0, 2  ;;  %v9933_v53 = vrot.slane %v13755_v28, 2  ;;  %v9959_v11 = vrot.slane %v13774_v18, 2 }
 0x451   : > { %12757 = vmatprep.subr.bf16.mxu1 %v13749_v58 }
 0x452   : > { %v9428_v23 = vor.u32 %v9427_v39, %v9424_v19  ;;  %v9932_v3 = vsel %vm4792_vm11, %v9929_v44, %v9931_v12  ;;  %v9934_v14 = vsel %vm4792_vm11, %v9931_v12, %v9933_v53  ;;  %v13777_v19 = vld [vmem:[#allocation3 + $0xa0] ss:$0 sps:$4 sm:$0x33]   ;;  %v10463_v44 = vrot.slane %v13778_v41, 3 }
 0x453   : > { %v9963_v13 = vrot.slane %v13777_v19, 2 }
 0x454   : > { %12758 = vmatpush3.bf16.msra.mxu1 %v13749_v58  ;;  %v9429_v58 = vsel %vm4123_vm14, %v9419_v29, %v9428_v23  ;;  %v9961_v29 = vrot.slane %v13775_v47, 2 }
 0x455   : > { %12795 = vmatprep.subr.bf16.mxu1 %v16078_v5 }
 0x456   : > { %v9962_v39 = vsel %vm4792_vm11, %v9959_v11, %v9961_v29  ;;  %v9964_v40 = vsel %vm4792_vm11, %v9961_v29, %v9963_v13 }
 0x457   : > { %12724 = vmatmul.mubr.bf16.gmra.mrb[52].mxu1 %v9357_v48  ;;  %v9936_v48 = vsel %vm4792_vm11, %v9933_v53, %v9935_v46 }
 0x458   : > { %12727 = vmatprep.mubr.bf16.mxu1 %v9366_v24  ;;  %v9939_v24 = vrot.slane %v13759_v30, 2 }
 0x45a   : > { %v9940_v26 = vsel %vm4792_vm11, %v9937_v4, %v9939_v24  ;;  %v9942_v56 = vsel %vm4792_vm11, %v9939_v24, %v9941_v59  ;;  %v13787_v24 = vld [vmem:[#allocation3 + $0x58] sm:$0xff]   ;;  %v10478_v59 = vrot.slane %v13786_v9, 3 }
 0x45f   : > { %12728 = vmatmul.mubr.bf16.gmra.mrb[56].mxu1 %v9375_v21  ;;  %v13776_v21 = vld [vmem:[%s16200_s6 + $0x138] sm:$0xff]  }
 0x460   : > { %12731 = vmatprep.mubr.bf16.mxu1 %v9384_v32  ;;  %v13766_v32 = vld [vmem:[#allocation3 + $0x68] sm:$0xff]  }
 0x461   : > { %v9949_v1 = vrot.slane %v13766_v32, 2  ;;  %v10488_v32 = vrot.slane %v13791_v17, 3 }
 0x463   : > { %v9950_v33 = vsel %vm4792_vm11, %v9947_v43, %v9949_v1  ;;  %v9952_v7 = vsel %vm4792_vm11, %v9949_v1, %v9951_v34  ;;  %v13792_v1 = vld [vmem:[#allocation3 + $0x80] sm:$0xff]  }
 0x467   : > { %12732 = vmatmul.mubr.bf16.gmra.mrb[60].mxu1 %v9393_v15  ;;  %v13771_v15 = vld [vmem:[#allocation3 + $0x80] sm:$0xff]  }
 0x468   : > { %12735 = vmatprep.mubr.bf16.mxu1 %v9402_v57  ;;  %v9955_v37 = vrot.slane %v13771_v15, 2  ;;  %v9957_v57 = vrot.slane %v13772_v54, 2  ;;  %v13795_v15 = vld [vmem:[#allocation3 + $0x98] sm:$0xff]  }
 0x469   : > { %v10496_v54 = vrot.slane %v13795_v15, 3 }
 0x46a   : > { %v9956_v10 = vsel %vm4792_vm11, %v9953_v61, %v9955_v37  ;;  %v9958_v60 = vsel %vm4792_vm11, %v9955_v37, %v9957_v57  ;;  %v13794_v61 = vld [vmem:[#allocation3 + $0x90] sm:$0xff]  }
 0x46f   : > { %12736 = vmatmul.mubr.bf16.gmra.mrb[64].mxu1 %v9411_v42  ;;  %v9960_v42 = vsel %vm4792_vm11, %v9957_v57, %v9959_v11  ;;  %v13796_v57 = vld [vmem:[#allocation3 + $0xa0] ss:$0 sps:$4 sm:$0x77]  }
 0x470   : > { %12739 = vmatprep.mubr.bf16.mxu1 %v9420_v52  ;;  %v13779_v52 = vld [vmem:[#allocation3 + $0x18] sm:$0xff]   ;;  %v10498_v18 = vrot.slane %v13796_v57, 3 }
 0x471   : > { %v10464_v23 = vrot.slane %v13779_v52, 3 }
 0x473   : > { %v10465_v0 = vsel %vm6532_vm0, %v10463_v44, %v10464_v23 }
 0x477   : > { %12740 = vmatmul.mubr.bf16.gmra.mrb[68].mxu1 %v9429_v58  ;;  %v13780_v58 = vld [vmem:[#allocation3 + $0x20] sm:$0xff]  }
 0x478   : > { %12759 = vmatprep.mubr.bf16.mxu1 %v9930_v62  ;;  %v13781_v62 = vld [vmem:[#allocation3 + $0x28] sm:$0xff]   ;;  %v10466_v28 = vrot.slane %v13780_v58, 3 }
 0x479   : > { %v10468_v12 = vrot.slane %v13781_v62, 3 }
 0x47a   : > { %v10467_v53 = vsel %vm6532_vm0, %v10464_v23, %v10466_v28 }
 0x47f   : > { %12760 = vmatmul.mubr.bf16.vlgmr.msra.gmra.mrb[36].mxu1 %v9932_v3  ;;  %v10469_v3 = vsel %vm6532_vm0, %v10466_v28, %v10468_v12 }
 0x480   : > { %12796 = vmatpush3.bf16.msra.mxu1 %v16078_v5  ;;  %12763 = vmatprep.mubr.bf16.mxu1 %v9934_v14  ;;  %v9938_v5 = vsel %vm4792_vm11, %v9935_v46, %v9937_v4  ;;  %v13784_v46 = vld [vmem:[#allocation3 + $0x40] sm:$0xff]  }
 0x481   : > { %12797 = vmatprep.subr.bf16.mxu1 %v13757_v20 }
 0x484   : > { %12798 = vmatpush3.bf16.msra.mxu1 %v13757_v20  ;;  %v13782_v20 = vld [vmem:[#allocation3 + $0x30] sm:$0xff]  }
 0x485   : > { %12799 = vmatprep.subr.bf16.mxu1 %v13761_v36  ;;  %v10470_v14 = vrot.slane %v13782_v20, 3 }
 0x487   : > { %12764 = vmatmul.mubr.bf16.gmra.mrb[40].mxu1 %v9936_v48  ;;  %v10473_v4 = vsel %vm6532_vm0, %v10470_v14, %v10472_v2  ;;  %v10474_v48 = vrot.slane %v13784_v46, 3 }
 0x488   : > { %12767 = vmatprep.mubr.bf16.mxu1 %v9938_v5  ;;  %12800 = vmatpush3.bf16.msra.mxu1 %v13761_v36  ;;  %v10471_v36 = vsel %vm6532_vm0, %v10468_v12, %v10470_v14 }
 0x489   : > { %12801 = vmatprep.subr.bf16.mxu1 %v13764_v35  ;;  %v10475_v5 = vsel %vm6532_vm0, %v10472_v2, %v10474_v48 }
 0x48c   : > { %12802 = vmatpush3.bf16.msra.mxu1 %v13764_v35  ;;  %v13785_v35 = vld [vmem:[#allocation3 + $0x48] sm:$0xff]  }
 0x48d   : > { %12803 = vmatprep.subr.bf16.mxu1 %v13767_v50  ;;  %v10476_v30 = vrot.slane %v13785_v35, 3 }
 0x48f   : > { %12768 = vmatmul.mubr.bf16.gmra.mrb[44].mxu1 %v9940_v26  ;;  %v10479_v26 = vsel %vm6532_vm0, %v10476_v30, %v10478_v59 }
 0x490   : > { %12771 = vmatprep.mubr.bf16.mxu1 %v9942_v56  ;;  %12804 = vmatpush3.bf16.msra.mxu1 %v13767_v50  ;;  %v10477_v50 = vsel %vm6532_vm0, %v10474_v48, %v10476_v30 }
 0x491   : > { %12805 = vmatprep.subr.bf16.mxu1 %v13770_v31 }
 0x494   : > { %12806 = vmatpush3.bf16.msra.mxu1 %v13770_v31  ;;  %v10480_v31 = vrot.slane %v13787_v24, 3 }
 0x495   : > { %12807 = vmatprep.subr.bf16.mxu1 %v13773_v16 }
 0x496   : > { %v10481_v56 = vsel %vm6532_vm0, %v10478_v59, %v10480_v31 }
 0x497   : > { %12772 = vmatmul.mubr.bf16.gmra.mrb[48].mxu1 %v9944_v22 }
 0x498   : > { %12775 = vmatprep.mubr.bf16.mxu1 %v9946_v51  ;;  %12808 = vmatpush3.bf16.msra.mxu1 %v13773_v16  ;;  %v10482_v16 = vrot.slane %v13788_v38, 3 }
 0x499   : > { %12809 = vmatprep.subr.bf16.mxu1 %v13776_v21 }
 0x49a   : > { %v10483_v8 = vsel %vm6532_vm0, %v10480_v31, %v10482_v16  ;;  %v10485_v22 = vsel %vm6532_vm0, %v10482_v16, %v10484_v63 }
 0x49c   : > { %12810 = vmatpush3.bf16.msra.mxu1 %v13776_v21  ;;  %v13790_v21 = vld [vmem:[#allocation3 + $0x70] sm:$0xff]  }
 0x49d   : > { %v10486_v51 = vrot.slane %v13790_v21, 3 }
 0x49f   : > { %12776 = vmatmul.mubr.bf16.gmra.mrb[52].mxu1 %v9948_v6  ;;  %v10487_v43 = vsel %vm6532_vm0, %v10484_v63, %v10486_v51  ;;  %v10489_v6 = vsel %vm6532_vm0, %v10486_v51, %v10488_v32 }
 0x4a0   : > { %12779 = vmatprep.mubr.bf16.mxu1 %v9950_v33  ;;  %v10490_v33 = vrot.slane %v13792_v1, 3 }
 0x4a2   : > { %v10491_v34 = vsel %vm6532_vm0, %v10488_v32, %v10490_v33 }
 0x4a7   : > { %12780 = vmatmul.mubr.bf16.gmra.mrb[56].mxu1 %v9952_v7  ;;  %v10493_v7 = vsel %vm6532_vm0, %v10490_v33, %v10492_v27 }
 0x4a8   : > { %12783 = vmatprep.mubr.bf16.mxu1 %v9954_v49  ;;  %v10494_v49 = vrot.slane %v13794_v61, 3 }
 0x4aa   : > { %v10495_v37 = vsel %vm6532_vm0, %v10492_v27, %v10494_v49 }
 0x4af   : > { %12784 = vmatmul.mubr.bf16.gmra.mrb[60].mxu1 %v9956_v10  ;;  %v10497_v10 = vsel %vm6532_vm0, %v10494_v49, %v10496_v54 }
 0x4b0   : > { %12787 = vmatprep.mubr.bf16.mxu1 %v9958_v60  ;;  %v10499_v60 = vsel %vm6532_vm0, %v10496_v54, %v10498_v18 }
 0x4b7   : > { %12788 = vmatmul.mubr.bf16.gmra.mrb[64].mxu1 %v9960_v42 }
 0x4b8   : > { %12791 = vmatprep.mubr.bf16.mxu1 %v9962_v39 }
 0x4bf   : > { %12792 = vmatmul.mubr.bf16.gmra.mrb[68].mxu1 %v9964_v40 }
 0x4c0   : > { %12811 = vmatprep.mubr.bf16.mxu1 %v10465_v0 }
 0x4c7   : > { %12812 = vmatmul.mubr.bf16.vlgmr.msra.gmra.mrb[36].mxu1 %v10467_v53 }
 0x4c8   : > { %12815 = vmatprep.mubr.bf16.mxu1 %v10469_v3 }
 0x4cf   : > { %12816 = vmatmul.mubr.bf16.gmra.mrb[40].mxu1 %v10471_v36 }
 0x4d0   : > { %12819 = vmatprep.mubr.bf16.mxu1 %v10473_v4 }
 0x4d7   : > { %12820 = vmatmul.mubr.bf16.gmra.mrb[44].mxu1 %v10475_v5 }
 0x4d8   : > { %12823 = vmatprep.mubr.bf16.mxu1 %v10477_v50 }
 0x4df   : > { %12824 = vmatmul.mubr.bf16.gmra.mrb[48].mxu1 %v10479_v26 }
 0x4e0   : > { %12827 = vmatprep.mubr.bf16.mxu1 %v10481_v56 }
 0x4e7   : > { %12828 = vmatmul.mubr.bf16.gmra.mrb[52].mxu1 %v10483_v8 }
 0x4e8   : > { %12831 = vmatprep.mubr.bf16.mxu1 %v10485_v22 }
 0x4ef   : > { %12832 = vmatmul.mubr.bf16.gmra.mrb[56].mxu1 %v10487_v43 }
 0x4f0   : > { %12835 = vmatprep.mubr.bf16.mxu1 %v10489_v6 }
 0x4f7   : > { %12836 = vmatmul.mubr.bf16.gmra.mrb[60].mxu1 %v10491_v34 }
 0x4f8   : > { %12839 = vmatprep.mubr.bf16.mxu1 %v10493_v7 }
 0x4ff   : > { %12840 = vmatmul.mubr.bf16.gmra.mrb[64].mxu1 %v10495_v37 }
 0x500   : > { %12843 = vmatprep.mubr.bf16.mxu1 %v10497_v10 }
 0x507   : > { %12844 = vmatmul.mubr.bf16.gmra.mrb[68].mxu1 %v10499_v60 }
 0x59a   : > { %v12813_v47 = vpop.f32.mrb[36].mxu1 }
 0x59b   : > { %10853 = vst [vmem:[%s16153_s23 + $0x10] sm:$0xff] %v12813_v47  ;;  %v10600_v11 = vpop.f32.mrb[37].mxu1 }
 0x59c   : > { %10851 = vst [vmem:[%s16153_s23] sm:$0xff] %v10600_v11  ;;  %v12814_v29 = vpop.f32.mrb[38].mxu1 }
 0x59d   : > { %10854 = vst [vmem:[%s16153_s23 + $0x18] sm:$0xff] %v12814_v29  ;;  %v10603_v42 = vpop.f32.mrb[39].mxu1 }
 0x59e   : > { %10852 = vst [vmem:[%s16153_s23 + $0x8] sm:$0xff] %v10603_v42 }
 0x5a2   : > { %v12817_v19 = vpop.f32.mrb[40].mxu1 }
 0x5a3   : > { %10857 = vst [vmem:[%s16153_s23 + $0x30] sm:$0xff] %v12817_v19  ;;  %v10616_v39 = vpop.f32.mrb[41].mxu1 }
 0x5a4   : > { %10855 = vst [vmem:[%s16153_s23 + $0x20] sm:$0xff] %v10616_v39  ;;  %v12818_v52 = vpop.f32.mrb[42].mxu1 }
 0x5a5   : > { %10858 = vst [vmem:[%s16153_s23 + $0x38] sm:$0xff] %v12818_v52  ;;  %v10619_v41 = vpop.f32.mrb[43].mxu1 }
 0x5a6   : > { %10856 = vst [vmem:[%s16153_s23 + $0x28] sm:$0xff] %v10619_v41 }
 0x5aa   : > { %v12821_v13 = vpop.f32.mrb[44].mxu1 }
 0x5ab   : > { %10861 = vst [vmem:[%s16153_s23 + $0x50] sm:$0xff] %v12821_v13  ;;  %v10632_v23 = vpop.f32.mrb[45].mxu1 }
 0x5ac   : > { %10859 = vst [vmem:[%s16153_s23 + $0x40] sm:$0xff] %v10632_v23  ;;  %v12822_v44 = vpop.f32.mrb[46].mxu1 }
 0x5ad   : > { %10862 = vst [vmem:[%s16153_s23 + $0x58] sm:$0xff] %v12822_v44  ;;  %v10635_v40 = vpop.f32.mrb[47].mxu1 }
 0x5ae   : > { %10860 = vst [vmem:[%s16153_s23 + $0x48] sm:$0xff] %v10635_v40 }
 0x5b2   : > { %v12825_v58 = vpop.f32.mrb[48].mxu1 }
 0x5b3   : > { %10865 = vst [vmem:[%s16153_s23 + $0x70] sm:$0xff] %v12825_v58  ;;  %v10648_v0 = vpop.f32.mrb[49].mxu1 }
 0x5b4   : > { %10863 = vst [vmem:[%s16153_s23 + $0x60] sm:$0xff] %v10648_v0  ;;  %v12826_v62 = vpop.f32.mrb[50].mxu1 }
 0x5b5   : > { %10866 = vst [vmem:[%s16153_s23 + $0x78] sm:$0xff] %v12826_v62  ;;  %v10651_v28 = vpop.f32.mrb[51].mxu1 }
 0x5b6   : > { %10864 = vst [vmem:[%s16153_s23 + $0x68] sm:$0xff] %v10651_v28 }
 0x5ba   : > { %v12829_v12 = vpop.f32.mrb[52].mxu1 }
 0x5bb   : > { %10869 = vst [vmem:[%s16153_s23 + $0x90] sm:$0xff] %v12829_v12  ;;  %v10664_v53 = vpop.f32.mrb[53].mxu1 }
 0x5bc   : > { %10867 = vst [vmem:[%s16153_s23 + $0x80] sm:$0xff] %v10664_v53  ;;  %v12830_v20 = vpop.f32.mrb[54].mxu1 }
 0x5bd   : > { %10870 = vst [vmem:[%s16153_s23 + $0x98] sm:$0xff] %v12830_v20  ;;  %v10667_v3 = vpop.f32.mrb[55].mxu1 }
 0x5be   : > { %10868 = vst [vmem:[%s16153_s23 + $0x88] sm:$0xff] %v10667_v3 }
 0x5c2   : > { %v12833_v55 = vpop.f32.mrb[56].mxu1 }
 0x5c3   : > { %10873 = vst [vmem:[%s16153_s23 + $0xb0] sm:$0xff] %v12833_v55  ;;  %v10680_v14 = vpop.f32.mrb[57].mxu1 }
 0x5c4   : > { %10871 = vst [vmem:[%s16153_s23 + $0xa0] sm:$0xff] %v10680_v14  ;;  %v12834_v2 = vpop.f32.mrb[58].mxu1 }
 0x5c5   : > { %10874 = vst [vmem:[%s16153_s23 + $0xb8] sm:$0xff] %v12834_v2  ;;  %v10683_v36 = vpop.f32.mrb[59].mxu1 }
 0x5c6   : > { %10872 = vst [vmem:[%s16153_s23 + $0xa8] sm:$0xff] %v10683_v36 }
 0x5ca   : > { %v12837_v46 = vpop.f32.mrb[60].mxu1 }
 0x5cb   : > { %10877 = vst [vmem:[%s16153_s23 + $0xd0] sm:$0xff] %v12837_v46  ;;  %v10696_v4 = vpop.f32.mrb[61].mxu1 }
 0x5cc   : > { %10875 = vst [vmem:[%s16153_s23 + $0xc0] sm:$0xff] %v10696_v4  ;;  %v12838_v35 = vpop.f32.mrb[62].mxu1 }
 0x5cd   : > { %10878 = vst [vmem:[%s16153_s23 + $0xd8] sm:$0xff] %v12838_v35  ;;  %v10699_v48 = vpop.f32.mrb[63].mxu1 }
 0x5ce   : > { %10876 = vst [vmem:[%s16153_s23 + $0xc8] sm:$0xff] %v10699_v48 }
 0x5d2   : > { %v12841_v30 = vpop.f32.mrb[64].mxu1 }
 0x5d3   : > { %10881 = vst [vmem:[%s16153_s23 + $0xf0] sm:$0xff] %v12841_v30  ;;  %v10712_v5 = vpop.f32.mrb[65].mxu1 }
 0x5d4   : > { %10879 = vst [vmem:[%s16153_s23 + $0xe0] sm:$0xff] %v10712_v5  ;;  %v12842_v9 = vpop.f32.mrb[66].mxu1 }
 0x5d5   : > { %10882 = vst [vmem:[%s16153_s23 + $0xf8] sm:$0xff] %v12842_v9  ;;  %v10715_v50 = vpop.f32.mrb[67].mxu1 }
 0x5d6   : > { %10880 = vst [vmem:[%s16153_s23 + $0xe8] sm:$0xff] %v10715_v50 }
 0x5da   : > { %v12845_v24 = vpop.f32.mrb[68].mxu1 }
 0x5db   : > { %10885 = vst [vmem:[%s16153_s23 + $0x110] sm:$0xff] %v12845_v24  ;;  %v10728_v59 = vpop.f32.mrb[69].mxu1 }
 0x5dc   : > { %10883 = vst [vmem:[%s16153_s23 + $0x100] sm:$0xff] %v10728_v59  ;;  %v12846_v31 = vpop.f32.mrb[70].mxu1 }
 0x5dd   : > { %10886 = vst [vmem:[%s16153_s23 + $0x118] sm:$0xff] %v12846_v31  ;;  %v10731_v26 = vpop.f32.mrb[71].mxu1 }
 0x5de   : > { %10884 = vst [vmem:[%s16153_s23 + $0x108] sm:$0xff] %v10731_v26 }
 0x5df PF: > { %s20_s13 = sadd.s32 1, %s13854_s13  }
 0x5e0   : > { %p17_p4 = scmp.ge.s32.totalorder %s20_s13, 4  }
 0x5e2   :  { %19 = sbr.rel (!%p17_p4) target bundleno = 1 (0x1), region = 102 }

</bundles_post_ra>
